<compile_context>
chip_gen: v7x
topology: tpu7x:2x2x1
jax: 0.10.0
libtpu: 0.0.40
codegen_flags: <defaults>
</compile_context>

<pallas_src>
import functools

import jax
import jax.numpy as jnp
from jax.experimental import pallas as pl
from jax.experimental.pallas import tpu as pltpu


def mlp_kernel(x_ref, w1_ref, b1_ref, w2_ref, b2_ref, o_ref, *, compute_dtype):
    """Fused fc1 + Swish + fc2 on one row-tile of tokens.

    Matmul inputs are cast to `compute_dtype` (bf16) for the MXU; both matmuls
    accumulate in f32, Swish + bias-adds stay in f32, single cast at the final
    store.
    """
    x = x_ref[...].astype(compute_dtype)                        # (tm, C)
    # fc1: (tm, C) @ (C, H) -> f32 accumulator, + f32 bias
    h = jnp.dot(x, w1_ref[...], preferred_element_type=jnp.float32)
    h = h + b1_ref[...]
    # Swish / SiLU in f32 (sigmoid -> EUP slot)
    h = h * jax.nn.sigmoid(h)
    # dropout: identity in eval mode
    # fc2: cast activations to the MXU input dtype, accumulate in f32
    y = jnp.dot(h.astype(w2_ref.dtype), w2_ref[...],
                preferred_element_type=jnp.float32)
    y = y + b2_ref[...]
    # dropout: identity in eval mode
    o_ref[...] = y.astype(o_ref.dtype)


def _round_up(x, m):
    return ((x + m - 1) // m) * m


def mlp_forward(x, w1_t, b1, w2_t, b2, *, tile_m=256, compute_dtype=jnp.bfloat16):
    """x: (B, T, C); w1_t: (C, H); b1: (H,); w2_t: (H, C); b2: (C,)."""
    B, T, C = x.shape
    H = w1_t.shape[1]
    M = B * T

    # Pad the token axis so any (B, T) works with a large MXU-aligned tile.
    Mp = _round_up(M, tile_m)
    grid_m = Mp // tile_m

    x2d = x.reshape(M, C)
    if Mp != M:
        x2d = jnp.pad(x2d, ((0, Mp - M), (0, 0)))

    # Weights in the MXU input dtype; biases stay f32 (added to the f32 acc).
    w1c = w1_t.astype(compute_dtype)
    w2c = w2_t.astype(compute_dtype)
    b1_2d = b1.reshape(1, H).astype(jnp.float32)
    b2_2d = b2.reshape(1, C).astype(jnp.float32)

    # VMEM budget: weights (x2 covers the double-buffer fallback), streamed
    # x/out tiles (2 bufs each), f32 hidden intermediate + temps, + headroom.
    cb = jnp.dtype(compute_dtype).itemsize
    ib = jnp.dtype(x.dtype).itemsize
    est = (2 * (C * H + H * C) * cb          # W1^T, W2^T
           + 2 * (H + C) * 4                 # biases
           + 2 * tile_m * C * ib             # streamed x tiles (2 bufs)
           + 2 * tile_m * C * ib             # streamed out tiles (2 bufs)
           + 4 * tile_m * H * 4)             # f32 hidden intermediate + temps
    vmem_limit = min(max(int(est * 1.5) + (4 << 20), 16 << 20), 64 << 20)

    x_spec = pl.BlockSpec((tile_m, C), lambda i: (i, 0))
    out_spec = pl.BlockSpec((tile_m, C), lambda i: (i, 0))

    def _weight_spec(shape, mode):
        # Constant block index -> weights DMA'd once and kept resident.
        if mode is None:
            return pl.BlockSpec(shape, lambda i: (0, 0))
        return pl.BlockSpec(shape, lambda i: (0, 0), pipeline_mode=mode)

    kernel = functools.partial(mlp_kernel, compute_dtype=compute_dtype)

    def _call(weight_mode):
        grid_spec = pltpu.PrefetchScalarGridSpec(
            num_scalar_prefetch=0,
            grid=(grid_m,),
            in_specs=[
                x_spec,                              # x row-tile (streamed)
                _weight_spec((C, H), weight_mode),   # W1^T (resident)
                _weight_spec((1, H), weight_mode),   # b1
                _weight_spec((H, C), weight_mode),   # W2^T (resident)
                _weight_spec((1, C), weight_mode),   # b2
            ],
            out_specs=out_spec,
        )
        return pl.pallas_call(
            kernel,
            out_shape=jax.ShapeDtypeStruct((Mp, C), x.dtype),
            grid_spec=grid_spec,
            compiler_params=pltpu.CompilerParams(
                # Row tiles are independent; lets v7x shard the grid over 2 TCs.
                dimension_semantics=("parallel",),
                vmem_limit_bytes=vmem_limit,
            ),
        )(x2d, w1c, b1_2d, w2c, b2_2d)

    try:
        # Single-buffer the constant-index weights/biases (halves their VMEM).
        out2d = jax.block_until_ready(_call(pl.Buffered(1)))
    except Exception:
        # pipeline_mode not accepted by this jax build for top-level
        # pallas_call BlockSpecs -> default buffering (weights are still only
        # DMA'd once since their block index never changes).
        out2d = _call(None)

    return out2d[:M].reshape(B, T, C)


def mlp_reference(x, w1_t, b1, w2_t, b2, compute_dtype=jnp.bfloat16):
    """Pure-JAX reference matching the kernel's numerics
    (bf16 matmul inputs, f32 accumulation, f32 Swish, eval-mode dropout)."""
    B, T, C = x.shape
    xc = x.reshape(-1, C).astype(compute_dtype)
    h = jnp.dot(xc, w1_t.astype(compute_dtype),
                preferred_element_type=jnp.float32) + b1.astype(jnp.float32)
    h = h * jax.nn.sigmoid(h)
    y = jnp.dot(h.astype(compute_dtype), w2_t.astype(compute_dtype),
                preferred_element_type=jnp.float32) + b2.astype(jnp.float32)
    return y.astype(x.dtype).reshape(B, T, C)


if __name__ == "__main__":
    # Small GPT-ish config: n_embd=128 (lane-aligned output), expansion 4 ->
    # hidden=512, bias=True, dropout in eval mode.  seq chosen so M = 2*200 =
    # 400 does NOT divide tile_m, exercising the padding path (Mp=512,
    # 2 grid steps at tile_m=256).
    batch, seq, n_embd = 2, 200, 128
    hidden = 4 * n_embd

    key = jax.random.PRNGKey(0)
    k_x, k_w1, k_w2 = jax.random.split(key, 3)

    x = jax.random.normal(k_x, (batch, seq, n_embd), dtype=jnp.float32)

    # _init_weights: normal(std=0.02), zero biases.  PyTorch fc1.weight is
    # (hidden, n_embd); pass the transpose so the kernel does plain x @ W.
    w1_t = (0.02 * jax.random.normal(k_w1, (hidden, n_embd), dtype=jnp.float32)).T
    w2_t = (0.02 * jax.random.normal(k_w2, (n_embd, hidden), dtype=jnp.float32)).T
    b1 = jnp.zeros((hidden,), dtype=jnp.float32)
    b2 = jnp.zeros((n_embd,), dtype=jnp.float32)

    # TODO(synk): training-mode dropout (stateful RNG masking) not implemented;
    # the module is reproduced in eval mode where nn.Dropout is the identity.

    out = mlp_forward(x, w1_t, b1, w2_t, b2, tile_m=256)
    out = jax.block_until_ready(out)

    ref = mlp_reference(x, w1_t, b1, w2_t, b2)
    assert out.shape == (batch, seq, n_embd)
    assert jnp.allclose(out, ref, atol=2e-3, rtol=2e-3), "mismatch vs reference"

    print("KERNEL_OK")
</pallas_src>

<mosaic_0001>
module attributes {stable_mosaic.version = 11 : i64} {
  func.func @mlp_kernel(%arg0: i32, %arg1: memref<256x128xf32, #tpu.memory_space<vmem>>, %arg2: memref<128x512xbf16, #tpu.memory_space<vmem>>, %arg3: memref<1x512xf32, #tpu.memory_space<vmem>>, %arg4: memref<512x128xbf16, #tpu.memory_space<vmem>>, %arg5: memref<1x128xf32, #tpu.memory_space<vmem>>, %arg6: memref<256x128xf32, #tpu.memory_space<vmem>>) attributes {dimension_semantics = [#tpu.dimension_semantics<parallel>], iteration_bounds = array<i64: 2>, scalar_prefetch = 0 : i64, scratch_operands = 0 : i64, tpu.core_type = #tpu.core_type<tc>, window_params = [{transform_indices = @transform_0, window_bounds = array<i64: 256, 128>}, {pipeline_mode = #tpu.pipeline_mode<synchronous>, transform_indices = @transform_1, window_bounds = array<i64: 128, 512>}, {pipeline_mode = #tpu.pipeline_mode<synchronous>, transform_indices = @transform_2, window_bounds = array<i64: 1, 512>}, {pipeline_mode = #tpu.pipeline_mode<synchronous>, transform_indices = @transform_3, window_bounds = array<i64: 512, 128>}, {pipeline_mode = #tpu.pipeline_mode<synchronous>, transform_indices = @transform_4, window_bounds = array<i64: 1, 128>}, {transform_indices = @transform_5, window_bounds = array<i64: 256, 128>}]} {
    %c0 = arith.constant 0 : index
    %c0_0 = arith.constant 0 : index
    %0 = vector.load %arg1[%c0, %c0_0] : memref<256x128xf32, #tpu.memory_space<vmem>>, vector<256x128xf32>
    %1 = arith.truncf %0 : vector<256x128xf32> to vector<256x128xbf16>
    %c0_1 = arith.constant 0 : index
    %c0_2 = arith.constant 0 : index
    %2 = vector.load %arg2[%c0_1, %c0_2] : memref<128x512xbf16, #tpu.memory_space<vmem>>, vector<128x512xbf16>
    %cst = arith.constant dense<0.000000e+00> : vector<256x512xf32>
    %3 = tpu.matmul %1, %2, %cst {dimension_numbers = #tpu.dot_dimension_numbers<[1], [0], [0], [1], [0, 0, 1, 1], [], []>} : vector<256x128xbf16>, vector<128x512xbf16>, vector<256x512xf32> -> vector<256x512xf32>
    %c0_3 = arith.constant 0 : index
    %c0_4 = arith.constant 0 : index
    %4 = vector.load %arg3[%c0_3, %c0_4] : memref<1x512xf32, #tpu.memory_space<vmem>>, vector<1x512xf32>
    %5 = vector.broadcast %4 : vector<1x512xf32> to vector<256x512xf32>
    %6 = arith.addf %3, %5 : vector<256x512xf32>
    %7 = arith.negf %6 : vector<256x512xf32>
    %8 = math.exp %7 : vector<256x512xf32>
    %cst_5 = arith.constant 1.000000e+00 : f32
    %9 = vector.broadcast %cst_5 : f32 to vector<256x512xf32>
    %10 = arith.addf %9, %8 : vector<256x512xf32>
    %11 = arith.divf %9, %10 : vector<256x512xf32>
    %12 = arith.mulf %6, %11 : vector<256x512xf32>
    %13 = arith.truncf %12 : vector<256x512xf32> to vector<256x512xbf16>
    %c0_6 = arith.constant 0 : index
    %c0_7 = arith.constant 0 : index
    %14 = vector.load %arg4[%c0_6, %c0_7] : memref<512x128xbf16, #tpu.memory_space<vmem>>, vector<512x128xbf16>
    %cst_8 = arith.constant dense<0.000000e+00> : vector<256x128xf32>
    %15 = tpu.matmul %13, %14, %cst_8 {dimension_numbers = #tpu.dot_dimension_numbers<[1], [0], [0], [1], [0, 0, 1, 1], [], []>} : vector<256x512xbf16>, vector<512x128xbf16>, vector<256x128xf32> -> vector<256x128xf32>
    %c0_9 = arith.constant 0 : index
    %c0_10 = arith.constant 0 : index
    %16 = vector.load %arg5[%c0_9, %c0_10] : memref<1x128xf32, #tpu.memory_space<vmem>>, vector<1x128xf32>
    %17 = vector.broadcast %16 : vector<1x128xf32> to vector<256x128xf32>
    %18 = arith.addf %15, %17 : vector<256x128xf32>
    %c0_11 = arith.constant 0 : index
    %c0_12 = arith.constant 0 : index
    %19 = vector.load %arg6[%c0_11, %c0_12] : memref<256x128xf32, #tpu.memory_space<vmem>>, vector<256x128xf32>
    tpu.vector_store %arg6[%c0_11, %c0_12], %18 {strides = array<i32>} : memref<256x128xf32, #tpu.memory_space<vmem>>, vector<256x128xf32>,
    return
  }
  func.func @transform_0(%arg0: i32) -> (i32, i32) {
    %c0_i32 = arith.constant 0 : i32
    %c0_i32_0 = arith.constant 0 : i32
    return %arg0, %c0_i32 : i32, i32
  }
  func.func @transform_1(%arg0: i32) -> (i32, i32) {
    %c0_i32 = arith.constant 0 : i32
    %c0_i32_0 = arith.constant 0 : i32
    %c0_i32_1 = arith.constant 0 : i32
    return %c0_i32, %c0_i32_0 : i32, i32
  }
  func.func @transform_2(%arg0: i32) -> (i32, i32) {
    %c0_i32 = arith.constant 0 : i32
    %c0_i32_0 = arith.constant 0 : i32
    %c0_i32_1 = arith.constant 0 : i32
    return %c0_i32, %c0_i32_0 : i32, i32
  }
  func.func @transform_3(%arg0: i32) -> (i32, i32) {
    %c0_i32 = arith.constant 0 : i32
    %c0_i32_0 = arith.constant 0 : i32
    %c0_i32_1 = arith.constant 0 : i32
    return %c0_i32, %c0_i32_0 : i32, i32
  }
  func.func @transform_4(%arg0: i32) -> (i32, i32) {
    %c0_i32 = arith.constant 0 : i32
    %c0_i32_0 = arith.constant 0 : i32
    %c0_i32_1 = arith.constant 0 : i32
    return %c0_i32, %c0_i32_0 : i32, i32
  }
  func.func @transform_5(%arg0: i32) -> (i32, i32) {
    %c0_i32 = arith.constant 0 : i32
    %c0_i32_0 = arith.constant 0 : i32
    return %arg0, %c0_i32 : i32, i32
  }
}

module attributes {stable_mosaic.version = 11 : i64} {
  func.func @mlp_kernel(%arg0: i32, %arg1: memref<256x128xf32, #tpu.memory_space<vmem>>, %arg2: memref<128x512xbf16, #tpu.memory_space<vmem>>, %arg3: memref<1x512xf32, #tpu.memory_space<vmem>>, %arg4: memref<512x128xbf16, #tpu.memory_space<vmem>>, %arg5: memref<1x128xf32, #tpu.memory_space<vmem>>, %arg6: memref<256x128xf32, #tpu.memory_space<vmem>>) attributes {dimension_semantics = [#tpu.dimension_semantics<parallel>], iteration_bounds = array<i64: 2>, scalar_prefetch = 0 : i64, scratch_operands = 0 : i64, tpu.core_type = #tpu.core_type<tc>, window_params = [{transform_indices = @transform_0, window_bounds = array<i64: 256, 128>}, {pipeline_mode = #tpu.pipeline_mode<synchronous>, transform_indices = @transform_1, window_bounds = array<i64: 128, 512>}, {pipeline_mode = #tpu.pipeline_mode<synchronous>, transform_indices = @transform_2, window_bounds = array<i64: 1, 512>}, {pipeline_mode = #tpu.pipeline_mode<synchronous>, transform_indices = @transform_3, window_bounds = array<i64: 512, 128>}, {pipeline_mode = #tpu.pipeline_mode<synchronous>, transform_indices = @transform_4, window_bounds = array<i64: 1, 128>}, {transform_indices = @transform_5, window_bounds = array<i64: 256, 128>}]} {
    %c0 = arith.constant 0 : index
    %c0_0 = arith.constant 0 : index
    %0 = vector.load %arg1[%c0, %c0_0] : memref<256x128xf32, #tpu.memory_space<vmem>>, vector<256x128xf32>
    %1 = arith.truncf %0 : vector<256x128xf32> to vector<256x128xbf16>
    %c0_1 = arith.constant 0 : index
    %c0_2 = arith.constant 0 : index
    %2 = vector.load %arg2[%c0_1, %c0_2] : memref<128x512xbf16, #tpu.memory_space<vmem>>, vector<128x512xbf16>
    %cst = arith.constant dense<0.000000e+00> : vector<256x512xf32>
    %3 = tpu.matmul %1, %2, %cst {dimension_numbers = #tpu.dot_dimension_numbers<[1], [0], [0], [1], [0, 0, 1, 1], [], []>} : vector<256x128xbf16>, vector<128x512xbf16>, vector<256x512xf32> -> vector<256x512xf32>
    %c0_3 = arith.constant 0 : index
    %c0_4 = arith.constant 0 : index
    %4 = vector.load %arg3[%c0_3, %c0_4] : memref<1x512xf32, #tpu.memory_space<vmem>>, vector<1x512xf32>
    %5 = vector.broadcast %4 : vector<1x512xf32> to vector<256x512xf32>
    %6 = arith.addf %3, %5 : vector<256x512xf32>
    %7 = arith.negf %6 : vector<256x512xf32>
    %8 = math.exp %7 : vector<256x512xf32>
    %cst_5 = arith.constant 1.000000e+00 : f32
    %9 = vector.broadcast %cst_5 : f32 to vector<256x512xf32>
    %10 = arith.addf %9, %8 : vector<256x512xf32>
    %11 = arith.divf %9, %10 : vector<256x512xf32>
    %12 = arith.mulf %6, %11 : vector<256x512xf32>
    %13 = arith.truncf %12 : vector<256x512xf32> to vector<256x512xbf16>
    %c0_6 = arith.constant 0 : index
    %c0_7 = arith.constant 0 : index
    %14 = vector.load %arg4[%c0_6, %c0_7] : memref<512x128xbf16, #tpu.memory_space<vmem>>, vector<512x128xbf16>
    %cst_8 = arith.constant dense<0.000000e+00> : vector<256x128xf32>
    %15 = tpu.matmul %13, %14, %cst_8 {dimension_numbers = #tpu.dot_dimension_numbers<[1], [0], [0], [1], [0, 0, 1, 1], [], []>} : vector<256x512xbf16>, vector<512x128xbf16>, vector<256x128xf32> -> vector<256x128xf32>
    %c0_9 = arith.constant 0 : index
    %c0_10 = arith.constant 0 : index
    %16 = vector.load %arg5[%c0_9, %c0_10] : memref<1x128xf32, #tpu.memory_space<vmem>>, vector<1x128xf32>
    %17 = vector.broadcast %16 : vector<1x128xf32> to vector<256x128xf32>
    %18 = arith.addf %15, %17 : vector<256x128xf32>
    %c0_11 = arith.constant 0 : index
    %c0_12 = arith.constant 0 : index
    %19 = vector.load %arg6[%c0_11, %c0_12] : memref<256x128xf32, #tpu.memory_space<vmem>>, vector<256x128xf32>
    tpu.vector_store %arg6[%c0_11, %c0_12], %18 {strides = array<i32>} : memref<256x128xf32, #tpu.memory_space<vmem>>, vector<256x128xf32>,
    return
  }
  func.func @transform_0(%arg0: i32) -> (i32, i32) {
    %c0_i32 = arith.constant 0 : i32
    %c0_i32_0 = arith.constant 0 : i32
    return %arg0, %c0_i32 : i32, i32
  }
  func.func @transform_1(%arg0: i32) -> (i32, i32) {
    %c0_i32 = arith.constant 0 : i32
    %c0_i32_0 = arith.constant 0 : i32
    %c0_i32_1 = arith.constant 0 : i32
    return %c0_i32, %c0_i32_0 : i32, i32
  }
  func.func @transform_2(%arg0: i32) -> (i32, i32) {
    %c0_i32 = arith.constant 0 : i32
    %c0_i32_0 = arith.constant 0 : i32
    %c0_i32_1 = arith.constant 0 : i32
    return %c0_i32, %c0_i32_0 : i32, i32
  }
  func.func @transform_3(%arg0: i32) -> (i32, i32) {
    %c0_i32 = arith.constant 0 : i32
    %c0_i32_0 = arith.constant 0 : i32
    %c0_i32_1 = arith.constant 0 : i32
    return %c0_i32, %c0_i32_0 : i32, i32
  }
  func.func @transform_4(%arg0: i32) -> (i32, i32) {
    %c0_i32 = arith.constant 0 : i32
    %c0_i32_0 = arith.constant 0 : i32
    %c0_i32_1 = arith.constant 0 : i32
    return %c0_i32, %c0_i32_0 : i32, i32
  }
  func.func @transform_5(%arg0: i32) -> (i32, i32) {
    %c0_i32 = arith.constant 0 : i32
    %c0_i32_0 = arith.constant 0 : i32
    return %arg0, %c0_i32 : i32, i32
  }
}

</mosaic_0001>

<bundles_post_ra>
// kernel: tpu_custom_call.1
= control target key start
LH: loop header
LB: loop body
LE: loop exit
PB: predicated region body
PF: predicated region fallthrough
CT: control target
= control target key end

     0   :  { %10 = vsyncpa [#allocation3], 0  ;;  %s5347_s0 = inlined_call_operand.hbm [shape: f32[512,128], index: 0, kind: input, shape index: {}]   ;;  %s5348_s1 = inlined_call_operand.hbm [shape: bf16[128,512], index: 1, kind: input, shape index: {}]   ;;  %s5349_s2 = inlined_call_operand.vmem [shape: f32[1,512], index: 2, kind: input, shape index: {}]   ;;  %s5350_s3 = inlined_call_operand.hbm [shape: bf16[512,128], index: 3, kind: input, shape index: {}]   ;;  %s5351_s4 = inlined_call_operand.vmem [shape: f32[1,128], index: 4, kind: input, shape index: {}]   ;;  %s5352_s5 = inlined_call_operand.hbm [shape: f32[512,128], index: 5, kind: output, shape index: {}]  }
   0x1   :  { %12 = vsyncpa [#allocation3 + $0x1], 0 }
   0x2   :  { %13 = vsyncpa [#allocation6], 0 }
   0x3   :  { %14 = vsyncpa [#allocation4], 0 }
   0x4   :  { %16 = vsyncpa [#allocation4 + $0x1], 0  ;;  %s3912_s18 = smov 0   ;;  %s3914_s19 = smov 0  }
   0x5   :  { %s3916_s20 = smov 0   ;;  %s3918_s21 = smov 0  }
   0x6 LB: > { %s3933_s22 = sadd.s32 4294967295, %s3867_s21   ;;  %s2606_s23 = sadd.s32 4294967294, %s3867_s21   ;;  %s3867_s21 = sphi %s3918_s21, %s5492_s21   ;;  %s3863_s20 = sphi %s3916_s20, %s5491_s20   ;;  %s3859_s19 = sphi %s3914_s19, %s5490_s19   ;;  %s3855_s18 = sphi %s3912_s18, %s5489_s18  }
   0x7   : > { %p42_p0 = scmp.ne.s32.totalorder %s3859_s19, %s3855_s18  ;;  %p5353_p1 = scmp.eq.s32.totalorder %s3933_s22, 0 }
   0x8   : > { %p156_p3 = scmp.eq.s32.totalorder %s2606_s23, 1  ;;  %p2607_p5 = scmp.ge.s32.totalorder %s3867_s21, 1 }
   0x9   : > { %p3942_p4 = por %p5353_p1, %p42_p0  ;;  %p163_p7 = scmp.lt.s32.totalorder %s3867_s21, 3 }
   0xa   : > { %p3947_p6 = por %p156_p3, %p42_p0  ;;  %s3869_s27 = smov [#allocation5]  }
   0xb   : > { %s5359_s24 = scalar_select %p3942_p4, 1, 0 }
   0xc   : > { %s5360_s25 = scalar_select %p3947_p6, 1, 0 }
   0xd   : > { %p3952_p8 = pnand %p2607_p5, %p163_p7  ;;  %s175_s28 = sshll.u32 %s3869_s27, 4  ;;  %s3956_s28 = int_to_ptr.vmem [resolvable:$true] %s175_s28 }
   0xe   : > { %s3870_s30 = smov [#allocation7]   ;;  %s3711_s9 = scalar_lea.hbm %s5348_s1, 4096 }
   0xf   : > { %p3055_p9 = pneg %p3952_p8  ;;  %s191_s6 = sshll.u32 %s3870_s30, 4  ;;  %s3967_s6 = int_to_ptr.vmem [resolvable:$true] %s191_s6 }
  0x10   : > { %p3712_p12 = scmp.ne.s32.totalorder %s5348_s1, %s3711_s9  ;;  %p3718_p5 = scmp.lt.u32.totalorder %s3711_s9, %s5348_s1 }
  0x11   : > { %p3963_p11 = pnand %p3055_p9, %p5353_p1 }
  0x13   : > { %p3713_p13 = pneg %p3963_p11 }
  0x15   : > { %p3714_p0 = pnand %p3713_p13, %p3712_p12 }
  0x17   : > { %p3715_p3 = pneg %p3714_p0 }
  0x19   : > { %p3720_p7 = pnand %p3718_p5, %p3715_p3 }
  0x1b   : > { %3723 = shalt.err (!%p3720_p7)
}
  0x1c   : > { %s3724_s14 = scalar_lea.vmem %s3956_s28, 4096  ;;  %p3732_p2 = scmp.lt.s32.totalorder %s3956_s28, %s3956_s28 }
  0x1d   : > { %p3725_p9 = scmp.ne.s32.totalorder %s3956_s28, %s3724_s14  ;;  %p3733_p12 = scmp.lt.s32.totalorder %s3724_s14, %s3724_s14 }
  0x1f   : > { %p3727_p10 = pnand %p3725_p9, %p3713_p13  ;;  %p3734_p0 = por %p3733_p12, %p3732_p2 }
  0x21   : > { %p3728_p1 = pneg %p3727_p10 }
  0x23   : > { %p3735_p6 = pnand %p3734_p0, %p3728_p1 }
  0x25   : > { %3738 = shalt.err (!%p3735_p6)
}
  0x26   : > { %s3871_s15 = smov 256   ;;  %s3872_s16 = smov 16  }
  0x27   : > { %3058 = dma.hbm_to_vmem [thread:$0]  (!%p3963_p11), %s5348_s1, 4096, %s3956_s28, [#allocation6], %s3871_s15, %s3871_s15, %s3872_s16  }
  0x28   : > { %s3739_s7 = scalar_lea.hbm %s5350_s3, 4096 }
  0x29   : > { %p3740_p2 = scmp.ne.s32.totalorder %s5350_s3, %s3739_s7  ;;  %p3746_p10 = scmp.lt.u32.totalorder %s3739_s7, %s5350_s3 }
  0x2b   : > { %p3742_p1 = pnand %p3740_p2, %p3713_p13 }
  0x2d   : > { %p3743_p6 = pneg %p3742_p1 }
  0x2f   : > { %p3748_p3 = pnand %p3746_p10, %p3743_p6 }
  0x31   : > { %3751 = shalt.err (!%p3748_p3)
}
  0x32   : > { %s3752_s28 = scalar_lea.vmem %s3967_s6, 4096  ;;  %p3760_p12 = scmp.lt.s32.totalorder %s3967_s6, %s3967_s6 }
  0x33   : > { %p3753_p5 = scmp.ne.s32.totalorder %s3967_s6, %s3752_s28  ;;  %p3761_p0 = scmp.lt.s32.totalorder %s3752_s28, %s3752_s28 }
  0x35   : > { %p3755_p7 = pnand %p3753_p5, %p3713_p13  ;;  %p3762_p2 = por %p3761_p0, %p3760_p12 }
  0x37   : > { %p3756_p9 = pneg %p3755_p7 }
  0x39   : > { %p3763_p1 = pnand %p3762_p2, %p3756_p9 }
  0x3b   : > { %3766 = shalt.err (!%p3763_p1)
}
  0x3c   : > { %s3873_s12 = smov 64   ;;  %s3874_s13 = smov 4  }
  0x3d   : > { %3061 = dma.hbm_to_vmem [thread:$0]  (!%p3963_p11), %s5350_s3, 4096, %s3967_s6, [#allocation6], %s3873_s12, %s3873_s12, %s3874_s13  }
  0x3e   : > { %s4022_s16 = sadd.s32 1, %s3867_s21   ;;  %s29_s23 = sadd.s32 1, %s3863_s20 }
  0x3f   : > { %s26_s17 = ssub.s32 %s3867_s21, %s4022_s16  ;;  %p36_p6 = scmp.ne.s32.totalorder %s3863_s20, %s3859_s19 }
  0x40   : > { %p27_p13 = scmp.eq.s32.totalorder %s26_s17, 0  ;;  %p37_p10 = scmp.eq.s32.totalorder %s3867_s21, 0 }
  0x41   : > { %p5363_p5 = scmp.eq.s32.totalorder %s3933_s22, 1  ;;  %p3072_p9 = scmp.lt.s32.totalorder %s3867_s21, 2 }
  0x42   : > { %s4031_s27 = scalar_select %p27_p13, %s3863_s20, %s29_s23  }
  0x43   : > { %p38_p3 = por %p37_p10, %p36_p6  ;;  %p4035_p7 = por %p5363_p5, %p36_p6 }
  0x44   : > { %s208_s29 = sand.u32 1, %s3863_s20   ;;  %s2817_s6 = sshll.u32 %s3867_s21, 12 }
  0x45   : > { %s5364_s30 = scalar_select %p4035_p7, 1, 0 }
  0x46   : > { %s2611_s7 = sshll.u32 %s208_s29, 8  ;;  %s4045_s10 = scalar_lea.hbm %s5347_s0, %s2817_s6 }
  0x47   : > { %s212_s11 = scalar_lea.vmem [#allocation2], %s2611_s7  ;;  %p4049_p11 = pnand %p3072_p9, %p38_p3 }
  0x48   : > { %s219_s28 = sshll.u32 %s212_s11, 4  ;;  %s4053_s13 = scalar_lea.sflag [#allocation3], %s208_s29  ;;  %s4047_s28 = int_to_ptr.vmem [resolvable:$true] %s219_s28 }
  0x49   : > { %s3767_s14 = scalar_lea.hbm %s4045_s10, 4096  ;;  %p3769_p0 = pneg %p4049_p11 }
  0x4a   : > { %p3768_p12 = scmp.ne.s32.totalorder %s4045_s10, %s3767_s14  ;;  %s3772_s23 = scalar_lea.hbm %s5347_s0, 8192 }
  0x4b   : > { %p3773_p13 = scmp.lt.u32.totalorder %s4045_s10, %s5347_s0  ;;  %p3774_p6 = scmp.lt.u32.totalorder %s3772_s23, %s3767_s14 }
  0x4c   : > { %p3770_p2 = pnand %p3769_p0, %p3768_p12  ;;  %p3776_p3 = scmp.lt.u32.totalorder %s3767_s14, %s4045_s10 }
  0x4d   : > { %p3775_p10 = por %p3774_p6, %p3773_p13 }
  0x4e   : > { %p3771_p1 = pneg %p3770_p2 }
  0x4f   : > { %p3777_p5 = por %p3776_p3, %p3775_p10 }
  0x51   : > { %p3778_p9 = pnand %p3777_p5, %p3771_p1 }
  0x53   : > { %3781 = shalt.err (!%p3778_p9)
}
  0x54   : > { %s3782_s29 = scalar_lea.vmem %s4047_s28, 4096  ;;  %s3875_s8 = smov [#allocation2]  }
  0x55   : > { %p3783_p12 = scmp.ne.s32.totalorder %s4047_s28, %s3782_s29  ;;  %s3787_s9 = sshll.u32 %s3875_s8, 4  ;;  %s3788_s9 = int_to_ptr.vmem [resolvable:$false] %s3787_s9 }
  0x56   : > { %s3789_s11 = scalar_lea.vmem %s3788_s9, 8192  ;;  %p3790_p4 = scmp.lt.s32.totalorder %s4047_s28, %s3788_s9 }
  0x57   : > { %p3785_p2 = pnand %p3783_p12, %p3769_p0  ;;  %p3791_p13 = scmp.lt.s32.totalorder %s3789_s11, %s3782_s29 }
  0x59   : > { %p3786_p7 = pneg %p3785_p2  ;;  %p3792_p6 = por %p3791_p13, %p3790_p4 }
  0x5b   : > { %p3793_p10 = pnand %p3792_p6, %p3786_p7 }
  0x5d   : > { %3796 = shalt.err (!%p3793_p10)
}
  0x5e   : > { %s3876_s14 = smov 128   ;;  %s3877_s15 = smov 8  }
  0x5f   : > { %3065 = dma.hbm_to_vmem [thread:$0]  (!%p4049_p11), %s4045_s10, 4096, %s4047_s28, %s4053_s13, %s3876_s14, %s3876_s14, %s3877_s15  }
  0x60   : > { %231 = sbr.rel (%p3952_p8) target bundleno = 870 (0x366), region = 40 }
  0x67   : > { %s4084_s17 = sand.u32 1, %s3859_s19   ;;  %p5366_p4 = scmp.ne.s32.totalorder %s5359_s24, 0 }
  0x68   : > { %s2615_s23 = sshll.u32 %s4084_s17, 8  ;;  %s234_s7 = scalar_lea.sflag [#allocation3], %s4084_s17 }
  0x69   : > { %s4090_s6 = scalar_lea.vmem [#allocation2], %s2615_s23 }
  0x6a   : > { %3842 = dma.done.wait (%p5366_p4), %s234_s7, 4096  }
  0x6b   : > { %3844 = vsyncadd (%p5366_p4), %s234_s7, 4294963200  ;;  %p5367_p7 = scmp.eq.s32.totalorder %s3933_s22, 0 }
  0x6d   : > { %3846 = dma.done.wait (%p5367_p7), [#allocation6], 8192   ;;  %p5368_p8 = pmov %p5367_p7 }
  0x6e   : > { %v3878_v0 = vmov 0   ;;  %v3119_v1 = vld [vmem:[#allocation5 + $0x4] ss:$16 sps:$4 sm:$0xff]   ;;  %v3121_v2 = vld [vmem:[#allocation5 + $0xc] ss:$16 sps:$4 sm:$0xff]   ;;  %s5219_s12 = scalar_lea.vmem [#allocation8], %s2615_s23 }
  0x6f   : > { %3848 = vsyncadd (%p5368_p8), [#allocation6], 4294959104  ;;  %569 = vmatprep.mubr.bf16.mxu0 %v3878_v0  ;;  %762 = vmatprep.mubr.bf16.mxu1 %v3878_v0  ;;  %v3123_v3 = vld [vmem:[#allocation5] ss:$16 sps:$4 sm:$0xff]   ;;  %v3124_v4 = vld [vmem:[#allocation5 + $0x8] ss:$16 sps:$4 sm:$0xff]  }
  0x70   : > { %537 = vmatprep.subr.bf16.mxu0 %v3119_v1  ;;  %730 = vmatprep.subr.bf16.mxu1 %v3121_v2  ;;  %v3125_v5 = vld [vmem:[#allocation5 + $0x24] ss:$16 sps:$4 sm:$0xff]   ;;  %v3127_v6 = vld [vmem:[#allocation5 + $0x2c] ss:$16 sps:$4 sm:$0xff]   ;;  %v3129_v7 = vld [vmem:[#allocation5 + $0x20] ss:$16 sps:$4 sm:$0xff]  }
  0x71   : > { %538 = vmatpush1.bf16.msra.mxu0 %v3123_v3  ;;  %731 = vmatpush1.bf16.msra.mxu1 %v3124_v4  ;;  %v3130_v8 = vld [vmem:[#allocation5 + $0x28] ss:$16 sps:$4 sm:$0xff]   ;;  %v3131_v9 = vld [vmem:[#allocation5 + $0x44] ss:$16 sps:$4 sm:$0xff]   ;;  %v3133_v10 = vld [vmem:[#allocation5 + $0x4c] ss:$16 sps:$4 sm:$0xff]  }
  0x72   : > { %539 = vmatprep.subr.bf16.mxu0 %v3125_v5  ;;  %732 = vmatprep.subr.bf16.mxu1 %v3127_v6  ;;  %v3135_v11 = vld [vmem:[#allocation5 + $0x40] ss:$16 sps:$4 sm:$0xff]   ;;  %v3136_v12 = vld [vmem:[#allocation5 + $0x48] ss:$16 sps:$4 sm:$0xff]   ;;  %v3137_v13 = vld [vmem:[#allocation5 + $0x64] ss:$16 sps:$4 sm:$0xff]  }
  0x73   : > { %v3139_v14 = vld [vmem:[#allocation5 + $0x6c] ss:$16 sps:$4 sm:$0xff]   ;;  %v3141_v15 = vld [vmem:[#allocation5 + $0x60] ss:$16 sps:$4 sm:$0xff]   ;;  %v3142_v16 = vld [vmem:[#allocation5 + $0x68] ss:$16 sps:$4 sm:$0xff]  }
  0x74   : > { %v3143_v17 = vld [vmem:[#allocation5 + $0x84] ss:$16 sps:$4 sm:$0xff]   ;;  %v3145_v18 = vld [vmem:[#allocation5 + $0x8c] ss:$16 sps:$4 sm:$0xff]   ;;  %v3147_v19 = vld [vmem:[#allocation5 + $0x80] ss:$16 sps:$4 sm:$0xff]  }
  0x75   : > { %540 = vmatpush1.bf16.msra.mxu0 %v3129_v7  ;;  %733 = vmatpush1.bf16.msra.mxu1 %v3130_v8  ;;  %v3148_v20 = vld [vmem:[#allocation5 + $0x88] ss:$16 sps:$4 sm:$0xff]   ;;  %v3149_v21 = vld [vmem:[#allocation5 + $0xa4] ss:$16 sps:$4 sm:$0xff]   ;;  %v3151_v22 = vld [vmem:[#allocation5 + $0xac] ss:$16 sps:$4 sm:$0xff]  }
  0x76   : > { %541 = vmatprep.subr.bf16.mxu0 %v3131_v9  ;;  %734 = vmatprep.subr.bf16.mxu1 %v3133_v10  ;;  %v3153_v23 = vld [vmem:[#allocation5 + $0xa0] ss:$16 sps:$4 sm:$0xff]   ;;  %v3154_v24 = vld [vmem:[#allocation5 + $0xa8] ss:$16 sps:$4 sm:$0xff]   ;;  %v3155_v25 = vld [vmem:[#allocation5 + $0xc4] ss:$16 sps:$4 sm:$0xff]  }
  0x77   : > { %v3157_v26 = vld [vmem:[#allocation5 + $0xcc] ss:$16 sps:$4 sm:$0xff]   ;;  %v3159_v27 = vld [vmem:[#allocation5 + $0xc0] ss:$16 sps:$4 sm:$0xff]   ;;  %v3160_v28 = vld [vmem:[#allocation5 + $0xc8] ss:$16 sps:$4 sm:$0xff]  }
  0x78   : > { %v3161_v29 = vld [vmem:[#allocation5 + $0xe4] ss:$16 sps:$4 sm:$0xff]   ;;  %v3163_v30 = vld [vmem:[#allocation5 + $0xec] ss:$16 sps:$4 sm:$0xff]   ;;  %v3165_v31 = vld [vmem:[#allocation5 + $0xe0] ss:$16 sps:$4 sm:$0xff]  }
  0x79   : > { %542 = vmatpush1.bf16.msra.mxu0 %v3135_v11  ;;  %735 = vmatpush1.bf16.msra.mxu1 %v3136_v12  ;;  %v3166_v32 = vld [vmem:[#allocation5 + $0xe8] ss:$16 sps:$4 sm:$0xff]   ;;  %v275_v33 = vld [vmem:[%s4090_s6] sm:$0xff]  ;;  %v277_v38 = vld [vmem:[%s4090_s6 + $0x10] sm:$0xff]  ;;  %s2818_s13 = sshll.u32 %s3933_s22, 12  ;;  %s2514_s29 = sshll.u32 %s5219_s12, 4  ;;  %s5301_s29 = int_to_ptr.vmem [resolvable:$true] %s2514_s29 }
  0x7a   : > { %543 = vmatprep.subr.bf16.mxu0 %v3137_v13  ;;  %736 = vmatprep.subr.bf16.mxu1 %v3139_v14  ;;  %v276_v34 = vld [vmem:[%s4090_s6 + $0x8] sm:$0xff]  ;;  %v3167_v36 = vld [vmem:[#allocation7 + $0x40] sm:$0xff]   ;;  %v278_v39 = vld [vmem:[%s4090_s6 + $0x18] sm:$0xff]  ;;  %s5299_s11 = scalar_lea.hbm %s5352_s5, %s2818_s13  ;;  %s2501_s14 = scalar_lea.sflag [#allocation4], %s4084_s17 }
  0x7b   : > { %v307_v35 = vpack.c.bf16 %v276_v34, %v275_v33  ;;  %v3168_v37 = vld [vmem:[#allocation7] sm:$0xff]   ;;  %v3171_v42 = vld [vmem:[#allocation7 + $0x48] sm:$0xff]   ;;  %v308_v45 = vpack.c.bf16 %v278_v39, %v277_v38  ;;  %v3175_v47 = vld [vmem:[#allocation7 + $0x50] sm:$0xff]   ;;  %s3797_s22 = scalar_lea.vmem %s5301_s29, 4096  ;;  %p5486_p0 = scmp.ne.s32.totalorder %s5364_s30, 0 }
  0x7c   : > { %v3169_v40 = vld [vmem:[#allocation7 + $0xc0] sm:$0xff]   ;;  %v3172_v43 = vld [vmem:[#allocation7 + $0x8] sm:$0xff]   ;;  %v3176_v48 = vld [vmem:[#allocation7 + $0x10] sm:$0xff]   ;;  %p3798_p11 = scmp.ne.s32.totalorder %s5301_s29, %s3797_s22  ;;  %s3879_s15 = smov [#allocation8]  }
  0x7d   : > { %544 = vmatpush1.bf16.msra.mxu0 %v3141_v15  ;;  %737 = vmatpush1.bf16.msra.mxu1 %v3142_v16  ;;  %v3170_v41 = vld [vmem:[#allocation7 + $0x80] sm:$0xff]   ;;  %v3173_v44 = vld [vmem:[#allocation7 + $0xc8] sm:$0xff]   ;;  %v3177_v51 = vld [vmem:[#allocation7 + $0xd0] sm:$0xff]   ;;  %s3801_s23 = sshll.u32 %s3879_s15, 4  ;;  %s3802_s23 = int_to_ptr.vmem [resolvable:$false] %s3801_s23 }
  0x7e   : > { %545 = vmatprep.subr.bf16.mxu0 %v3143_v17  ;;  %738 = vmatprep.subr.bf16.mxu1 %v3145_v18  ;;  %v3174_v46 = vld [vmem:[#allocation7 + $0x88] sm:$0xff]   ;;  %v279_v49 = vld [vmem:[%s4090_s6 + $0x20] sm:$0xff]  ;;  %v3178_v52 = vld [vmem:[#allocation7 + $0x90] sm:$0xff]   ;;  %p3799_p1 = pnand %p3798_p11, %p5486_p0  ;;  %s3803_s7 = scalar_lea.vmem %s3802_s23, 8192 }
  0x7f   : > { %v280_v50 = vld [vmem:[%s4090_s6 + $0x28] sm:$0xff]  ;;  %v3179_v53 = vld [vmem:[#allocation7 + $0x58] sm:$0xff]   ;;  %v3183_v58 = vld [vmem:[#allocation7 + $0x60] sm:$0xff]   ;;  %p3804_p5 = scmp.lt.s32.totalorder %s5301_s29, %s3802_s23  ;;  %p3805_p9 = scmp.lt.s32.totalorder %s3803_s7, %s3797_s22 }
  0x80   : > { %v3180_v54 = vld [vmem:[#allocation7 + $0x18] sm:$0xff]   ;;  %v309_v56 = vpack.c.bf16 %v280_v50, %v279_v49  ;;  %v3184_v59 = vld [vmem:[#allocation7 + $0x20] sm:$0xff]   ;;  %v281_v60 = vld [vmem:[%s4090_s6 + $0x30] sm:$0xff]  ;;  %p3800_p3 = pneg %p3799_p1 }
  0x81   : > { %546 = vmatpush1.bf16.msra.mxu0 %v3147_v19  ;;  %739 = vmatpush1.bf16.msra.mxu1 %v3148_v20  ;;  %v3181_v55 = vld [vmem:[#allocation7 + $0xd8] sm:$0xff]   ;;  %v3185_v62 = vld [vmem:[#allocation7 + $0xe0] sm:$0xff]   ;;  %v3187_v1 = vld [vmem:[#allocation7 + $0x68] sm:$0xff]   ;;  %p3806_p12 = por %p3805_p9, %p3804_p5 }
  0x82   : > { %547 = vmatprep.subr.bf16.mxu0 %v3149_v21  ;;  %740 = vmatprep.subr.bf16.mxu1 %v3151_v22  ;;  %v3182_v57 = vld [vmem:[#allocation7 + $0x98] sm:$0xff]   ;;  %v3186_v63 = vld [vmem:[#allocation7 + $0xa0] sm:$0xff]   ;;  %v3188_v2 = vld [vmem:[#allocation7 + $0x28] sm:$0xff]  }
  0x83   : > { %v282_v61 = vld [vmem:[%s4090_s6 + $0x38] sm:$0xff]  ;;  %v3189_v3 = vld [vmem:[#allocation7 + $0xe8] sm:$0xff]   ;;  %v283_v6 = vld [vmem:[%s4090_s6 + $0x40] sm:$0xff]  ;;  %p3807_p2 = pnand %p3806_p12, %p3800_p3 }
  0x84   : > { %v310_v4 = vpack.c.bf16 %v282_v61, %v281_v60  ;;  %v3190_v5 = vld [vmem:[#allocation7 + $0xa8] sm:$0xff]   ;;  %v285_v9 = vld [vmem:[%s4090_s6 + $0x50] sm:$0xff]  ;;  %v286_v10 = vld [vmem:[%s4090_s6 + $0x58] sm:$0xff] }
  0x85   : > { %548 = vmatpush1.bf16.msra.mxu0 %v3153_v23  ;;  %741 = vmatpush1.bf16.msra.mxu1 %v3154_v24  ;;  %v284_v7 = vld [vmem:[%s4090_s6 + $0x48] sm:$0xff]  ;;  %v312_v11 = vpack.c.bf16 %v286_v10, %v285_v9  ;;  %v287_v12 = vld [vmem:[%s4090_s6 + $0x60] sm:$0xff]  ;;  %v289_v15 = vld [vmem:[%s4090_s6 + $0x70] sm:$0xff] }
  0x86   : > { %549 = vmatprep.subr.bf16.mxu0 %v3155_v25  ;;  %742 = vmatprep.subr.bf16.mxu1 %v3157_v26  ;;  %v311_v8 = vpack.c.bf16 %v284_v7, %v283_v6  ;;  %v288_v13 = vld [vmem:[%s4090_s6 + $0x68] sm:$0xff]  ;;  %v290_v16 = vld [vmem:[%s4090_s6 + $0x78] sm:$0xff]  ;;  %v291_v18 = vld [vmem:[%s4090_s6 + $0x80] sm:$0xff] }
  0x87   : > { %v313_v14 = vpack.c.bf16 %v288_v13, %v287_v12  ;;  %v314_v17 = vpack.c.bf16 %v290_v16, %v289_v15  ;;  %v292_v19 = vld [vmem:[%s4090_s6 + $0x88] sm:$0xff]  ;;  %v293_v21 = vld [vmem:[%s4090_s6 + $0x90] sm:$0xff]  ;;  %v294_v22 = vld [vmem:[%s4090_s6 + $0x98] sm:$0xff] }
  0x88   : > { %v315_v20 = vpack.c.bf16 %v292_v19, %v291_v18  ;;  %v316_v23 = vpack.c.bf16 %v294_v22, %v293_v21  ;;  %v295_v24 = vld [vmem:[%s4090_s6 + $0xa0] sm:$0xff]  ;;  %v296_v25 = vld [vmem:[%s4090_s6 + $0xa8] sm:$0xff]  ;;  %v301_v33 = vld [vmem:[%s4090_s6 + $0xd0] sm:$0xff] }
  0x89   : > { %550 = vmatpush1.bf16.msra.mxu0 %v3159_v27  ;;  %743 = vmatpush1.bf16.msra.mxu1 %v3160_v28  ;;  %v317_v26 = vpack.c.bf16 %v296_v25, %v295_v24  ;;  %v297_v27 = vld [vmem:[%s4090_s6 + $0xb0] sm:$0xff]  ;;  %v298_v28 = vld [vmem:[%s4090_s6 + $0xb8] sm:$0xff] }
  0x8a   : > { %551 = vmatprep.subr.bf16.mxu0 %v3161_v29  ;;  %744 = vmatprep.subr.bf16.mxu1 %v3163_v30  ;;  %v318_v29 = vpack.c.bf16 %v298_v28, %v297_v27  ;;  %v299_v30 = vld [vmem:[%s4090_s6 + $0xc0] sm:$0xff]  ;;  %v302_v34 = vld [vmem:[%s4090_s6 + $0xd8] sm:$0xff]  ;;  %v305_v39 = vld [vmem:[%s4090_s6 + $0xf0] sm:$0xff] }
  0x8b   : > { %v3198_v49 = vld [vmem:[#allocation7 + $0xb8] sm:$0xff]  }
  0x8d   : > { %552 = vmatpush1.bf16.msra.mxu0 %v3165_v31  ;;  %745 = vmatpush1.bf16.msra.mxu1 %v3166_v32  ;;  %v300_v31 = vld [vmem:[%s4090_s6 + $0xc8] sm:$0xff] }
  0x8e   : > { %2819 = vmatprep.subr.bf16.mxu0 %v3167_v36  ;;  %2931 = vmatprep.subr.bf16.mxu1 %v3169_v40  ;;  %v319_v32 = vpack.c.bf16 %v300_v31, %v299_v30  ;;  %v303_v36 = vld [vmem:[%s4090_s6 + $0xe0] sm:$0xff]  ;;  %v306_v40 = vld [vmem:[%s4090_s6 + $0xf8] sm:$0xff] }
  0x90   : > { %570 = vmatmul.mubr.bf16.vlgmr.msra.gmra.mrb[0].mxu0 %v307_v35  ;;  %763 = vmatmul.mubr.bf16.vlgmr.msra.gmra.mrb[0].mxu1 %v307_v35  ;;  %v320_v35 = vpack.c.bf16 %v302_v34, %v301_v33 }
  0x91   : > { %579 = vmatprep.mubr.bf16.mxu0 %v3878_v0  ;;  %772 = vmatprep.mubr.bf16.mxu1 %v3878_v0 }
  0x92   : > { %2820 = vmatpush3.bf16.msra.mxu0 %v3168_v37  ;;  %2932 = vmatpush3.bf16.msra.mxu1 %v3170_v41  ;;  %v304_v37 = vld [vmem:[%s4090_s6 + $0xe8] sm:$0xff]  ;;  %v3191_v41 = vld [vmem:[#allocation7 + $0x70] sm:$0xff]  }
  0x93   : > { %2821 = vmatprep.subr.bf16.mxu0 %v3171_v42  ;;  %2933 = vmatprep.subr.bf16.mxu1 %v3173_v44  ;;  %v321_v38 = vpack.c.bf16 %v304_v37, %v303_v36  ;;  %v3193_v42 = vld [vmem:[#allocation7 + $0xf0] sm:$0xff]  }
  0x94   : > { %v3194_v44 = vld [vmem:[#allocation7 + $0xb0] sm:$0xff]  }
  0x96   : > { %2822 = vmatpush3.bf16.msra.mxu0 %v3172_v43  ;;  %2934 = vmatpush3.bf16.msra.mxu1 %v3174_v46  ;;  %v3192_v43 = vld [vmem:[#allocation7 + $0x30] sm:$0xff]   ;;  %v3195_v46 = vld [vmem:[#allocation7 + $0x78] sm:$0xff]  }
  0x97   : > { %2823 = vmatprep.subr.bf16.mxu0 %v3175_v47  ;;  %2935 = vmatprep.subr.bf16.mxu1 %v3177_v51  ;;  %v3197_v47 = vld [vmem:[#allocation7 + $0xf8] sm:$0xff]  }
  0x98   : > { %580 = vmatmul.mubr.bf16.gmra.mrb[4].mxu0 %v308_v45  ;;  %773 = vmatmul.mubr.bf16.gmra.mrb[4].mxu1 %v308_v45  ;;  %v322_v45 = vpack.c.bf16 %v306_v40, %v305_v39 }
  0x99   : > { %589 = vmatprep.mubr.bf16.mxu0 %v3878_v0  ;;  %782 = vmatprep.mubr.bf16.mxu1 %v3878_v0 }
  0x9a   : > { %2824 = vmatpush3.bf16.msra.mxu0 %v3176_v48  ;;  %2936 = vmatpush3.bf16.msra.mxu1 %v3178_v52  ;;  %v3196_v48 = vld [vmem:[#allocation7 + $0x38] sm:$0xff]  }
  0x9b   : > { %2825 = vmatprep.subr.bf16.mxu0 %v3179_v53  ;;  %2937 = vmatprep.subr.bf16.mxu1 %v3181_v55  ;;  %v355_v53 = vld [vmem:[%s5349_s2] sm:$0xf] }
  0x9e   : > { %2826 = vmatpush3.bf16.msra.mxu0 %v3180_v54  ;;  %2938 = vmatpush3.bf16.msra.mxu1 %v3182_v57 }
  0x9f   : > { %2827 = vmatprep.subr.bf16.mxu0 %v3183_v58  ;;  %2939 = vmatprep.subr.bf16.mxu1 %v3185_v62 }
  0xa0   : > { %590 = vmatmul.mubr.bf16.gmra.mrb[8].mxu0 %v309_v56  ;;  %783 = vmatmul.mubr.bf16.gmra.mrb[8].mxu1 %v309_v56 }
  0xa1   : > { %599 = vmatprep.mubr.bf16.mxu0 %v3878_v0  ;;  %792 = vmatprep.mubr.bf16.mxu1 %v3878_v0 }
  0xa2   : > { %2828 = vmatpush3.bf16.msra.mxu0 %v3184_v59  ;;  %2940 = vmatpush3.bf16.msra.mxu1 %v3186_v63 }
  0xa3   : > { %2829 = vmatprep.subr.bf16.mxu0 %v3187_v1  ;;  %2941 = vmatprep.subr.bf16.mxu1 %v3189_v3 }
  0xa6   : > { %2830 = vmatpush3.bf16.msra.mxu0 %v3188_v2  ;;  %2942 = vmatpush3.bf16.msra.mxu1 %v3190_v5 }
  0xa7   : > { %2831 = vmatprep.subr.bf16.mxu0 %v3191_v41  ;;  %2943 = vmatprep.subr.bf16.mxu1 %v3193_v42 }
  0xa8   : > { %600 = vmatmul.mubr.bf16.gmra.mrb[12].mxu0 %v310_v4  ;;  %793 = vmatmul.mubr.bf16.gmra.mrb[12].mxu1 %v310_v4 }
  0xa9   : > { %609 = vmatprep.mubr.bf16.mxu0 %v3878_v0  ;;  %802 = vmatprep.mubr.bf16.mxu1 %v3878_v0 }
  0xaa   : > { %2832 = vmatpush3.bf16.msra.mxu0 %v3192_v43  ;;  %2944 = vmatpush3.bf16.msra.mxu1 %v3194_v44 }
  0xab   : > { %2833 = vmatprep.subr.bf16.mxu0 %v3195_v46  ;;  %2945 = vmatprep.subr.bf16.mxu1 %v3197_v47 }
  0xae   : > { %2834 = vmatpush3.bf16.msra.mxu0 %v3196_v48  ;;  %2946 = vmatpush3.bf16.msra.mxu1 %v3198_v49 }
  0xb0   : > { %610 = vmatmul.mubr.bf16.gmra.mrb[16].mxu0 %v311_v8  ;;  %803 = vmatmul.mubr.bf16.gmra.mrb[16].mxu1 %v311_v8 }
  0xb1   : > { %619 = vmatprep.mubr.bf16.mxu0 %v3878_v0  ;;  %812 = vmatprep.mubr.bf16.mxu1 %v3878_v0 }
  0xb8   : > { %620 = vmatmul.mubr.bf16.gmra.mrb[20].mxu0 %v312_v11  ;;  %813 = vmatmul.mubr.bf16.gmra.mrb[20].mxu1 %v312_v11 }
  0xb9   : > { %629 = vmatprep.mubr.bf16.mxu0 %v3878_v0  ;;  %822 = vmatprep.mubr.bf16.mxu1 %v3878_v0 }
  0xc0   : > { %630 = vmatmul.mubr.bf16.gmra.mrb[24].mxu0 %v313_v14  ;;  %823 = vmatmul.mubr.bf16.gmra.mrb[24].mxu1 %v313_v14 }
  0xc1   : > { %639 = vmatprep.mubr.bf16.mxu0 %v3878_v0  ;;  %832 = vmatprep.mubr.bf16.mxu1 %v3878_v0 }
  0xc8   : > { %640 = vmatmul.mubr.bf16.gmra.mrb[28].mxu0 %v314_v17  ;;  %833 = vmatmul.mubr.bf16.gmra.mrb[28].mxu1 %v314_v17 }
  0xc9   : > { %649 = vmatprep.mubr.bf16.mxu0 %v3878_v0  ;;  %842 = vmatprep.mubr.bf16.mxu1 %v3878_v0 }
  0xd0   : > { %650 = vmatmul.mubr.bf16.gmra.mrb[32].mxu0 %v315_v20  ;;  %843 = vmatmul.mubr.bf16.gmra.mrb[32].mxu1 %v315_v20 }
  0xd1   : > { %659 = vmatprep.mubr.bf16.mxu0 %v3878_v0  ;;  %852 = vmatprep.mubr.bf16.mxu1 %v3878_v0 }
  0xd8   : > { %660 = vmatmul.mubr.bf16.gmra.mrb[36].mxu0 %v316_v23  ;;  %853 = vmatmul.mubr.bf16.gmra.mrb[36].mxu1 %v316_v23 }
  0xd9   : > { %669 = vmatprep.mubr.bf16.mxu0 %v3878_v0  ;;  %862 = vmatprep.mubr.bf16.mxu1 %v3878_v0 }
  0xe0   : > { %670 = vmatmul.mubr.bf16.gmra.mrb[40].mxu0 %v317_v26  ;;  %863 = vmatmul.mubr.bf16.gmra.mrb[40].mxu1 %v317_v26 }
  0xe1   : > { %679 = vmatprep.mubr.bf16.mxu0 %v3878_v0  ;;  %872 = vmatprep.mubr.bf16.mxu1 %v3878_v0 }
  0xe8   : > { %680 = vmatmul.mubr.bf16.gmra.mrb[44].mxu0 %v318_v29  ;;  %873 = vmatmul.mubr.bf16.gmra.mrb[44].mxu1 %v318_v29 }
  0xe9   : > { %689 = vmatprep.mubr.bf16.mxu0 %v3878_v0  ;;  %882 = vmatprep.mubr.bf16.mxu1 %v3878_v0 }
  0xf0   : > { %690 = vmatmul.mubr.bf16.gmra.mrb[48].mxu0 %v319_v32  ;;  %883 = vmatmul.mubr.bf16.gmra.mrb[48].mxu1 %v319_v32 }
  0xf1   : > { %699 = vmatprep.mubr.bf16.mxu0 %v3878_v0  ;;  %892 = vmatprep.mubr.bf16.mxu1 %v3878_v0 }
  0xf8   : > { %700 = vmatmul.mubr.bf16.gmra.mrb[52].mxu0 %v320_v35  ;;  %893 = vmatmul.mubr.bf16.gmra.mrb[52].mxu1 %v320_v35 }
  0xf9   : > { %709 = vmatprep.mubr.bf16.mxu0 %v3878_v0  ;;  %902 = vmatprep.mubr.bf16.mxu1 %v3878_v0 }
 0x100   : > { %710 = vmatmul.mubr.bf16.gmra.mrb[56].mxu0 %v321_v38  ;;  %903 = vmatmul.mubr.bf16.gmra.mrb[56].mxu1 %v321_v38 }
 0x101   : > { %719 = vmatprep.mubr.bf16.mxu0 %v3878_v0  ;;  %912 = vmatprep.mubr.bf16.mxu1 %v3878_v0  ;;  %v357_v0 = vlaneseq }
 0x103   : > { %v358_v50 = vshrl.u32 %v357_v0, 7 }
 0x105   : > { %v359_v51 = vsub.s32 0, %v358_v50  ;;  %v367_v52 = vsub.s32 2, %v358_v50  ;;  %v363_v54 = vsub.s32 1, %v358_v50  ;;  %v371_v55 = vsub.s32 3, %v358_v50 }
 0x107   : > { %v4167_v56 = vrot.slane %v355_v53, %v359_v51  ;;  %v4169_v57 = vrot.slane %v355_v53, %v367_v52  ;;  %v4171_v58 = vrot.slane %v355_v53, %v363_v54  ;;  %v4173_v59 = vrot.slane %v355_v53, %v371_v55 }
 0x108   : > { %720 = vmatmul.mubr.bf16.gmra.mrb[60].mxu0 %v322_v45  ;;  %913 = vmatmul.mubr.bf16.gmra.mrb[60].mxu1 %v322_v45 }
 0x163   : > { %v571_v60 = vpop.f32.mrb[0].mxu0  ;;  %v764_v61 = vpop.f32.mrb[0].mxu1 }
 0x164   : > { %v4176_v62 = vadd.f32 %v571_v60, %v4167_v56  ;;  %v4179_v63 = vadd.f32 %v764_v61, %v4169_v57  ;;  %v573_v1 = vpop.f32.mrb[1].mxu0  ;;  %v766_v2 = vpop.f32.mrb[1].mxu1 }
 0x165   : > { %v4182_v3 = vadd.f32 %v573_v1, %v4171_v58  ;;  %v4185_v4 = vadd.f32 %v766_v2, %v4173_v59  ;;  %v575_v5 = vpop.f32.mrb[2].mxu0  ;;  %v768_v6 = vpop.f32.mrb[2].mxu1 }
 0x166   : > { %v2651_v7 = vmul.f32 -1.442695, %v4176_v62  ;;  %v2653_v8 = vmul.f32 -1.442695, %v4179_v63  ;;  %v4190_v9 = vadd.f32 %v575_v5, %v4167_v56  ;;  %v4193_v10 = vadd.f32 %v768_v6, %v4169_v57  ;;  %v577_v11 = vpop.f32.mrb[3].mxu0  ;;  %v770_v12 = vpop.f32.mrb[3].mxu1 }
 0x167   : > { %v2652_v13 = vmul.f32 -1.442695, %v4182_v3  ;;  %v2654_v14 = vmul.f32 -1.442695, %v4185_v4  ;;  %v4198_v15 = vadd.f32 %v577_v11, %v4171_v58  ;;  %v4201_v16 = vadd.f32 %v770_v12, %v4173_v59 }
 0x168   : > { %3199 = vpow2.f32 %v2651_v7  ;;  %v2655_v17 = vmul.f32 -1.442695, %v4190_v9  ;;  %v2657_v18 = vmul.f32 -1.442695, %v4193_v10 }
 0x169   : > { %3201 = vpow2.f32 %v2653_v8  ;;  %v2656_v19 = vmul.f32 -1.442695, %v4198_v15  ;;  %v2658_v20 = vmul.f32 -1.442695, %v4201_v16 }
 0x16a   : > { %3203 = vpow2.f32 %v2652_v13 }
 0x16b   : > { %3205 = vpow2.f32 %v2654_v14  ;;  %v581_v21 = vpop.f32.mrb[4].mxu0  ;;  %v774_v22 = vpop.f32.mrb[4].mxu1 }
 0x16c   : > { %3207 = vpow2.f32 %v2655_v17  ;;  %v4208_v23 = vadd.f32 %v581_v21, %v4167_v56  ;;  %v4211_v24 = vadd.f32 %v774_v22, %v4169_v57  ;;  %v583_v25 = vpop.f32.mrb[5].mxu0  ;;  %v776_v26 = vpop.f32.mrb[5].mxu1 }
 0x16d   : > { %3209 = vpow2.f32 %v2657_v18  ;;  %v4214_v27 = vadd.f32 %v583_v25, %v4171_v58  ;;  %v4217_v28 = vadd.f32 %v776_v26, %v4173_v59  ;;  %v585_v29 = vpop.f32.mrb[6].mxu0  ;;  %v778_v30 = vpop.f32.mrb[6].mxu1 }
 0x16e   : > { %3211 = vpow2.f32 %v2656_v19  ;;  %v2659_v31 = vmul.f32 -1.442695, %v4208_v23  ;;  %v2661_v32 = vmul.f32 -1.442695, %v4211_v24  ;;  %v4222_v33 = vadd.f32 %v585_v29, %v4167_v56  ;;  %v587_v34 = vpop.f32.mrb[7].mxu0  ;;  %v780_v35 = vpop.f32.mrb[7].mxu1 }
 0x16f   : > { %3213 = vpow2.f32 %v2658_v20  ;;  %v2660_v36 = vmul.f32 -1.442695, %v4214_v27  ;;  %v2662_v37 = vmul.f32 -1.442695, %v4217_v28  ;;  %v4228_v6 = vadd.f32 %v778_v30, %v4169_v57 }
 0x170   : > { %3215 = vpow2.f32 %v2659_v31  ;;  %v2663_v38 = vmul.f32 -1.442695, %v4222_v33  ;;  %v4231_v13 = vadd.f32 %v587_v34, %v4171_v58  ;;  %v4234_v19 = vadd.f32 %v780_v35, %v4173_v59 }
 0x171   : > { %3217 = vpow2.f32 %v2661_v32  ;;  %v2665_v26 = vmul.f32 -1.442695, %v4228_v6 }
 0x172   : > { %v3200_v39 = vpop.eup %3199  ;;  %3219 = vpow2.f32 %v2660_v36 }
 0x173   : > { %v3202_v40 = vpop.eup %3201  ;;  %v1307_v41 = vadd.f32 1.0, %v3200_v39  ;;  %3221 = vpow2.f32 %v2662_v37  ;;  %v591_v42 = vpop.f32.mrb[8].mxu0 }
 0x174   : > { %v784_v43 = vpop.f32.mrb[8].mxu1  ;;  %v3204_v44 = vpop.eup %3203  ;;  %v1309_v45 = vadd.f32 1.0, %v3202_v40  ;;  %3223 = vpow2.f32 %v2663_v38  ;;  %v4240_v29 = vadd.f32 %v591_v42, %v4167_v56 }
 0x175   : > { %v593_v46 = vpop.f32.mrb[9].mxu0  ;;  %v786_v47 = vpop.f32.mrb[9].mxu1  ;;  %3225 = vrcp.f32 %v1307_v41  ;;  %v1308_v49 = vadd.f32 1.0, %v3204_v44  ;;  %v4247_v35 = vadd.f32 %v784_v43, %v4169_v57  ;;  %v2664_v41 = vmul.f32 -1.442695, %v4231_v13 }
 0x176   : > { %v3206_v48 = vpop.eup %3205  ;;  %v595_v0 = vpop.f32.mrb[10].mxu0  ;;  %3227 = vrcp.f32 %v1309_v45  ;;  %v4250_v36 = vadd.f32 %v593_v46, %v4171_v58  ;;  %v4258_v42 = vadd.f32 %v786_v47, %v4173_v59  ;;  %v2666_v43 = vmul.f32 -1.442695, %v4234_v19 }
 0x177   : > { %v788_v50 = vpop.f32.mrb[10].mxu1  ;;  %v3208_v51 = vpop.eup %3207  ;;  %v1310_v52 = vadd.f32 1.0, %v3206_v48  ;;  %3229 = vrcp.f32 %v1308_v49  ;;  %v4264_v46 = vadd.f32 %v595_v0, %v4167_v56  ;;  %v2667_v49 = vmul.f32 -1.442695, %v4240_v29 }
 0x178   : > { %v597_v53 = vpop.f32.mrb[11].mxu0  ;;  %v3210_v54 = vpop.eup %3209  ;;  %v1311_v55 = vadd.f32 1.0, %v3208_v51  ;;  %v2668_v47 = vmul.f32 -1.442695, %v4250_v36 }
 0x179   : > { %v790_v60 = vpop.f32.mrb[11].mxu1  ;;  %v3212_v61 = vpop.eup %3211  ;;  %3231 = vrcp.f32 %v1310_v52  ;;  %v1313_v1 = vadd.f32 1.0, %v3210_v54  ;;  %v2669_v52 = vmul.f32 -1.442695, %v4247_v35  ;;  %v4270_v54 = vadd.f32 %v788_v50, %v4169_v57 }
 0x17a   : > { %v3214_v2 = vpop.eup %3213  ;;  %3233 = vrcp.f32 %v1311_v55  ;;  %v1312_v5 = vadd.f32 1.0, %v3212_v61  ;;  %v2670_v61 = vmul.f32 -1.442695, %v4258_v42  ;;  %v4274_v0 = vadd.f32 %v597_v53, %v4171_v58 }
 0x17b   : > { %v3216_v7 = vpop.eup %3215  ;;  %3235 = vrcp.f32 %v1313_v1  ;;  %v1314_v8 = vadd.f32 1.0, %v3214_v2  ;;  %v601_v14 = vpop.f32.mrb[12].mxu0  ;;  %v4277_v1 = vadd.f32 %v790_v60, %v4173_v59 }
 0x17c   : > { %v3218_v11 = vpop.eup %3217  ;;  %3237 = vrcp.f32 %v1312_v5  ;;  %v1315_v12 = vadd.f32 1.0, %v3216_v7  ;;  %v794_v20 = vpop.f32.mrb[12].mxu1 }
 0x17d   : > { %v3220_v17 = vpop.eup %3219  ;;  %3239 = vrcp.f32 %v1314_v8  ;;  %v1317_v18 = vadd.f32 1.0, %v3218_v11  ;;  %v4236_v21 = vpop.f32.mrb[13].mxu0  ;;  %v2671_v11 = vmul.f32 -1.442695, %v4264_v46 }
 0x17e   : > { %v3222_v22 = vpop.eup %3221  ;;  %3241 = vrcp.f32 %v1315_v12  ;;  %v1316_v25 = vadd.f32 1.0, %v3220_v17  ;;  %v4242_v30 = vpop.f32.mrb[13].mxu1 }
 0x17f   : > { %v4244_v31 = vpop.f32.mrb[14].mxu0  ;;  %v3224_v32 = vpop.eup %3223  ;;  %3243 = vrcp.f32 %v1317_v18  ;;  %v1318_v34 = vadd.f32 1.0, %v3222_v22  ;;  %v4297_v22 = vadd.f32 %v601_v14, %v4167_v56 }
 0x180   : > { %v4252_v37 = vpop.f32.mrb[14].mxu1  ;;  %v4254_v38 = vpop.f32.mrb[15].mxu0  ;;  %3245 = vrcp.f32 %v1316_v25  ;;  %v1319_v40 = vadd.f32 1.0, %v3224_v32  ;;  %v2673_v32 = vmul.f32 -1.442695, %v4270_v54 }
 0x181   : > { %v3226_v39 = vpop.eup %3225  ;;  %v4260_v44 = vpop.f32.mrb[15].mxu1  ;;  %3247 = vrcp.f32 %v1318_v34  ;;  %5369 = vst [vmem:[#allocation12_spill] sm:$0xff] %v4297_v22  ;;  %v4307_v34 = vadd.f32 %v794_v20, %v4169_v57 }
 0x182   : > { %v3228_v45 = vpop.eup %3227  ;;  %3249 = vrcp.f32 %v1319_v40  ;;  %v4284_v8 = vmul.f32 %v3226_v39, %v4176_v62  ;;  %v2672_v40 = vmul.f32 -1.442695, %v4274_v0 }
 0x183   : > { %v3230_v48 = vpop.eup %3229  ;;  %3251 = vpow2.f32 %v2665_v26  ;;  %v4279_v2 = vpop.f32.mrb[16].mxu0  ;;  %v1693_v17 = vmul.f32 %v3228_v45, %v4179_v63  ;;  %5370 = vst [vmem:[#allocation13_spill] sm:$0xff] %v4307_v34  ;;  %v2674_v45 = vmul.f32 -1.442695, %v4277_v1 }
 0x184   : > { %v3232_v51 = vpop.eup %3231  ;;  %3253 = vpow2.f32 %v2664_v41  ;;  %v4281_v5 = vpop.f32.mrb[16].mxu1 }
 0x185   : > { %v3234_v55 = vpop.eup %3233  ;;  %3255 = vpow2.f32 %v2666_v43  ;;  %v4290_v12 = vpop.f32.mrb[17].mxu0 }
 0x186   : > { %v3236_v7 = vpop.eup %3235  ;;  %v4287_v50 = vmul.f32 %v3234_v55, %v4190_v9  ;;  %v4292_v53 = vpop.f32.mrb[17].mxu1  ;;  %3257 = vpow2.f32 %v2667_v49 }
 0x187   : > { %v3238_v60 = vpop.eup %3237  ;;  %v1697_v18 = vmul.f32 %v3236_v7, %v4193_v10  ;;  %v4299_v62 = vpop.f32.mrb[18].mxu0  ;;  %3259 = vpow2.f32 %v2669_v52  ;;  %v2675_v52 = vmul.f32 -1.442695, %v4297_v22 }
 0x188   : > { %v4301_v9 = vpop.f32.mrb[18].mxu1  ;;  %v3240_v25 = vpop.eup %3239  ;;  %v1819_v26 = vpack.c.bf16 %v4287_v50, %v4284_v8  ;;  %3261 = vpow2.f32 %v2668_v47  ;;  %v1696_v20 = vmul.f32 %v3238_v60, %v4198_v15  ;;  %v2677_v47 = vmul.f32 -1.442695, %v4307_v34 }
 0x189   : > { %v4309_v63 = vpop.f32.mrb[19].mxu0  ;;  %v4311_v10 = vpop.f32.mrb[19].mxu1  ;;  %v1821_v39 = vpack.c.bf16 %v1697_v18, %v1693_v17  ;;  %3263 = vpow2.f32 %v2670_v61  ;;  %v1698_v49 = vmul.f32 %v3240_v25, %v4201_v16  ;;  %v1692_v8 = vmul.f32 %v3230_v48, %v4182_v3 }
 0x18a   : > { %v4313_v14 = vpop.eup %3241  ;;  %3265 = vpow2.f32 %v2671_v11  ;;  %v1694_v61 = vmul.f32 %v3232_v51, %v4185_v4 }
 0x18b   : > { %v4316_v41 = vpop.eup %3243  ;;  %3267 = vpow2.f32 %v2673_v32  ;;  %v4329_v50 = vpop.f32.mrb[20].mxu0  ;;  %v1820_v25 = vpack.c.bf16 %v1696_v20, %v1692_v8  ;;  %v4351_v8 = vadd.f32 %v4242_v30, %v4173_v59 }
 0x18c   : > { %v4319_v43 = vpop.eup %3245  ;;  %3269 = vpow2.f32 %v2672_v40  ;;  %v4331_v17 = vpop.f32.mrb[20].mxu1  ;;  %v1822_v32 = vpack.c.bf16 %v1698_v49, %v1694_v61 }
 0x18d   : > { %v4324_v55 = vpop.eup %3247  ;;  %3271 = vpow2.f32 %v2674_v45  ;;  %v4333_v16 = vpop.f32.mrb[21].mxu0  ;;  %2178 = vmatprep.mubr.bf16.mxu0 %v1820_v25 }
 0x18e   : > { %v3250_v7 = vpop.eup %3249  ;;  %v4335_v11 = vpop.f32.mrb[21].mxu1  ;;  %3273 = vpow2.f32 %v2675_v52  ;;  %2339 = vmatprep.mubr.bf16.mxu1 %v1822_v32  ;;  %2179 = vmatmul.mubr.bf16.vlgmr.msra.gmra.mrb[64].mxu0 %v1819_v26  ;;  %v4358_v26 = vadd.f32 %v4244_v31, %v4167_v56  ;;  %v4374_v31 = vadd.f32 %v4254_v38, %v4171_v58 }
 0x18f   : > { %v3252_v15 = vpop.eup %3251  ;;  %v4337_v34 = vpop.f32.mrb[22].mxu0  ;;  %3275 = vpow2.f32 %v2677_v47  ;;  %2340 = vmatmul.mubr.bf16.vlgmr.msra.gmra.mrb[64].mxu1 %v1821_v39  ;;  %v4347_v47 = vadd.f32 %v4236_v21, %v4171_v58  ;;  %v4362_v21 = vadd.f32 %v4252_v37, %v4169_v57 }
 0x190   : > { %v3254_v60 = vpop.eup %3253  ;;  %v1321_v18 = vadd.f32 1.0, %v3252_v15  ;;  %v4339_v3 = vpop.f32.mrb[22].mxu1 }
 0x191   : > { %v3256_v4 = vpop.eup %3255  ;;  %v1320_v48 = vadd.f32 1.0, %v3254_v60  ;;  %v4341_v51 = vpop.f32.mrb[23].mxu0  ;;  %v4354_v60 = vmul.f32 %v3250_v7, %v4222_v33  ;;  %v4370_v33 = vmul.f32 %v4313_v14, %v4208_v23 }
 0x192   : > { %v4343_v40 = vpop.f32.mrb[23].mxu1  ;;  %v3258_v45 = vpop.eup %3257  ;;  %3277 = vrcp.f32 %v1321_v18  ;;  %v1322_v22 = vadd.f32 1.0, %v3256_v4 }
 0x193   : > { %v3260_v15 = vpop.eup %3259  ;;  %3279 = vrcp.f32 %v1320_v48  ;;  %v1323_v20 = vadd.f32 1.0, %v3258_v45  ;;  %v4364_v25 = vpop.f32.mrb[24].mxu0  ;;  %v1823_v38 = vpack.c.bf16 %v4354_v60, %v4370_v33  ;;  %v2680_v60 = vmul.f32 -1.442695, %v4374_v31 }
 0x194   : > { %v3262_v49 = vpop.eup %3261  ;;  %3281 = vrcp.f32 %v1322_v22  ;;  %v1325_v52 = vadd.f32 1.0, %v3260_v15  ;;  %v4366_v30 = vpop.f32.mrb[24].mxu1  ;;  %v2676_v15 = vmul.f32 -1.442695, %v4347_v47  ;;  %v4401_v33 = vadd.f32 %v4279_v2, %v4167_v56 }
 0x195   : > { %v3264_v61 = vpop.eup %3263  ;;  %3283 = vrcp.f32 %v1323_v20  ;;  %v1324_v18 = vadd.f32 1.0, %v3262_v49  ;;  %v4376_v4 = vpop.f32.mrb[25].mxu0  ;;  %v2678_v20 = vmul.f32 -1.442695, %v4351_v8  ;;  %v4416_v2 = vadd.f32 %v4292_v53, %v4173_v59 }
 0x196   : > { %v3266_v22 = vpop.eup %3265  ;;  %3285 = vrcp.f32 %v1325_v52  ;;  %v1326_v39 = vadd.f32 1.0, %v3264_v61  ;;  %v4378_v48 = vpop.f32.mrb[25].mxu1  ;;  %v2679_v52 = vmul.f32 -1.442695, %v4358_v26  ;;  %v1702_v53 = vmul.f32 %v4324_v55, %v4217_v28 }
 0x197   : > { %v3268_v32 = vpop.eup %3267  ;;  %3287 = vrcp.f32 %v1324_v18  ;;  %v1327_v7 = vadd.f32 1.0, %v3266_v22  ;;  %5371 = vst [vmem:[#allocation14_spill] sm:$0xff] %v4378_v48  ;;  %v4382_v49 = vpop.f32.mrb[26].mxu0  ;;  %5376 = vst [vmem:[#allocation19_spill] sm:$0xff] %v4416_v2  ;;  %v2683_v55 = vmul.f32 -1.442695, %v4401_v33 }
 0x198   : > { %v3270_v37 = vpop.eup %3269  ;;  %3289 = vrcp.f32 %v1326_v39  ;;  %v1329_v45 = vadd.f32 1.0, %v3268_v32  ;;  %5372 = vst [vmem:[#allocation15_spill] sm:$0xff] %v4382_v49  ;;  %v4387_v61 = vpop.f32.mrb[26].mxu1  ;;  %v2681_v32 = vmul.f32 -1.442695, %v4362_v21  ;;  %v4394_v49 = vadd.f32 %v4260_v44, %v4173_v59 }
 0x199   : > { %v3272_v23 = vpop.eup %3271  ;;  %3291 = vrcp.f32 %v1327_v7  ;;  %v1328_v14 = vadd.f32 1.0, %v3270_v37  ;;  %5373 = vst [vmem:[#allocation16_spill] sm:$0xff] %v4387_v61  ;;  %v4389_v18 = vpop.f32.mrb[27].mxu0  ;;  %v4409_v44 = vadd.f32 %v4290_v12, %v4171_v58  ;;  %v4423_v12 = vadd.f32 %v4299_v62, %v4167_v56 }
 0x19a   : > { %5374 = vst [vmem:[#allocation17_spill] sm:$0xff] %v4389_v18  ;;  %v3274_v22 = vpop.eup %3273  ;;  %3293 = vrcp.f32 %v1329_v45  ;;  %v1330_v39 = vadd.f32 1.0, %v3272_v23  ;;  %v4396_v7 = vpop.f32.mrb[27].mxu1  ;;  %v4405_v23 = vadd.f32 %v4281_v5, %v4169_v57  ;;  %v1700_v5 = vmul.f32 %v4319_v43, %v4214_v27 }
 0x19b   : > { %5375 = vst [vmem:[#allocation18_spill] sm:$0xff] %v4396_v7  ;;  %v3276_v37 = vpop.eup %3275  ;;  %3295 = vrcp.f32 %v1328_v14  ;;  %v1331_v48 = vadd.f32 1.0, %v3274_v22  ;;  %v1701_v14 = vmul.f32 %v4316_v41, %v4211_v24  ;;  %v4425_v61 = vpop.f32.mrb[28].mxu0  ;;  %v2682_v62 = vmul.f32 -1.442695, %v4394_v49 }
 0x19c   : > { %v3278_v18 = vpop.eup %3277  ;;  %3297 = vrcp.f32 %v1330_v39  ;;  %v1333_v45 = vadd.f32 1.0, %v3276_v37  ;;  %v4427_v24 = vpop.f32.mrb[28].mxu1 }
 0x19d   : > { %v3280_v7 = vpop.eup %3279  ;;  %v1705_v22 = vmul.f32 %v3278_v18, %v4228_v6  ;;  %3299 = vrcp.f32 %v1331_v48  ;;  %v4432_v27 = vpop.f32.mrb[29].mxu0  ;;  %v4439_v18 = vadd.f32 %v4301_v9, %v4169_v57 }
 0x19e   : > { %v3282_v39 = vpop.eup %3281  ;;  %v1704_v37 = vmul.f32 %v3280_v7, %v4231_v13  ;;  %3301 = vrcp.f32 %v1333_v45  ;;  %v4434_v13 = vpop.f32.mrb[29].mxu1 }
 0x19f   : > { %v3284_v6 = vpop.eup %3283  ;;  %v1706_v41 = vmul.f32 %v3282_v39, %v4234_v19  ;;  %3303 = vpow2.f32 %v2676_v15  ;;  %v1825_v48 = vpack.c.bf16 %v1705_v22, %v1701_v14  ;;  %v4441_v45 = vpop.f32.mrb[30].mxu0  ;;  %v4448_v15 = vadd.f32 %v4309_v63, %v4171_v58 }
 0x1a0   : > { %v3286_v43 = vpop.eup %3285  ;;  %3305 = vpow2.f32 %v2678_v20  ;;  %v1824_v7 = vpack.c.bf16 %v1704_v37, %v1700_v5  ;;  %v4443_v28 = vpop.f32.mrb[30].mxu1  ;;  %v2685_v39 = vmul.f32 -1.442695, %v4405_v23  ;;  %v2686_v37 = vmul.f32 -1.442695, %v4416_v2 }
 0x1a1   : > { %5377 = vst [vmem:[#allocation20_spill] sm:$0xff] %v4443_v28  ;;  %v3288_v19 = vpop.eup %3287  ;;  %3307 = vpow2.f32 %v2679_v52  ;;  %v1826_v20 = vpack.c.bf16 %v1706_v41, %v1702_v53  ;;  %v4450_v14 = vpop.f32.mrb[31].mxu0  ;;  %v2684_v52 = vmul.f32 -1.442695, %v4409_v44  ;;  %v2687_v28 = vmul.f32 -1.442695, %v4423_v12 }
 0x1a2   : > { %5378 = vst [vmem:[#allocation21_spill] sm:$0xff] %v4450_v14  ;;  %v4452_v22 = vpop.f32.mrb[31].mxu1  ;;  %v3290_v9 = vpop.eup %3289  ;;  %3309 = vpow2.f32 %v2681_v32  ;;  %2186 = vmatprep.mubr.bf16.mxu0 %v1824_v7  ;;  %v1707_v53 = vmul.f32 %v3284_v6, %v4240_v29  ;;  %v2689_v32 = vmul.f32 -1.442695, %v4439_v18  ;;  %v2688_v14 = vmul.f32 -1.442695, %v4448_v15 }
 0x1a3   : > { %5379 = vst [vmem:[#allocation22_spill] sm:$0xff] %v4452_v22  ;;  %v3292_v5 = vpop.eup %3291  ;;  %3311 = vpow2.f32 %v2680_v60  ;;  %2347 = vmatprep.mubr.bf16.mxu1 %v1826_v20  ;;  %2187 = vmatmul.mubr.bf16.gmra.mrb[68].mxu0 %v1823_v38  ;;  %v1709_v60 = vmul.f32 %v3286_v43, %v4247_v35  ;;  %v1708_v38 = vmul.f32 %v3288_v19, %v4250_v36  ;;  %v4468_v6 = vpop.f32.mrb[32].mxu1 }
 0x1a4   : > { %v3294_v63 = vpop.eup %3293  ;;  %v1711_v41 = vmul.f32 %v3292_v5, %v4264_v46  ;;  %3313 = vpow2.f32 %v2682_v62  ;;  %2348 = vmatmul.mubr.bf16.gmra.mrb[68].mxu1 %v1825_v48  ;;  %v4466_v46 = vpop.f32.mrb[32].mxu0  ;;  %v1710_v35 = vmul.f32 %v3290_v9, %v4258_v42 }
 0x1a5   : > { %v3296_v7 = vpop.eup %3295  ;;  %v1713_v22 = vmul.f32 %v3294_v63, %v4270_v54  ;;  %3315 = vpow2.f32 %v2683_v55  ;;  %v4474_v62 = vpop.f32.mrb[33].mxu0 }
 0x1a6   : > { %v3298_v2 = vpop.eup %3297  ;;  %v1712_v20 = vmul.f32 %v3296_v7, %v4274_v0  ;;  %3317 = vpow2.f32 %v2685_v39  ;;  %v1827_v29 = vpack.c.bf16 %v1711_v41, %v1707_v53  ;;  %v4476_v55 = vpop.f32.mrb[33].mxu1 }
 0x1a7   : > { %v4470_v48 = vpop.eup %3299  ;;  %v1714_v54 = vmul.f32 %v3298_v2, %v4277_v1  ;;  %3319 = vpow2.f32 %v2684_v52  ;;  %v1829_v43 = vpack.c.bf16 %v1713_v22, %v1709_v60  ;;  %v4480_v19 = vpop.f32.mrb[34].mxu0 }
 0x1a8   : > { %v4478_v36 = vpop.eup %3301  ;;  %3321 = vpow2.f32 %v2686_v37  ;;  %v1828_v0 = vpack.c.bf16 %v1712_v20, %v1708_v38  ;;  %v4482_v39 = vpop.f32.mrb[34].mxu1  ;;  %v4490_v38 = vadd.f32 %v4311_v10, %v4173_v59 }
 0x1a9   : > { %v3304_v5 = vpop.eup %3303  ;;  %3323 = vpow2.f32 %v2687_v28  ;;  %v1830_v63 = vpack.c.bf16 %v1714_v54, %v1710_v35  ;;  %v4484_v42 = vpop.f32.mrb[35].mxu0 }
 0x1aa   : > { %v4486_v1 = vpop.f32.mrb[35].mxu1  ;;  %v3306_v2 = vpop.eup %3305  ;;  %v1332_v22 = vadd.f32 1.0, %v3304_v5  ;;  %3325 = vpow2.f32 %v2689_v32  ;;  %2194 = vmatprep.mubr.bf16.mxu0 %v1828_v0 }
 0x1ab   : > { %5380 = vst [vmem:[#allocation23_spill] sm:$0xff] %v4486_v1  ;;  %v3308_v9 = vpop.eup %3307  ;;  %v1334_v52 = vadd.f32 1.0, %v3306_v2  ;;  %3327 = vpow2.f32 %v2688_v14  ;;  %2355 = vmatprep.mubr.bf16.mxu1 %v1830_v63  ;;  %2195 = vmatmul.mubr.bf16.gmra.mrb[72].mxu0 %v1827_v29  ;;  %v4492_v32 = vpop.f32.mrb[36].mxu0  ;;  %v5398_v1 = vld [vmem:[#allocation13_spill] sm:$0xff] }
 0x1ac   : > { %v3310_v37 = vpop.eup %3309  ;;  %3329 = vrcp.f32 %v1332_v22  ;;  %v1335_v53 = vadd.f32 1.0, %v3308_v9  ;;  %2356 = vmatmul.mubr.bf16.gmra.mrb[72].mxu1 %v1829_v43  ;;  %5381 = vst [vmem:[#allocation24_spill] sm:$0xff] %v4492_v32  ;;  %v4494_v20 = vpop.f32.mrb[36].mxu1  ;;  %v4506_v22 = vadd.f32 %v4329_v50, %v4167_v56  ;;  %v4510_v9 = vadd.f32 %v4331_v17, %v4169_v57 }
 0x1ad   : > { %v3312_v41 = vpop.eup %3311  ;;  %3331 = vrcp.f32 %v1334_v52  ;;  %v1337_v28 = vadd.f32 1.0, %v3310_v37  ;;  %5382 = vst [vmem:[#allocation25_spill] sm:$0xff] %v4494_v20  ;;  %v4496_v35 = vpop.f32.mrb[37].mxu0  ;;  %v4523_v17 = vadd.f32 %v4335_v11, %v4173_v59 }
 0x1ae   : > { %v3314_v7 = vpop.eup %3313  ;;  %3333 = vrcp.f32 %v1335_v53  ;;  %v1336_v60 = vadd.f32 1.0, %v3312_v41  ;;  %5383 = vst [vmem:[#allocation26_spill] sm:$0xff] %v4496_v35  ;;  %v4498_v54 = vpop.f32.mrb[37].mxu1  ;;  %v2690_v41 = vmul.f32 -1.442695, %v4490_v38  ;;  %v5395_v35 = vld [vmem:[#allocation12_spill] sm:$0xff] }
 0x1af   : > { %v3316_v14 = vpop.eup %3315  ;;  %3335 = vrcp.f32 %v1337_v28  ;;  %v1338_v29 = vadd.f32 1.0, %v3314_v7  ;;  %5384 = vst [vmem:[#allocation27_spill] sm:$0xff] %v4498_v54  ;;  %v4500_v5 = vpop.f32.mrb[38].mxu0  ;;  %v4517_v28 = vadd.f32 %v4333_v16, %v4171_v58  ;;  %v4531_v16 = vadd.f32 %v4339_v3, %v4169_v57 }
 0x1b0   : > { %v3318_v43 = vpop.eup %3317  ;;  %3337 = vrcp.f32 %v1336_v60  ;;  %v1339_v0 = vadd.f32 1.0, %v3316_v14  ;;  %5385 = vst [vmem:[#allocation28_spill] sm:$0xff] %v4500_v5  ;;  %v4502_v63 = vpop.f32.mrb[38].mxu1  ;;  %v4527_v14 = vadd.f32 %v4337_v34, %v4167_v56  ;;  %v2691_v11 = vmul.f32 -1.442695, %v4506_v22 }
 0x1b1   : > { %5386 = vst [vmem:[#allocation29_spill] sm:$0xff] %v4502_v63  ;;  %v3320_v10 = vpop.eup %3319  ;;  %3339 = vrcp.f32 %v1338_v29  ;;  %v1341_v2 = vadd.f32 1.0, %v3318_v43  ;;  %v4512_v52 = vpop.f32.mrb[39].mxu0 }
 0x1b2   : > { %5387 = vst [vmem:[#allocation30_spill] sm:$0xff] %v4512_v52  ;;  %v3322_v37 = vpop.eup %3321  ;;  %3341 = vrcp.f32 %v1339_v0  ;;  %v1340_v53 = vadd.f32 1.0, %v3320_v10  ;;  %v4519_v7 = vpop.f32.mrb[39].mxu1  ;;  %v4535_v0 = vadd.f32 %v4341_v51, %v4171_v58  ;;  %v2694_v51 = vmul.f32 -1.442695, %v4523_v17 }
 0x1b3   : > { %5388 = vst [vmem:[#allocation31_spill] sm:$0xff] %v4519_v7  ;;  %v3324_v60 = vpop.eup %3323  ;;  %3343 = vrcp.f32 %v1341_v2  ;;  %v1342_v50 = vadd.f32 1.0, %v3322_v37  ;;  %v2693_v37 = vmul.f32 -1.442695, %v4510_v9  ;;  %v4542_v3 = vpop.f32.mrb[40].mxu1 }
 0x1b4   : > { %v3326_v29 = vpop.eup %3325  ;;  %3345 = vrcp.f32 %v1340_v53  ;;  %v1343_v43 = vadd.f32 1.0, %v3324_v60  ;;  %v2692_v53 = vmul.f32 -1.442695, %v4517_v28  ;;  %v4540_v60 = vpop.f32.mrb[40].mxu0  ;;  %5390 = vst [vmem:[#allocation33_spill] sm:$0xff] %v4542_v3 }
 0x1b5   : > { %v3328_v10 = vpop.eup %3327  ;;  %3347 = vrcp.f32 %v1342_v50  ;;  %v1345_v2 = vadd.f32 1.0, %v3326_v29  ;;  %5389 = vst [vmem:[#allocation32_spill] sm:$0xff] %v4540_v60  ;;  %v2695_v50 = vmul.f32 -1.442695, %v4527_v14  ;;  %v4548_v29 = vadd.f32 %v4343_v40, %v4173_v59  ;;  %v4550_v63 = vpop.f32.mrb[41].mxu0 }
 0x1b6   : > { %v3330_v34 = vpop.eup %3329  ;;  %3349 = vrcp.f32 %v1343_v43  ;;  %v1344_v7 = vadd.f32 1.0, %v3328_v10  ;;  %5391 = vst [vmem:[#allocation34_spill] sm:$0xff] %v4550_v63  ;;  %v4552_v43 = vpop.f32.mrb[41].mxu1  ;;  %v2697_v60 = vmul.f32 -1.442695, %v4531_v16  ;;  %v1715_v63 = vmul.f32 %v4470_v48, %v5395_v35 }
 0x1b7   : > { %v3332_v52 = vpop.eup %3331  ;;  %3351 = vrcp.f32 %v1345_v2  ;;  %5392 = vst [vmem:[#allocation35_spill] sm:$0xff] %v4552_v43  ;;  %v2696_v3 = vmul.f32 -1.442695, %v4535_v0  ;;  %v4558_v2 = vadd.f32 %v4364_v25, %v4167_v56  ;;  %v4560_v5 = vpop.f32.mrb[42].mxu0  ;;  %v4580_v48 = vadd.f32 %v4376_v4, %v4171_v58  ;;  %v5399_v4 = vld [vmem:[#allocation14_spill] sm:$0xff] }
 0x1b8   : > { %v3334_v10 = vpop.eup %3333  ;;  %3353 = vrcp.f32 %v1344_v7  ;;  %5393 = vst [vmem:[#allocation36_spill] sm:$0xff] %v4560_v5  ;;  %v4562_v54 = vpop.f32.mrb[42].mxu1  ;;  %v4569_v7 = vadd.f32 %v4366_v30, %v4169_v57  ;;  %v1717_v5 = vmul.f32 %v4478_v36, %v5398_v1  ;;  %v1716_v35 = vmul.f32 %v3330_v34, %v4347_v47 }
 0x1b9   : > { %5394 = vst [vmem:[#allocation37_spill] sm:$0xff] %v4562_v54  ;;  %v3336_v40 = vpop.eup %3335  ;;  %v1719_v43 = vmul.f32 %v3334_v10, %v4358_v26  ;;  %3355 = vpow2.f32 %v2690_v41  ;;  %v4571_v20 = vpop.f32.mrb[43].mxu0  ;;  %v2698_v1 = vmul.f32 -1.442695, %v4548_v29 }
 0x1ba   : > { %5396 = vst [vmem:[#allocation12_spill] sm:$0xff] %v4571_v20  ;;  %v4573_v32 = vpop.f32.mrb[43].mxu1  ;;  %v3338_v25 = vpop.eup %3337  ;;  %v1721_v54 = vmul.f32 %v3336_v40, %v4362_v21  ;;  %3357 = vpow2.f32 %v2691_v11  ;;  %v4589_v11 = vadd.f32 %v5399_v4, %v4173_v59 }
 0x1bb   : > { %5397 = vst [vmem:[#allocation38_spill] sm:$0xff] %v4573_v32  ;;  %v3340_v26 = vpop.eup %3339  ;;  %v1720_v30 = vmul.f32 %v3338_v25, %v4374_v31  ;;  %3359 = vpow2.f32 %v2693_v37  ;;  %v1831_v41 = vpack.c.bf16 %v1719_v43, %v1715_v63  ;;  %v1718_v32 = vmul.f32 %v3332_v52, %v4351_v8  ;;  %v4592_v37 = vpop.f32.mrb[44].mxu0 }
 0x1bc   : > { %v3342_v10 = vpop.eup %3341  ;;  %v1722_v20 = vmul.f32 %v3340_v26, %v4394_v49  ;;  %3361 = vpow2.f32 %v2692_v53  ;;  %v1833_v36 = vpack.c.bf16 %v1721_v54, %v1717_v5  ;;  %v2699_v31 = vmul.f32 -1.442695, %v4558_v2  ;;  %v4594_v8 = vpop.f32.mrb[44].mxu1 }
 0x1bd   : > { %v3344_v21 = vpop.eup %3343  ;;  %3363 = vpow2.f32 %v2694_v51  ;;  %v1832_v47 = vpack.c.bf16 %v1720_v30, %v1716_v35  ;;  %v2701_v54 = vmul.f32 -1.442695, %v4569_v7  ;;  %v4599_v5 = vpop.f32.mrb[45].mxu0  ;;  %v2700_v51 = vmul.f32 -1.442695, %v4580_v48 }
 0x1be   : > { %v3346_v34 = vpop.eup %3345  ;;  %3365 = vpow2.f32 %v2695_v50  ;;  %v1834_v63 = vpack.c.bf16 %v1722_v20, %v1718_v32  ;;  %v4601_v52 = vpop.f32.mrb[45].mxu1  ;;  %v2702_v40 = vmul.f32 -1.442695, %v4589_v11  ;;  %v4616_v35 = vmul.f32 %v3344_v21, %v4405_v23 }
 0x1bf   : > { %v4596_v49 = vpop.eup %3347  ;;  %3367 = vpow2.f32 %v2697_v60  ;;  %2202 = vmatprep.mubr.bf16.mxu0 %v1832_v47  ;;  %v4604_v32 = vpop.f32.mrb[46].mxu0  ;;  %v1723_v60 = vmul.f32 %v3342_v10, %v4401_v33  ;;  %v1724_v33 = vmul.f32 %v3346_v34, %v4409_v44 }
 0x1c0   : > { %v3350_v53 = vpop.eup %3349  ;;  %3369 = vpow2.f32 %v2696_v3  ;;  %2363 = vmatprep.mubr.bf16.mxu1 %v1834_v63  ;;  %2203 = vmatmul.mubr.bf16.gmra.mrb[76].mxu0 %v1831_v41  ;;  %v4606_v20 = vpop.f32.mrb[46].mxu1 }
 0x1c1   : > { %v3352_v50 = vpop.eup %3351  ;;  %v1727_v43 = vmul.f32 %v3350_v53, %v4423_v12  ;;  %3371 = vpow2.f32 %v2698_v1  ;;  %2364 = vmatmul.mubr.bf16.gmra.mrb[76].mxu1 %v1833_v36  ;;  %v4611_v25 = vpop.f32.mrb[47].mxu0 }
 0x1c2   : > { %5400 = vst [vmem:[#allocation13_spill] sm:$0xff] %v4611_v25  ;;  %v4613_v3 = vpop.f32.mrb[47].mxu1  ;;  %v3354_v26 = vpop.eup %3353  ;;  %v4619_v30 = vmul.f32 %v3352_v50, %v4439_v18  ;;  %3373 = vpow2.f32 %v2699_v31 }
 0x1c3   : > { %5401 = vst [vmem:[#allocation14_spill] sm:$0xff] %v4613_v3  ;;  %v3356_v41 = vpop.eup %3355  ;;  %v1728_v12 = vmul.f32 %v3354_v26, %v4448_v15  ;;  %3375 = vpow2.f32 %v2701_v54  ;;  %v1835_v10 = vpack.c.bf16 %v1727_v43, %v1723_v60  ;;  %v4625_v63 = vpop.f32.mrb[48].mxu0  ;;  %v5406_v60 = vld [vmem:[#allocation15_spill] sm:$0xff] }
 0x1c4   : > { %v3358_v36 = vpop.eup %3357  ;;  %v1346_v1 = vadd.f32 1.0, %v3356_v41  ;;  %3377 = vpow2.f32 %v2700_v51  ;;  %5402 = vst [vmem:[#allocation39_spill] sm:$0xff] %v4625_v63  ;;  %v4627_v44 = vpop.f32.mrb[48].mxu1  ;;  %v4635_v43 = vadd.f32 %v5406_v60, %v4167_v56 }
 0x1c5   : > { %v3360_v47 = vpop.eup %3359  ;;  %v1347_v23 = vadd.f32 1.0, %v3358_v36  ;;  %3379 = vpow2.f32 %v2702_v40  ;;  %v1836_v21 = vpack.c.bf16 %v1728_v12, %v1724_v33  ;;  %5403 = vst [vmem:[#allocation40_spill] sm:$0xff] %v4627_v44  ;;  %v4629_v54 = vpop.f32.mrb[49].mxu0  ;;  %v5408_v33 = vld [vmem:[#allocation16_spill] sm:$0xff]  ;;  %v5409_v36 = vld [vmem:[#allocation17_spill] sm:$0xff]  ;;  %v5425_v44 = vld [vmem:[#allocation22_spill] sm:$0xff] }
 0x1c6   : > { %v3362_v18 = vpop.eup %3361  ;;  %3381 = vrcp.f32 %v1346_v1  ;;  %v1349_v31 = vadd.f32 1.0, %v3360_v47  ;;  %5404 = vst [vmem:[#allocation41_spill] sm:$0xff] %v4629_v54  ;;  %v4631_v53 = vpop.f32.mrb[49].mxu1  ;;  %v4641_v12 = vadd.f32 %v5408_v33, %v4169_v57  ;;  %v4645_v1 = vadd.f32 %v5409_v36, %v4171_v58 }
 0x1c7   : > { %v3364_v15 = vpop.eup %3363  ;;  %3383 = vrcp.f32 %v1347_v23  ;;  %v1348_v34 = vadd.f32 1.0, %v3362_v18  ;;  %2210 = vmatprep.mubr.bf16.mxu0 %v1836_v21  ;;  %5405 = vst [vmem:[#allocation42_spill] sm:$0xff] %v4631_v53  ;;  %v4637_v40 = vpop.f32.mrb[50].mxu0  ;;  %v2703_v60 = vmul.f32 -1.442695, %v4635_v43  ;;  %v4716_v63 = vadd.f32 %v5425_v44, %v4173_v59 }
 0x1c8   : > { %v3366_v51 = vpop.eup %3365  ;;  %3385 = vrcp.f32 %v1349_v31  ;;  %v1350_v50 = vadd.f32 1.0, %v3364_v15  ;;  %2211 = vmatmul.mubr.bf16.gmra.mrb[80].mxu0 %v1835_v10  ;;  %5407 = vst [vmem:[#allocation15_spill] sm:$0xff] %v4637_v40  ;;  %v4647_v47 = vpop.f32.mrb[50].mxu1  ;;  %v2705_v4 = vmul.f32 -1.442695, %v4641_v12 }
 0x1c9   : > { %v3368_v26 = vpop.eup %3367  ;;  %3387 = vrcp.f32 %v1348_v34  ;;  %v1351_v41 = vadd.f32 1.0, %v3366_v51  ;;  %5410 = vst [vmem:[#allocation16_spill] sm:$0xff] %v4647_v47  ;;  %v4649_v18 = vpop.f32.mrb[51].mxu0 }
 0x1ca   : > { %v3370_v23 = vpop.eup %3369  ;;  %3389 = vrcp.f32 %v1350_v50  ;;  %v1353_v21 = vadd.f32 1.0, %v3368_v26  ;;  %5411 = vst [vmem:[#allocation17_spill] sm:$0xff] %v4649_v18  ;;  %v4651_v10 = vpop.f32.mrb[51].mxu1  ;;  %v2704_v50 = vmul.f32 -1.442695, %v4645_v1 }
 0x1cb   : > { %5412 = vst [vmem:[#allocation43_spill] sm:$0xff] %v4651_v10  ;;  %v3372_v31 = vpop.eup %3371  ;;  %3391 = vrcp.f32 %v1351_v41  ;;  %v1352_v15 = vadd.f32 1.0, %v3370_v23  ;;  %v5413_v10 = vld [vmem:[#allocation18_spill] sm:$0xff]  ;;  %v4662_v41 = vadd.f32 %v4425_v61, %v4167_v56  ;;  %v4664_v23 = vpop.f32.mrb[52].mxu0 }
 0x1cc   : > { %v3374_v34 = vpop.eup %3373  ;;  %3393 = vrcp.f32 %v1353_v21  ;;  %v1354_v51 = vadd.f32 1.0, %v3372_v31  ;;  %v4658_v47 = vadd.f32 %v5413_v10, %v4173_v59  ;;  %5414 = vst [vmem:[#allocation18_spill] sm:$0xff] %v4664_v23  ;;  %v4666_v21 = vpop.f32.mrb[52].mxu1 }
 0x1cd   : > { %v3376_v33 = vpop.eup %3375  ;;  %3395 = vrcp.f32 %v1352_v15  ;;  %v1355_v36 = vadd.f32 1.0, %v3374_v34  ;;  %5415 = vst [vmem:[#allocation44_spill] sm:$0xff] %v4666_v21  ;;  %v4670_v34 = vadd.f32 %v4427_v24, %v4169_v57  ;;  %v4676_v10 = vpop.f32.mrb[53].mxu0  ;;  %v4682_v21 = vadd.f32 %v4434_v13, %v4173_v59 }
 0x1ce   : > { %v3378_v26 = vpop.eup %3377  ;;  %3397 = vrcp.f32 %v1354_v51  ;;  %v1357_v18 = vadd.f32 1.0, %v3376_v33  ;;  %v4674_v51 = vadd.f32 %v4432_v27, %v4171_v58  ;;  %5416 = vst [vmem:[#allocation45_spill] sm:$0xff] %v4676_v10  ;;  %v4678_v33 = vpop.f32.mrb[53].mxu1  ;;  %v5419_v27 = vld [vmem:[#allocation19_spill] sm:$0xff] }
 0x1cf   : > { %v3380_v31 = vpop.eup %3379  ;;  %3399 = vrcp.f32 %v1355_v36  ;;  %v1356_v15 = vadd.f32 1.0, %v3378_v26  ;;  %5417 = vst [vmem:[#allocation46_spill] sm:$0xff] %v4678_v33  ;;  %v4686_v36 = vadd.f32 %v4441_v45, %v4167_v56  ;;  %v4688_v24 = vpop.f32.mrb[54].mxu0  ;;  %v1726_v40 = vmul.f32 %v4596_v49, %v5419_v27 }
 0x1d0   : > { %v3382_v61 = vpop.eup %3381  ;;  %3401 = vrcp.f32 %v1357_v18  ;;  %v1358_v23 = vadd.f32 1.0, %v3380_v31  ;;  %5418 = vst [vmem:[#allocation47_spill] sm:$0xff] %v4688_v24  ;;  %v5420_v18 = vld [vmem:[#allocation20_spill] sm:$0xff]  ;;  %v4697_v33 = vpop.f32.mrb[54].mxu1  ;;  %v2706_v45 = vmul.f32 -1.442695, %v4658_v47 }
 0x1d1   : > { %v3384_v26 = vpop.eup %3383  ;;  %v1730_v10 = vmul.f32 %v3382_v61, %v4490_v38  ;;  %3403 = vrcp.f32 %v1356_v15  ;;  %v4695_v31 = vadd.f32 %v5420_v18, %v4169_v57  ;;  %5421 = vst [vmem:[#allocation19_spill] sm:$0xff] %v4697_v33  ;;  %v4699_v13 = vpop.f32.mrb[55].mxu0  ;;  %v2707_v49 = vmul.f32 -1.442695, %v4662_v41  ;;  %v5424_v38 = vld [vmem:[#allocation21_spill] sm:$0xff] }
 0x1d2   : > { %5422 = vst [vmem:[#allocation20_spill] sm:$0xff] %v4699_v13  ;;  %v3386_v53 = vpop.eup %3385  ;;  %3405 = vrcp.f32 %v1358_v23  ;;  %v4702_v24 = vpop.f32.mrb[55].mxu1  ;;  %v4707_v15 = vadd.f32 %v5424_v38, %v4171_v58  ;;  %v2709_v18 = vmul.f32 -1.442695, %v4670_v34  ;;  %v2708_v13 = vmul.f32 -1.442695, %v4674_v51 }
 0x1d3   : > { %5423 = vst [vmem:[#allocation48_spill] sm:$0xff] %v4702_v24  ;;  %v3388_v54 = vpop.eup %3387  ;;  %3407 = vpow2.f32 %v2703_v60  ;;  %v1838_v61 = vpack.c.bf16 %v1730_v10, %v1726_v40  ;;  %v2710_v23 = vmul.f32 -1.442695, %v4682_v21  ;;  %v2711_v24 = vmul.f32 -1.442695, %v4686_v36  ;;  %v4727_v3 = vpop.f32.mrb[56].mxu0 }
 0x1d4   : > { %v3390_v27 = vpop.eup %3389  ;;  %3409 = vpow2.f32 %v2705_v4  ;;  %v2713_v60 = vmul.f32 -1.442695, %v4695_v31  ;;  %v1731_v4 = vmul.f32 %v3384_v26, %v4506_v22  ;;  %v4722_v38 = vadd.f32 %v4466_v46, %v4167_v56  ;;  %v4729_v25 = vpop.f32.mrb[56].mxu1 }
 0x1d5   : > { %v3392_v33 = vpop.eup %3391  ;;  %3411 = vpow2.f32 %v2704_v50  ;;  %2371 = vmatprep.mubr.bf16.mxu1 %v1838_v61  ;;  %v5426_v50 = vpack.c.bf16 %v4619_v30, %v4616_v35  ;;  %5427 = vst [vmem:[#allocation21_spill] sm:$0xff] %v4729_v25  ;;  %v1733_v61 = vmul.f32 %v3386_v53, %v4510_v9  ;;  %v4736_v46 = vpop.f32.mrb[57].mxu1  ;;  %v1732_v35 = vmul.f32 %v3388_v54, %v4517_v28 }
 0x1d6   : > { %v3394_v40 = vpop.eup %3393  ;;  %v1735_v10 = vmul.f32 %v3392_v33, %v4527_v14  ;;  %3413 = vpow2.f32 %v2706_v45  ;;  %v2712_v14 = vmul.f32 -1.442695, %v4707_v15  ;;  %v4734_v33 = vpop.f32.mrb[57].mxu0  ;;  %5428 = vst [vmem:[#allocation22_spill] sm:$0xff] %v4736_v46 }
 0x1d7   : > { %2372 = vmatmul.mubr.bf16.gmra.mrb[80].mxu1 %v5426_v50  ;;  %v3396_v44 = vpop.eup %3395  ;;  %v1737_v22 = vmul.f32 %v3394_v40, %v4531_v16  ;;  %3415 = vpow2.f32 %v2707_v49  ;;  %v4740_v50 = vpop.f32.mrb[58].mxu0  ;;  %v1734_v16 = vmul.f32 %v3390_v27, %v4523_v17 }
 0x1d8   : > { %v3398_v26 = vpop.eup %3397  ;;  %v1736_v30 = vmul.f32 %v3396_v44, %v4535_v0  ;;  %3417 = vpow2.f32 %v2709_v18  ;;  %v1839_v45 = vpack.c.bf16 %v1735_v10, %v1731_v4  ;;  %v4742_v25 = vpop.f32.mrb[58].mxu1  ;;  %v2714_v0 = vmul.f32 -1.442695, %v4716_v63 }
 0x1d9   : > { %v4744_v9 = vpop.eup %3399  ;;  %v1738_v53 = vmul.f32 %v3398_v26, %v4548_v29  ;;  %3419 = vpow2.f32 %v2708_v13  ;;  %v1841_v49 = vpack.c.bf16 %v1737_v22, %v1733_v61  ;;  %v4748_v40 = vpop.f32.mrb[59].mxu0  ;;  %v2715_v4 = vmul.f32 -1.442695, %v4722_v38 }
 0x1da   : > { %5429 = vst [vmem:[#allocation49_spill] sm:$0xff] %v4748_v40  ;;  %v4750_v46 = vpop.f32.mrb[59].mxu1  ;;  %v4752_v28 = vpop.eup %3401  ;;  %3421 = vpow2.f32 %v2710_v23  ;;  %v1840_v54 = vpack.c.bf16 %v1736_v30, %v1732_v35 }
 0x1db   : > { %5430 = vst [vmem:[#allocation50_spill] sm:$0xff] %v4750_v46  ;;  %v4755_v18 = vpop.eup %3403  ;;  %3423 = vpow2.f32 %v2711_v24  ;;  %v1842_v17 = vpack.c.bf16 %v1738_v53, %v1734_v16  ;;  %v4760_v23 = vpop.f32.mrb[60].mxu0 }
 0x1dc   : > { %v4758_v27 = vpop.eup %3405  ;;  %3425 = vpow2.f32 %v2713_v60  ;;  %2218 = vmatprep.mubr.bf16.mxu0 %v1840_v54  ;;  %5431 = vst [vmem:[#allocation51_spill] sm:$0xff] %v4760_v23  ;;  %v4762_v24 = vpop.f32.mrb[60].mxu1  ;;  %v4776_v54 = vadd.f32 %v4468_v6, %v4169_v57  ;;  %v4790_v6 = vadd.f32 %v4480_v19, %v4167_v56 }
 0x1dd   : > { %v3408_v29 = vpop.eup %3407  ;;  %3427 = vpow2.f32 %v2712_v14  ;;  %2379 = vmatprep.mubr.bf16.mxu1 %v1842_v17  ;;  %2219 = vmatmul.mubr.bf16.gmra.mrb[84].mxu0 %v1839_v45  ;;  %5432 = vst [vmem:[#allocation52_spill] sm:$0xff] %v4762_v24  ;;  %v4764_v22 = vpop.f32.mrb[61].mxu0  ;;  %v5442_v24 = vld [vmem:[#allocation26_spill] sm:$0xff] }
 0x1de   : > { %v3410_v13 = vpop.eup %3409  ;;  %v1359_v10 = vadd.f32 1.0, %v3408_v29  ;;  %3429 = vpow2.f32 %v2714_v0  ;;  %5433 = vst [vmem:[#allocation53_spill] sm:$0xff] %v4764_v22  ;;  %v4766_v35 = vpop.f32.mrb[61].mxu1 }
 0x1df   : > { %2380 = vmatmul.mubr.bf16.gmra.mrb[84].mxu1 %v1841_v49  ;;  %v3412_v44 = vpop.eup %3411  ;;  %v1361_v61 = vadd.f32 1.0, %v3410_v13  ;;  %3431 = vpow2.f32 %v2715_v4  ;;  %5434 = vst [vmem:[#allocation54_spill] sm:$0xff] %v4766_v35  ;;  %v4768_v14 = vpop.f32.mrb[62].mxu0  ;;  %v4782_v13 = vadd.f32 %v4474_v62, %v4171_v58 }
 0x1e0   : > { %v3414_v26 = vpop.eup %3413  ;;  %3433 = vrcp.f32 %v1359_v10  ;;  %v1360_v60 = vadd.f32 1.0, %v3412_v44  ;;  %5435 = vst [vmem:[#allocation55_spill] sm:$0xff] %v4768_v14  ;;  %v4770_v16 = vpop.f32.mrb[62].mxu1  ;;  %v4786_v10 = vadd.f32 %v4476_v55, %v4173_v59  ;;  %v2717_v55 = vmul.f32 -1.442695, %v4776_v54 }
 0x1e1   : > { %v3416_v30 = vpop.eup %3415  ;;  %3435 = vrcp.f32 %v1361_v61  ;;  %v1362_v45 = vadd.f32 1.0, %v3414_v26  ;;  %5436 = vst [vmem:[#allocation56_spill] sm:$0xff] %v4770_v16  ;;  %v4772_v53 = vpop.f32.mrb[63].mxu0 }
 0x1e2   : > { %5437 = vst [vmem:[#allocation57_spill] sm:$0xff] %v4772_v53  ;;  %v3418_v49 = vpop.eup %3417  ;;  %3437 = vrcp.f32 %v1360_v60  ;;  %v1363_v0 = vadd.f32 1.0, %v3416_v30  ;;  %v4778_v4 = vpop.f32.mrb[63].mxu1  ;;  %v4794_v30 = vadd.f32 %v4482_v39, %v4169_v57 }
 0x1e3   : > { %5438 = vst [vmem:[#allocation58_spill] sm:$0xff] %v4778_v4  ;;  %v3420_v17 = vpop.eup %3419  ;;  %3439 = vrcp.f32 %v1362_v45  ;;  %v1365_v29 = vadd.f32 1.0, %v3418_v49  ;;  %v4799_v49 = vadd.f32 %v4484_v42, %v4171_v58  ;;  %v2719_v4 = vmul.f32 -1.442695, %v4790_v6 }
 0x1e4   : > { %v3422_v44 = vpop.eup %3421  ;;  %3441 = vrcp.f32 %v1363_v0  ;;  %v1364_v61 = vadd.f32 1.0, %v3420_v17  ;;  %v2716_v17 = vmul.f32 -1.442695, %v4782_v13  ;;  %v2721_v16 = vmul.f32 -1.442695, %v4794_v30 }
 0x1e5   : > { %v3424_v26 = vpop.eup %3423  ;;  %3443 = vrcp.f32 %v1365_v29  ;;  %v1366_v60 = vadd.f32 1.0, %v3422_v44  ;;  %v2718_v29 = vmul.f32 -1.442695, %v4786_v10 }
 0x1e6   : > { %v3426_v62 = vpop.eup %3425  ;;  %3445 = vrcp.f32 %v1364_v61  ;;  %v1367_v45 = vadd.f32 1.0, %v3424_v26  ;;  %v5439_v61 = vld [vmem:[#allocation23_spill] sm:$0xff] }
 0x1e7   : > { %v3428_v0 = vpop.eup %3427  ;;  %3447 = vrcp.f32 %v1366_v60  ;;  %v1369_v19 = vadd.f32 1.0, %v3426_v62  ;;  %v4806_v26 = vadd.f32 %v5439_v61, %v4173_v59  ;;  %v5440_v60 = vld [vmem:[#allocation24_spill] sm:$0xff] }
 0x1e8   : > { %v3430_v44 = vpop.eup %3429  ;;  %3449 = vrcp.f32 %v1367_v45  ;;  %v1368_v39 = vadd.f32 1.0, %v3428_v0  ;;  %v4811_v62 = vadd.f32 %v5440_v60, %v4167_v56  ;;  %v2720_v45 = vmul.f32 -1.442695, %v4799_v49  ;;  %v5441_v0 = vld [vmem:[#allocation25_spill] sm:$0xff] }
 0x1e9   : > { %v3432_v53 = vpop.eup %3431  ;;  %3451 = vrcp.f32 %v1369_v19  ;;  %v1370_v42 = vadd.f32 1.0, %v3430_v44  ;;  %v4816_v22 = vadd.f32 %v5441_v0, %v4169_v57  ;;  %v1739_v19 = vmul.f32 %v4744_v9, %v4558_v2  ;;  %v5443_v0 = vld [vmem:[#allocation27_spill] sm:$0xff] }
 0x1ea   : > { %v3434_v14 = vpop.eup %3433  ;;  %3453 = vrcp.f32 %v1368_v39  ;;  %v1371_v35 = vadd.f32 1.0, %v3432_v53  ;;  %v4823_v60 = vadd.f32 %v5442_v24, %v4171_v58  ;;  %v1741_v53 = vmul.f32 %v4752_v28, %v4569_v7 }
 0x1eb   : > { %v3436_v61 = vpop.eup %3435  ;;  %v1743_v44 = vmul.f32 %v3434_v14, %v4635_v43  ;;  %3455 = vrcp.f32 %v1370_v42  ;;  %v4830_v46 = vadd.f32 %v5443_v0, %v4173_v59  ;;  %v1740_v2 = vmul.f32 %v4755_v18, %v4580_v48  ;;  %v5444_v42 = vld [vmem:[#allocation28_spill] sm:$0xff] }
 0x1ec   : > { %v3438_v23 = vpop.eup %3437  ;;  %v1745_v39 = vmul.f32 %v3436_v61, %v4641_v12  ;;  %3457 = vrcp.f32 %v1371_v35  ;;  %v1742_v14 = vmul.f32 %v4758_v27, %v4589_v11  ;;  %v2722_v35 = vmul.f32 -1.442695, %v4806_v26 }
 0x1ed   : > { %v3440_v40 = vpop.eup %3439  ;;  %v1744_v43 = vmul.f32 %v3438_v23, %v4645_v1  ;;  %3459 = vpow2.f32 %v2717_v55  ;;  %v1843_v9 = vpack.c.bf16 %v1743_v44, %v1739_v19  ;;  %v4841_v61 = vadd.f32 %v5444_v42, %v4167_v56  ;;  %v5445_v23 = vld [vmem:[#allocation29_spill] sm:$0xff] }
 0x1ee   : > { %v3442_v24 = vpop.eup %3441  ;;  %v1746_v7 = vmul.f32 %v3440_v40, %v4658_v47  ;;  %3461 = vpow2.f32 %v2716_v17  ;;  %v1845_v12 = vpack.c.bf16 %v1745_v39, %v1741_v53  ;;  %v2723_v18 = vmul.f32 -1.442695, %v4811_v62 }
 0x1ef   : > { %v3444_v28 = vpop.eup %3443  ;;  %3463 = vpow2.f32 %v2718_v29  ;;  %v1844_v48 = vpack.c.bf16 %v1744_v43, %v1740_v2  ;;  %v4846_v11 = vadd.f32 %v5445_v23, %v4169_v57  ;;  %v2725_v27 = vmul.f32 -1.442695, %v4816_v22 }
 0x1f0   : > { %v3446_v1 = vpop.eup %3445  ;;  %3465 = vpow2.f32 %v2719_v4  ;;  %v1846_v47 = vpack.c.bf16 %v1746_v7, %v1742_v14  ;;  %v2724_v17 = vmul.f32 -1.442695, %v4823_v60  ;;  %v2726_v29 = vmul.f32 -1.442695, %v4830_v46 }
 0x1f1   : > { %v3448_v40 = vpop.eup %3447  ;;  %3467 = vpow2.f32 %v2721_v16  ;;  %2226 = vmatprep.mubr.bf16.mxu0 %v1844_v48  ;;  %v1747_v19 = vmul.f32 %v3442_v24, %v4662_v41  ;;  %v2727_v53 = vmul.f32 -1.442695, %v4841_v61  ;;  %v1749_v39 = vmul.f32 %v3444_v28, %v4670_v34 }
 0x1f2   : > { %v3450_v55 = vpop.eup %3449  ;;  %3469 = vpow2.f32 %v2720_v45  ;;  %2387 = vmatprep.mubr.bf16.mxu1 %v1846_v47  ;;  %2227 = vmatmul.mubr.bf16.gmra.mrb[88].mxu0 %v1843_v9  ;;  %v2729_v0 = vmul.f32 -1.442695, %v4846_v11  ;;  %v1748_v43 = vmul.f32 %v3446_v1, %v4674_v51  ;;  %v1750_v24 = vmul.f32 %v3448_v40, %v4682_v21  ;;  %v5446_v1 = vld [vmem:[#allocation30_spill] sm:$0xff] }
 0x1f3   : > { %v3452_v4 = vpop.eup %3451  ;;  %v1751_v44 = vmul.f32 %v3450_v55, %v4686_v36  ;;  %3471 = vpow2.f32 %v2722_v35  ;;  %2388 = vmatmul.mubr.bf16.gmra.mrb[88].mxu1 %v1845_v12 }
 0x1f4   : > { %v3454_v16 = vpop.eup %3453  ;;  %v1753_v45 = vmul.f32 %v3452_v4, %v4695_v31  ;;  %3473 = vpow2.f32 %v2723_v18  ;;  %v4865_v18 = vadd.f32 %v5446_v1, %v4171_v58 }
 0x1f5   : > { %v3456_v2 = vpop.eup %3455  ;;  %v1752_v9 = vmul.f32 %v3454_v16, %v4707_v15  ;;  %3475 = vpow2.f32 %v2725_v27  ;;  %v1847_v41 = vpack.c.bf16 %v1751_v44, %v1747_v19  ;;  %v5447_v16 = vld [vmem:[#allocation31_spill] sm:$0xff] }
 0x1f6   : > { %v4859_v36 = vpop.eup %3457  ;;  %v1754_v14 = vmul.f32 %v3456_v2, %v4716_v63  ;;  %3477 = vpow2.f32 %v2724_v17  ;;  %v1849_v34 = vpack.c.bf16 %v1753_v45, %v1749_v39  ;;  %v2728_v19 = vmul.f32 -1.442695, %v4865_v18  ;;  %v5448_v45 = vld [vmem:[#allocation32_spill] sm:$0xff] }
 0x1f7   : > { %v3460_v7 = vpop.eup %3459  ;;  %3479 = vpow2.f32 %v2726_v29  ;;  %v1848_v31 = vpack.c.bf16 %v1752_v9, %v1748_v43  ;;  %v4870_v39 = vadd.f32 %v5447_v16, %v4173_v59  ;;  %v5449_v9 = vld [vmem:[#allocation33_spill] sm:$0xff] }
 0x1f8   : > { %v3462_v12 = vpop.eup %3461  ;;  %v1373_v28 = vadd.f32 1.0, %v3460_v7  ;;  %3481 = vpow2.f32 %v2727_v53  ;;  %v1850_v35 = vpack.c.bf16 %v1754_v14, %v1750_v24  ;;  %v5450_v24 = vld [vmem:[#allocation34_spill] sm:$0xff] }
 0x1f9   : > { %v3464_v51 = vpop.eup %3463  ;;  %v1372_v42 = vadd.f32 1.0, %v3462_v12  ;;  %3483 = vpow2.f32 %v2729_v0  ;;  %2234 = vmatprep.mubr.bf16.mxu0 %v1848_v31  ;;  %v4874_v0 = vadd.f32 %v5448_v45, %v4167_v56  ;;  %v4882_v14 = vadd.f32 %v5450_v24, %v4171_v58  ;;  %v5451_v31 = vld [vmem:[#allocation35_spill] sm:$0xff] }
 0x1fa   : > { %v3466_v15 = vpop.eup %3465  ;;  %3485 = vrcp.f32 %v1373_v28  ;;  %v1374_v48 = vadd.f32 1.0, %v3464_v51  ;;  %2395 = vmatprep.mubr.bf16.mxu1 %v1850_v35  ;;  %2235 = vmatmul.mubr.bf16.gmra.mrb[92].mxu0 %v1847_v41  ;;  %v4878_v41 = vadd.f32 %v5449_v9, %v4169_v57  ;;  %v4886_v12 = vadd.f32 %v5451_v31, %v4173_v59  ;;  %v5452_v28 = vld [vmem:[#allocation36_spill] sm:$0xff] }
 0x1fb   : > { %v3468_v21 = vpop.eup %3467  ;;  %3487 = vrcp.f32 %v1372_v42  ;;  %v1375_v63 = vadd.f32 1.0, %v3466_v15  ;;  %2396 = vmatmul.mubr.bf16.gmra.mrb[92].mxu1 %v1849_v34  ;;  %v4890_v35 = vadd.f32 %v5452_v28, %v4167_v56  ;;  %v5453_v15 = vld [vmem:[#allocation37_spill] sm:$0xff]  ;;  %v4914_v9 = vadd.f32 %v4592_v37, %v4167_v56 }
 0x1fc   : > { %v3470_v23 = vpop.eup %3469  ;;  %3489 = vrcp.f32 %v1374_v48  ;;  %v1377_v47 = vadd.f32 1.0, %v3468_v21  ;;  %v4894_v48 = vadd.f32 %v5453_v15, %v4169_v57  ;;  %v5454_v21 = vld [vmem:[#allocation12_spill] sm:$0xff]  ;;  %v4921_v31 = vadd.f32 %v4594_v8, %v4169_v57 }
 0x1fd   : > { %v3472_v40 = vpop.eup %3471  ;;  %3491 = vrcp.f32 %v1375_v63  ;;  %v1376_v27 = vadd.f32 1.0, %v3470_v23  ;;  %v4898_v63 = vadd.f32 %v5454_v21, %v4171_v58  ;;  %v4927_v37 = vadd.f32 %v4599_v5, %v4171_v58 }
 0x1fe   : > { %v3474_v55 = vpop.eup %3473  ;;  %3493 = vrcp.f32 %v1377_v47  ;;  %v1378_v17 = vadd.f32 1.0, %v3472_v40  ;;  %v2730_v47 = vmul.f32 -1.442695, %v4870_v39 }
 0x1ff   : > { %v3476_v29 = vpop.eup %3475  ;;  %3495 = vrcp.f32 %v1376_v27  ;;  %v1379_v4 = vadd.f32 1.0, %v3474_v55  ;;  %v2731_v27 = vmul.f32 -1.442695, %v4874_v0  ;;  %v2733_v55 = vmul.f32 -1.442695, %v4878_v41 }
 0x200   : > { %v3478_v44 = vpop.eup %3477  ;;  %3497 = vrcp.f32 %v1378_v17  ;;  %v1381_v53 = vadd.f32 1.0, %v3476_v29  ;;  %v2732_v17 = vmul.f32 -1.442695, %v4882_v14 }
 0x201   : > { %v3480_v2 = vpop.eup %3479  ;;  %3499 = vrcp.f32 %v1379_v4  ;;  %v1380_v43 = vadd.f32 1.0, %v3478_v44  ;;  %v2734_v4 = vmul.f32 -1.442695, %v4886_v12  ;;  %v2735_v44 = vmul.f32 -1.442695, %v4890_v35 }
 0x202   : > { %v3482_v34 = vpop.eup %3481  ;;  %3501 = vrcp.f32 %v1381_v53  ;;  %v1382_v7 = vadd.f32 1.0, %v3480_v2  ;;  %v5455_v53 = vld [vmem:[#allocation38_spill] sm:$0xff]  ;;  %v2737_v2 = vmul.f32 -1.442695, %v4894_v48 }
 0x203   : > { %v3484_v51 = vpop.eup %3483  ;;  %3503 = vrcp.f32 %v1380_v43  ;;  %v1383_v42 = vadd.f32 1.0, %v3482_v34  ;;  %v4908_v16 = vadd.f32 %v5455_v53, %v4173_v59  ;;  %v2736_v43 = vmul.f32 -1.442695, %v4898_v63 }
 0x204   : > { %v3486_v1 = vpop.eup %3485  ;;  %3505 = vrcp.f32 %v1382_v7  ;;  %v1385_v23 = vadd.f32 1.0, %v3484_v51  ;;  %v1755_v34 = vmul.f32 %v4859_v36, %v4722_v38 }
 0x205   : > { %v3488_v40 = vpop.eup %3487  ;;  %3507 = vrcp.f32 %v1383_v42  ;;  %v1757_v28 = vmul.f32 %v3486_v1, %v4776_v54  ;;  %v2738_v1 = vmul.f32 -1.442695, %v4908_v16 }
 0x206   : > { %v3490_v29 = vpop.eup %3489  ;;  %3509 = vrcp.f32 %v1385_v23  ;;  %v1756_v38 = vmul.f32 %v3488_v40, %v4782_v13  ;;  %v2739_v13 = vmul.f32 -1.442695, %v4914_v9  ;;  %v2740_v40 = vmul.f32 -1.442695, %v4927_v37 }
 0x207   : > { %v3492_v45 = vpop.eup %3491  ;;  %3511 = vpow2.f32 %v2728_v19  ;;  %v1758_v8 = vmul.f32 %v3490_v29, %v4786_v10  ;;  %v2741_v10 = vmul.f32 -1.442695, %v4921_v31 }
 0x208   : > { %v3494_v24 = vpop.eup %3493  ;;  %v1759_v7 = vmul.f32 %v3492_v45, %v4790_v6  ;;  %3513 = vpow2.f32 %v2730_v47 }
 0x209   : > { %v3496_v19 = vpop.eup %3495  ;;  %v1761_v51 = vmul.f32 %v3494_v24, %v4794_v30  ;;  %3515 = vpow2.f32 %v2731_v27 }
 0x20a   : > { %v3498_v42 = vpop.eup %3497  ;;  %v1760_v6 = vmul.f32 %v3496_v19, %v4799_v49  ;;  %3517 = vpow2.f32 %v2733_v55  ;;  %v1851_v36 = vpack.c.bf16 %v1759_v7, %v1755_v34 }
 0x20b   : > { %v3500_v15 = vpop.eup %3499  ;;  %v1762_v21 = vmul.f32 %v3498_v42, %v4806_v26  ;;  %3519 = vpow2.f32 %v2732_v17  ;;  %v1853_v54 = vpack.c.bf16 %v1761_v51, %v1757_v28  ;;  %v4959_v42 = vadd.f32 %v4601_v52, %v4173_v59 }
 0x20c   : > { %v3502_v30 = vpop.eup %3501  ;;  %3521 = vpow2.f32 %v2734_v4  ;;  %v1852_v5 = vpack.c.bf16 %v1760_v6, %v1756_v38  ;;  %v4942_v55 = vmul.f32 %v3500_v15, %v4811_v62  ;;  %v4963_v38 = vadd.f32 %v4604_v32, %v4167_v56 }
 0x20d   : > { %v4934_v23 = vpop.eup %3503  ;;  %3523 = vpow2.f32 %v2735_v44  ;;  %v1854_v49 = vpack.c.bf16 %v1762_v21, %v1758_v8  ;;  %v4948_v4 = vmul.f32 %v3502_v30, %v4816_v22  ;;  %v4967_v21 = vadd.f32 %v4606_v20, %v4169_v57  ;;  %v5457_v20 = vld [vmem:[#allocation14_spill] sm:$0xff] }
 0x20e   : > { %v4937_v47 = vpop.eup %3505  ;;  %3525 = vpow2.f32 %v2737_v2  ;;  %2242 = vmatprep.mubr.bf16.mxu0 %v1852_v5 }
 0x20f   : > { %v3508_v26 = vpop.eup %3507  ;;  %3527 = vpow2.f32 %v2736_v43  ;;  %2403 = vmatprep.mubr.bf16.mxu1 %v1854_v49  ;;  %2243 = vmatmul.mubr.bf16.gmra.mrb[96].mxu0 %v1851_v36  ;;  %v2743_v49 = vmul.f32 -1.442695, %v4963_v38 }
 0x210   : > { %v3510_v27 = vpop.eup %3509  ;;  %v4945_v17 = vmul.f32 %v3508_v26, %v4841_v61  ;;  %3529 = vpow2.f32 %v2738_v1  ;;  %2404 = vmatmul.mubr.bf16.gmra.mrb[96].mxu1 %v1853_v54  ;;  %v5456_v54 = vld [vmem:[#allocation13_spill] sm:$0xff] }
 0x211   : > { %v3512_v29 = vpop.eup %3511  ;;  %v4951_v44 = vmul.f32 %v3510_v27, %v4846_v11  ;;  %3531 = vpow2.f32 %v2739_v13  ;;  %v4971_v30 = vadd.f32 %v5456_v54, %v4171_v58  ;;  %v2742_v13 = vmul.f32 -1.442695, %v4959_v42  ;;  %v5458_v27 = vld [vmem:[#allocation39_spill] sm:$0xff] }
 0x212   : > { %v3514_v53 = vpop.eup %3513  ;;  %v1384_v45 = vadd.f32 1.0, %v3512_v29  ;;  %3533 = vpow2.f32 %v2741_v10  ;;  %v1855_v62 = vpack.c.bf16 %v4945_v17, %v4942_v55  ;;  %v4981_v29 = vadd.f32 %v5458_v27, %v4167_v56 }
 0x213   : > { %v3516_v2 = vpop.eup %3515  ;;  %v1386_v43 = vadd.f32 1.0, %v3514_v53  ;;  %3535 = vpow2.f32 %v2740_v40  ;;  %v1857_v61 = vpack.c.bf16 %v4951_v44, %v4948_v4  ;;  %v4977_v40 = vadd.f32 %v5457_v20, %v4173_v59 }
 0x214   : > { %v3518_v24 = vpop.eup %3517  ;;  %3537 = vrcp.f32 %v1384_v45  ;;  %v1387_v22 = vadd.f32 1.0, %v3516_v2  ;;  %v2745_v2 = vmul.f32 -1.442695, %v4967_v21  ;;  %v1766_v54 = vmul.f32 %v4937_v47, %v4830_v46 }
 0x215   : > { %v3520_v34 = vpop.eup %3519  ;;  %3539 = vrcp.f32 %v1386_v43  ;;  %v1389_v11 = vadd.f32 1.0, %v3518_v24  ;;  %v2744_v43 = vmul.f32 -1.442695, %v4971_v30  ;;  %v2747_v46 = vmul.f32 -1.442695, %v4981_v29 }
 0x216   : > { %v3522_v7 = vpop.eup %3521  ;;  %3541 = vrcp.f32 %v1387_v22  ;;  %v1388_v19 = vadd.f32 1.0, %v3520_v34  ;;  %v5459_v34 = vld [vmem:[#allocation40_spill] sm:$0xff] }
 0x217   : > { %v3524_v28 = vpop.eup %3523  ;;  %3543 = vrcp.f32 %v1389_v11  ;;  %v1390_v51 = vadd.f32 1.0, %v3522_v7  ;;  %v4987_v11 = vadd.f32 %v5459_v34, %v4169_v57  ;;  %v5460_v7 = vld [vmem:[#allocation41_spill] sm:$0xff] }
 0x218   : > { %v3526_v6 = vpop.eup %3525  ;;  %3545 = vrcp.f32 %v1388_v19  ;;  %v1391_v36 = vadd.f32 1.0, %v3524_v28  ;;  %v4991_v19 = vadd.f32 %v5460_v7, %v4171_v58 }
 0x219   : > { %v3528_v15 = vpop.eup %3527  ;;  %3547 = vrcp.f32 %v1390_v51  ;;  %v1393_v8 = vadd.f32 1.0, %v3526_v6  ;;  %v1764_v51 = vmul.f32 %v4934_v23, %v4823_v60  ;;  %v2746_v60 = vmul.f32 -1.442695, %v4977_v40 }
 0x21a   : > { %v3530_v52 = vpop.eup %3529  ;;  %3549 = vrcp.f32 %v1391_v36  ;;  %v1392_v1 = vadd.f32 1.0, %v3528_v15  ;;  %v5461_v36 = vld [vmem:[#allocation42_spill] sm:$0xff] }
 0x21b   : > { %v3532_v5 = vpop.eup %3531  ;;  %3551 = vrcp.f32 %v1393_v8  ;;  %v1394_v32 = vadd.f32 1.0, %v3530_v52  ;;  %v4998_v15 = vadd.f32 %v5461_v36, %v4173_v59 }
 0x21c   : > { %v3534_v10 = vpop.eup %3533  ;;  %3553 = vrcp.f32 %v1392_v1  ;;  %v1395_v26 = vadd.f32 1.0, %v3532_v5  ;;  %v5462_v1 = vld [vmem:[#allocation15_spill] sm:$0xff] }
 0x21d   : > { %v3536_v53 = vpop.eup %3535  ;;  %3555 = vrcp.f32 %v1394_v32  ;;  %v1397_v45 = vadd.f32 1.0, %v3534_v10  ;;  %v5005_v5 = vadd.f32 %v5462_v1, %v4167_v56 }
 0x21e   : > { %v3538_v24 = vpop.eup %3537  ;;  %3557 = vrcp.f32 %v1395_v26  ;;  %v1396_v22 = vadd.f32 1.0, %v3536_v53  ;;  %v2748_v53 = vmul.f32 -1.442695, %v4991_v19 }
 0x21f   : > { %v3540_v28 = vpop.eup %3539  ;;  %v1768_v6 = vmul.f32 %v3538_v24, %v4865_v18  ;;  %3559 = vrcp.f32 %v1397_v45  ;;  %v5463_v18 = vld [vmem:[#allocation16_spill] sm:$0xff]  ;;  %v2750_v24 = vmul.f32 -1.442695, %v4998_v15 }
 0x220   : > { %v3542_v8 = vpop.eup %3541  ;;  %v1770_v52 = vmul.f32 %v3540_v28, %v4870_v39  ;;  %3561 = vrcp.f32 %v1396_v22  ;;  %v5010_v23 = vadd.f32 %v5463_v18, %v4169_v57  ;;  %v5464_v39 = vld [vmem:[#allocation17_spill] sm:$0xff]  ;;  %v5465_v22 = vld [vmem:[#allocation43_spill] sm:$0xff] }
 0x221   : > { %v3544_v32 = vpop.eup %3543  ;;  %3563 = vpow2.f32 %v2742_v13  ;;  %v1856_v10 = vpack.c.bf16 %v1768_v6, %v1764_v51  ;;  %v5015_v47 = vadd.f32 %v5464_v39, %v4171_v58  ;;  %v2749_v13 = vmul.f32 -1.442695, %v4987_v11 }
 0x222   : > { %v3546_v26 = vpop.eup %3545  ;;  %3565 = vpow2.f32 %v2743_v49  ;;  %v1858_v20 = vpack.c.bf16 %v1770_v52, %v1766_v54  ;;  %v2751_v49 = vmul.f32 -1.442695, %v5005_v5  ;;  %v5023_v34 = vadd.f32 %v5465_v22, %v4173_v59 }
 0x223   : > { %v3548_v27 = vpop.eup %3547  ;;  %3567 = vpow2.f32 %v2745_v2  ;;  %2250 = vmatprep.mubr.bf16.mxu0 %v1856_v10  ;;  %v1771_v7 = vmul.f32 %v3542_v8, %v4874_v0  ;;  %v1773_v6 = vmul.f32 %v3544_v32, %v4878_v41  ;;  %v2752_v55 = vmul.f32 -1.442695, %v5015_v47 }
 0x224   : > { %v3550_v45 = vpop.eup %3549  ;;  %3569 = vpow2.f32 %v2744_v43  ;;  %2411 = vmatprep.mubr.bf16.mxu1 %v1858_v20  ;;  %2251 = vmatmul.mubr.bf16.gmra.mrb[100].mxu0 %v1855_v62  ;;  %v2753_v43 = vmul.f32 -1.442695, %v5010_v23  ;;  %v1772_v0 = vmul.f32 %v3546_v26, %v4882_v14  ;;  %v1774_v4 = vmul.f32 %v3548_v27, %v4886_v12 }
 0x225   : > { %v3552_v2 = vpop.eup %3551  ;;  %v1775_v28 = vmul.f32 %v3550_v45, %v4890_v35  ;;  %3571 = vpow2.f32 %v2746_v60  ;;  %2412 = vmatmul.mubr.bf16.gmra.mrb[100].mxu1 %v1857_v61  ;;  %v5466_v45 = vld [vmem:[#allocation18_spill] sm:$0xff] }
 0x226   : > { %v3554_v51 = vpop.eup %3553  ;;  %v1777_v36 = vmul.f32 %v3552_v2, %v4894_v48  ;;  %3573 = vpow2.f32 %v2747_v46  ;;  %v2754_v48 = vmul.f32 -1.442695, %v5023_v34  ;;  %v5467_v2 = vld [vmem:[#allocation44_spill] sm:$0xff] }
 0x227   : > { %v3556_v17 = vpop.eup %3555  ;;  %v1776_v35 = vmul.f32 %v3554_v51, %v4898_v63  ;;  %3575 = vpow2.f32 %v2749_v13  ;;  %v1859_v62 = vpack.c.bf16 %v1775_v28, %v1771_v7  ;;  %v5054_v7 = vadd.f32 %v5467_v2, %v4169_v57  ;;  %v5468_v28 = vld [vmem:[#allocation45_spill] sm:$0xff] }
 0x228   : > { %v5039_v8 = vpop.eup %3557  ;;  %v1778_v44 = vmul.f32 %v3556_v17, %v4908_v16  ;;  %3577 = vpow2.f32 %v2748_v53  ;;  %v1861_v41 = vpack.c.bf16 %v1777_v36, %v1773_v6  ;;  %v5469_v36 = vld [vmem:[#allocation46_spill] sm:$0xff]  ;;  %v5470_v17 = vld [vmem:[#allocation47_spill] sm:$0xff] }
 0x229   : > { %v5043_v61 = vpop.eup %3559  ;;  %3579 = vpow2.f32 %v2750_v24  ;;  %v1860_v54 = vpack.c.bf16 %v1776_v35, %v1772_v0  ;;  %v5050_v24 = vadd.f32 %v5466_v45, %v4167_v56  ;;  %v5066_v0 = vadd.f32 %v5470_v17, %v4167_v56 }
 0x22a   : > { %v5046_v52 = vpop.eup %3561  ;;  %3581 = vpow2.f32 %v2751_v49  ;;  %v1862_v14 = vpack.c.bf16 %v1778_v44, %v1774_v4  ;;  %v5471_v4 = vld [vmem:[#allocation19_spill] sm:$0xff]  ;;  %v1779_v45 = vmul.f32 %v5039_v8, %v4914_v9 }
 0x22b   : > { %v3564_v63 = vpop.eup %3563  ;;  %3583 = vpow2.f32 %v2753_v43  ;;  %2258 = vmatprep.mubr.bf16.mxu0 %v1860_v54  ;;  %v5058_v43 = vadd.f32 %v5468_v28, %v4171_v58  ;;  %v5070_v44 = vadd.f32 %v5471_v4, %v4169_v57  ;;  %v1781_v28 = vmul.f32 %v5043_v61, %v4921_v31 }
 0x22c   : > { %v3566_v1 = vpop.eup %3565  ;;  %v1398_v32 = vadd.f32 1.0, %v3564_v63  ;;  %3585 = vpow2.f32 %v2752_v55  ;;  %2419 = vmatprep.mubr.bf16.mxu1 %v1862_v14  ;;  %2259 = vmatmul.mubr.bf16.gmra.mrb[104].mxu0 %v1859_v62  ;;  %v5062_v55 = vadd.f32 %v5469_v36, %v4173_v59  ;;  %v2755_v63 = vmul.f32 -1.442695, %v5050_v24 }
 0x22d   : > { %v3568_v12 = vpop.eup %3567  ;;  %v1399_v16 = vadd.f32 1.0, %v3566_v1  ;;  %3587 = vpow2.f32 %v2754_v48  ;;  %2420 = vmatmul.mubr.bf16.gmra.mrb[104].mxu1 %v1861_v41  ;;  %v5472_v41 = vld [vmem:[#allocation20_spill] sm:$0xff]  ;;  %v1780_v9 = vmul.f32 %v5046_v52, %v4927_v37  ;;  %v5109_v4 = vadd.f32 %v4734_v33, %v4171_v58 }
 0x22e   : > { %v3570_v60 = vpop.eup %3569  ;;  %3589 = vrcp.f32 %v1398_v32  ;;  %v1401_v18 = vadd.f32 1.0, %v3568_v12  ;;  %v5074_v48 = vadd.f32 %v5472_v41, %v4171_v58  ;;  %v2757_v12 = vmul.f32 -1.442695, %v5054_v7 }
 0x22f   : > { %v3572_v10 = vpop.eup %3571  ;;  %3591 = vrcp.f32 %v1399_v16  ;;  %v1400_v26 = vadd.f32 1.0, %v3570_v60  ;;  %v2756_v16 = vmul.f32 -1.442695, %v5058_v43 }
 0x230   : > { %v3574_v46 = vpop.eup %3573  ;;  %3593 = vrcp.f32 %v1401_v18  ;;  %v1402_v39 = vadd.f32 1.0, %v3572_v10  ;;  %v2758_v10 = vmul.f32 -1.442695, %v5062_v55 }
 0x231   : > { %v3576_v20 = vpop.eup %3575  ;;  %3595 = vrcp.f32 %v1400_v26  ;;  %v1403_v27 = vadd.f32 1.0, %v3574_v46  ;;  %v2759_v26 = vmul.f32 -1.442695, %v5066_v0 }
 0x232   : > { %v3578_v13 = vpop.eup %3577  ;;  %3597 = vrcp.f32 %v1402_v39  ;;  %v1405_v53 = vadd.f32 1.0, %v3576_v20  ;;  %v2761_v39 = vmul.f32 -1.442695, %v5070_v44  ;;  %v2760_v20 = vmul.f32 -1.442695, %v5074_v48 }
 0x233   : > { %v3580_v49 = vpop.eup %3579  ;;  %3599 = vrcp.f32 %v1403_v27  ;;  %v1404_v22 = vadd.f32 1.0, %v3578_v13  ;;  %v5473_v27 = vld [vmem:[#allocation48_spill] sm:$0xff] }
 0x234   : > { %v3582_v51 = vpop.eup %3581  ;;  %3601 = vrcp.f32 %v1405_v53  ;;  %v1406_v6 = vadd.f32 1.0, %v3580_v49  ;;  %v5085_v13 = vadd.f32 %v5473_v27, %v4173_v59 }
 0x235   : > { %v3584_v35 = vpop.eup %3583  ;;  %3603 = vrcp.f32 %v1404_v22  ;;  %v1407_v62 = vadd.f32 1.0, %v3582_v51  ;;  %v5092_v22 = vadd.f32 %v4727_v3, %v4167_v56 }
 0x236   : > { %v3586_v54 = vpop.eup %3585  ;;  %3605 = vrcp.f32 %v1406_v6  ;;  %v1409_v14 = vadd.f32 1.0, %v3584_v35  ;;  %v5474_v6 = vld [vmem:[#allocation21_spill] sm:$0xff] }
 0x237   : > { %v3588_v1 = vpop.eup %3587  ;;  %3607 = vrcp.f32 %v1407_v62  ;;  %v1408_v32 = vadd.f32 1.0, %v3586_v54  ;;  %v5099_v36 = vadd.f32 %v5474_v6, %v4169_v57  ;;  %v2762_v62 = vmul.f32 -1.442695, %v5085_v13 }
 0x238   : > { %v3590_v60 = vpop.eup %3589  ;;  %3609 = vrcp.f32 %v1409_v14  ;;  %v1410_v18 = vadd.f32 1.0, %v3588_v1 }
 0x239   : > { %v3592_v46 = vpop.eup %3591  ;;  %3611 = vrcp.f32 %v1408_v32  ;;  %v1782_v35 = vmul.f32 %v3590_v60, %v4959_v42  ;;  %v5114_v42 = vadd.f32 %v4740_v50, %v4167_v56  ;;  %v2765_v54 = vmul.f32 -1.442695, %v5099_v36 }
 0x23a   : > { %v3594_v53 = vpop.eup %3593  ;;  %v1783_v49 = vmul.f32 %v3592_v46, %v4963_v38  ;;  %3613 = vrcp.f32 %v1410_v18  ;;  %v2764_v32 = vmul.f32 -1.442695, %v5109_v4 }
 0x23b   : > { %v3596_v2 = vpop.eup %3595  ;;  %v1785_v51 = vmul.f32 %v3594_v53, %v4967_v21  ;;  %3615 = vpow2.f32 %v2755_v63  ;;  %v2767_v60 = vmul.f32 -1.442695, %v5114_v42 }
 0x23c   : > { %v3598_v17 = vpop.eup %3597  ;;  %v1784_v38 = vmul.f32 %v3596_v2, %v4971_v30  ;;  %3617 = vpow2.f32 %v2757_v12  ;;  %v1863_v3 = vpack.c.bf16 %v1783_v49, %v1779_v45  ;;  %v2763_v30 = vmul.f32 -1.442695, %v5092_v22 }
 0x23d   : > { %v3600_v8 = vpop.eup %3599  ;;  %v1786_v31 = vmul.f32 %v3598_v17, %v4977_v40  ;;  %3619 = vpow2.f32 %v2756_v16  ;;  %v1865_v21 = vpack.c.bf16 %v1785_v51, %v1781_v28 }
 0x23e   : > { %v3602_v61 = vpop.eup %3601  ;;  %3621 = vpow2.f32 %v2758_v10  ;;  %v1864_v37 = vpack.c.bf16 %v1784_v38, %v1780_v9  ;;  %v1787_v63 = vmul.f32 %v3600_v8, %v4981_v29 }
 0x23f   : > { %v3604_v52 = vpop.eup %3603  ;;  %3623 = vpow2.f32 %v2759_v26  ;;  %v1866_v40 = vpack.c.bf16 %v1786_v31, %v1782_v35  ;;  %v1789_v12 = vmul.f32 %v3602_v61, %v4987_v11  ;;  %v5134_v35 = vadd.f32 %v4742_v25, %v4169_v57  ;;  %v5476_v61 = vld [vmem:[#allocation49_spill] sm:$0xff] }
 0x240   : > { %v3606_v41 = vpop.eup %3605  ;;  %3625 = vpow2.f32 %v2761_v39  ;;  %2266 = vmatprep.mubr.bf16.mxu0 %v1864_v37  ;;  %v1788_v10 = vmul.f32 %v3604_v52, %v4991_v19 }
 0x241   : > { %v3608_v14 = vpop.eup %3607  ;;  %3627 = vpow2.f32 %v2760_v20  ;;  %2427 = vmatprep.mubr.bf16.mxu1 %v1866_v40  ;;  %2267 = vmatmul.mubr.bf16.gmra.mrb[108].mxu0 %v1863_v3  ;;  %v1790_v46 = vmul.f32 %v3606_v41, %v4998_v15  ;;  %v5477_v40 = vld [vmem:[#allocation50_spill] sm:$0xff]  ;;  %v2769_v25 = vmul.f32 -1.442695, %v5134_v35 }
 0x242   : > { %v3610_v33 = vpop.eup %3609  ;;  %v1791_v1 = vmul.f32 %v3608_v14, %v5005_v5  ;;  %3629 = vpow2.f32 %v2762_v62  ;;  %2428 = vmatmul.mubr.bf16.gmra.mrb[108].mxu1 %v1865_v21  ;;  %v5138_v62 = vadd.f32 %v5476_v61, %v4171_v58  ;;  %v5142_v41 = vadd.f32 %v5477_v40, %v4173_v59  ;;  %v5478_v14 = vld [vmem:[#allocation51_spill] sm:$0xff] }
 0x243   : > { %v3612_v50 = vpop.eup %3611  ;;  %v1793_v16 = vmul.f32 %v3610_v33, %v5010_v23  ;;  %3631 = vpow2.f32 %v2763_v30  ;;  %v5147_v33 = vadd.f32 %v5478_v14, %v4167_v56 }
 0x244   : > { %v3614_v18 = vpop.eup %3613  ;;  %v1792_v26 = vmul.f32 %v3612_v50, %v5015_v47  ;;  %3633 = vpow2.f32 %v2765_v54  ;;  %v1867_v29 = vpack.c.bf16 %v1791_v1, %v1787_v63  ;;  %v5475_v47 = vld [vmem:[#allocation22_spill] sm:$0xff]  ;;  %v2768_v1 = vmul.f32 -1.442695, %v5138_v62 }
 0x245   : > { %v3616_v5 = vpop.eup %3615  ;;  %v1794_v39 = vmul.f32 %v3614_v18, %v5023_v34  ;;  %v1869_v20 = vpack.c.bf16 %v1793_v16, %v1789_v12  ;;  %3635 = vpow2.f32 %v2764_v32  ;;  %v5129_v28 = vadd.f32 %v5475_v47, %v4173_v59  ;;  %v5479_v32 = vld [vmem:[#allocation52_spill] sm:$0xff]  ;;  %v5480_v12 = vld [vmem:[#allocation53_spill] sm:$0xff] }
 0x246   : > { %v3618_v27 = vpop.eup %3617  ;;  %v1411_v11 = vadd.f32 1.0, %v3616_v5  ;;  %v1868_v23 = vpack.c.bf16 %v1792_v26, %v1788_v10  ;;  %3637 = vpow2.f32 %v2767_v60  ;;  %v5152_v50 = vadd.f32 %v5479_v32, %v4169_v57  ;;  %v5481_v60 = vld [vmem:[#allocation54_spill] sm:$0xff] }
 0x247   : > { %v3620_v53 = vpop.eup %3619  ;;  %v1413_v45 = vadd.f32 1.0, %v3618_v27  ;;  %v1870_v49 = vpack.c.bf16 %v1794_v39, %v1790_v46  ;;  %v2766_v8 = vmul.f32 -1.442695, %v5129_v28  ;;  %v5156_v16 = vadd.f32 %v5480_v12, %v4171_v58  ;;  %v5483_v46 = vld [vmem:[#allocation56_spill] sm:$0xff] }
 0x248   : > { %v3622_v2 = vpop.eup %3621  ;;  %3639 = vrcp.f32 %v1411_v11  ;;  %v1412_v19 = vadd.f32 1.0, %v3620_v53  ;;  %2274 = vmatprep.mubr.bf16.mxu0 %v1868_v23  ;;  %v5160_v18 = vadd.f32 %v5481_v60, %v4173_v59  ;;  %v5168_v39 = vadd.f32 %v5483_v46, %v4169_v57  ;;  %v5484_v53 = vld [vmem:[#allocation57_spill] sm:$0xff] }
 0x249   : > { %v3624_v15 = vpop.eup %3623  ;;  %3641 = vrcp.f32 %v1413_v45  ;;  %v1414_v34 = vadd.f32 1.0, %v3622_v2  ;;  %2435 = vmatprep.mubr.bf16.mxu1 %v1870_v49  ;;  %2275 = vmatmul.mubr.bf16.gmra.mrb[112].mxu0 %v1867_v29  ;;  %v5482_v29 = vld [vmem:[#allocation55_spill] sm:$0xff]  ;;  %v2770_v27 = vmul.f32 -1.442695, %v5142_v41  ;;  %v2771_v23 = vmul.f32 -1.442695, %v5147_v33 }
 0x24a   : > { %v3626_v51 = vpop.eup %3625  ;;  %3643 = vrcp.f32 %v1412_v19  ;;  %v1415_v6 = vadd.f32 1.0, %v3624_v15  ;;  %2436 = vmatmul.mubr.bf16.gmra.mrb[112].mxu1 %v1869_v20  ;;  %v5164_v5 = vadd.f32 %v5482_v29, %v4167_v56  ;;  %v5174_v45 = vadd.f32 %v5484_v53, %v4171_v58 }
 0x24b   : > { %v3628_v17 = vpop.eup %3627  ;;  %3645 = vrcp.f32 %v1414_v34  ;;  %v1417_v9 = vadd.f32 1.0, %v3626_v51  ;;  %v2773_v56 = vmul.f32 -1.442695, %v5152_v50  ;;  %v2772_v2 = vmul.f32 -1.442695, %v5156_v16 }
 0x24c   : > { %v3630_v38 = vpop.eup %3629  ;;  %3647 = vrcp.f32 %v1415_v6  ;;  %v1416_v3 = vadd.f32 1.0, %v3628_v17  ;;  %v2774_v19 = vmul.f32 -1.442695, %v5160_v18  ;;  %v2775_v47 = vmul.f32 -1.442695, %v5164_v5  ;;  %v5485_v6 = vld [vmem:[#allocation58_spill] sm:$0xff] }
 0x24d   : > { %v3632_v31 = vpop.eup %3631  ;;  %3649 = vrcp.f32 %v1417_v9  ;;  %v1418_v21 = vadd.f32 1.0, %v3630_v38  ;;  %v2777_v15 = vmul.f32 -1.442695, %v5168_v39  ;;  %v5185_v17 = vadd.f32 %v5485_v6, %v4173_v59 }
 0x24e   : > { %v3634_v37 = vpop.eup %3633  ;;  %3651 = vrcp.f32 %v1416_v3  ;;  %v1419_v52 = vadd.f32 1.0, %v3632_v31 }
 0x24f   : > { %3653 = vrcp.f32 %v1418_v21  ;;  %v1421_v30 = vadd.f32 1.0, %v3634_v37  ;;  %v3636_v54 = vpop.eup %3635 }
 0x250   : > { %3655 = vpow2.f32 %v2766_v8  ;;  %v3638_v63 = vpop.eup %3637  ;;  %v2776_v8 = vmul.f32 -1.442695, %v5174_v45  ;;  %v1420_v40 = vadd.f32 1.0, %v3636_v54 }
 0x251   : > { %3657 = vrcp.f32 %v1419_v52  ;;  %v1423_v26 = vadd.f32 1.0, %v3638_v63 }
 0x252   : > { %v3640_v10 = vpop.eup %3639  ;;  %3659 = vrcp.f32 %v1421_v30 }
 0x253   : > { %v3642_v20 = vpop.eup %3641  ;;  %3661 = vrcp.f32 %v1423_v26  ;;  %v1795_v51 = vmul.f32 %v3640_v10, %v5050_v24 }
 0x254   : > { %v3644_v11 = vpop.eup %3643  ;;  %3663 = vpow2.f32 %v2769_v25  ;;  %v1797_v38 = vmul.f32 %v3642_v20, %v5054_v7  ;;  %v2778_v7 = vmul.f32 -1.442695, %v5185_v17 }
 0x255   : > { %v3646_v49 = vpop.eup %3645  ;;  %3665 = vpow2.f32 %v2768_v1  ;;  %v1796_v21 = vmul.f32 %v3644_v11, %v5058_v43 }
 0x256   : > { %v3648_v57 = vpop.eup %3647  ;;  %3667 = vpow2.f32 %v2770_v27  ;;  %v1798_v37 = vmul.f32 %v3646_v49, %v5062_v55 }
 0x257   : > { %v3650_v34 = vpop.eup %3649  ;;  %v1799_v58 = vmul.f32 %v3648_v57, %v5066_v0  ;;  %3669 = vpow2.f32 %v2771_v23  ;;  %v5208_v57 = vld [vmem:[%s5351_s4] ss:$0 sm:$0xff] }
 0x258   : > { %v3652_v9 = vpop.eup %3651  ;;  %v1801_v3 = vmul.f32 %v3650_v34, %v5070_v44  ;;  %3671 = vpow2.f32 %v2773_v56 }
 0x259   : > { %v3654_v31 = vpop.eup %3653  ;;  %v1800_v24 = vmul.f32 %v3652_v9, %v5074_v48  ;;  %v1871_v0 = vpack.c.bf16 %v1799_v58, %v1795_v51  ;;  %3673 = vpow2.f32 %v2772_v2 }
 0x25a   : > { %v3656_v61 = vpop.eup %3655  ;;  %v1802_v59 = vmul.f32 %v3654_v31, %v5085_v13  ;;  %v1873_v52 = vpack.c.bf16 %v1801_v3, %v1797_v38  ;;  %3675 = vpow2.f32 %v2774_v19 }
 0x25b   : > { %v1872_v44 = vpack.c.bf16 %v1800_v24, %v1796_v21  ;;  %v3658_v30 = vpop.eup %3657  ;;  %3677 = vpow2.f32 %v2775_v47  ;;  %v1422_v48 = vadd.f32 1.0, %v3656_v61 }
 0x25c   : > { %v1874_v25 = vpack.c.bf16 %v1802_v59, %v1798_v37  ;;  %v5195_v43 = vpop.eup %3659  ;;  %3679 = vpow2.f32 %v2777_v15  ;;  %v5198_v13 = vmul.f32 %v3658_v30, %v5092_v22 }
 0x25d   : > { %2282 = vmatprep.mubr.bf16.mxu0 %v1872_v44  ;;  %v3662_v14 = vpop.eup %3661  ;;  %3681 = vpow2.f32 %v2776_v8 }
 0x25e   : > { %2443 = vmatprep.mubr.bf16.mxu1 %v1874_v25  ;;  %2283 = vmatmul.mubr.bf16.gmra.mrb[116].mxu0 %v1871_v0  ;;  %v3664_v55 = vpop.eup %3663  ;;  %v5201_v63 = vmul.f32 %v3662_v14, %v5114_v42  ;;  %3683 = vpow2.f32 %v2778_v7 }
 0x25f   : > { %2444 = vmatmul.mubr.bf16.gmra.mrb[116].mxu1 %v1873_v52  ;;  %v3666_v54 = vpop.eup %3665  ;;  %3685 = vrcp.f32 %v1420_v40  ;;  %v1425_v1 = vadd.f32 1.0, %v3664_v55  ;;  %v1805_v40 = vmul.f32 %v5195_v43, %v5099_v36 }
 0x260   : > { %v3668_v32 = vpop.eup %3667  ;;  %3687 = vrcp.f32 %v1422_v48  ;;  %v1424_v12 = vadd.f32 1.0, %v3666_v54  ;;  %v1875_v60 = vpack.c.bf16 %v5201_v63, %v5198_v13 }
 0x261   : > { %v3670_v10 = vpop.eup %3669  ;;  %3689 = vrcp.f32 %v1425_v1  ;;  %v1426_v26 = vadd.f32 1.0, %v3668_v32  ;;  %v2835_v53 = vpop.f32.mrb[64].mxu0 }
 0x262   : > { %v3672_v29 = vpop.eup %3671  ;;  %3691 = vrcp.f32 %v1424_v12  ;;  %v1427_v22 = vadd.f32 1.0, %v3670_v10  ;;  %v2947_v49 = vpop.f32.mrb[64].mxu1 }
 0x263   : > { %v3674_v46 = vpop.eup %3673  ;;  %3693 = vrcp.f32 %v1426_v26  ;;  %v1429_v42 = vadd.f32 1.0, %v3672_v29  ;;  %v2836_v19 = vpop.f32.mrb[65].mxu0 }
 0x264   : > { %v3676_v20 = vpop.eup %3675  ;;  %3695 = vrcp.f32 %v1427_v22  ;;  %v1428_v27 = vadd.f32 1.0, %v3674_v46  ;;  %v2948_v47 = vpop.f32.mrb[65].mxu1  ;;  %v2837_v51 = vadd.f32 %v2836_v19, %v2835_v53 }
 0x265   : > { %v3678_v11 = vpop.eup %3677  ;;  %3697 = vrcp.f32 %v1429_v42  ;;  %v1430_v23 = vadd.f32 1.0, %v3676_v20  ;;  %v2949_v58 = vadd.f32 %v2948_v47, %v2947_v49  ;;  %v2838_v6 = vpop.f32.mrb[66].mxu0 }
 0x266   : > { %v3680_v56 = vpop.eup %3679  ;;  %3699 = vrcp.f32 %v1428_v27  ;;  %v1431_v2 = vadd.f32 1.0, %v3678_v11  ;;  %v2950_v9 = vpop.f32.mrb[66].mxu1  ;;  %v2181_v0 = vadd.f32 %v2837_v51, %v5208_v57 }
 0x267   : > { %v3682_v15 = vpop.eup %3681  ;;  %3701 = vrcp.f32 %v1430_v23  ;;  %v1433_v34 = vadd.f32 1.0, %v3680_v56  ;;  %v2839_v8 = vpop.f32.mrb[67].mxu0 }
 0x268   : > { %v3684_v38 = vpop.eup %3683  ;;  %3703 = vrcp.f32 %v1431_v2  ;;  %v1432_v3 = vadd.f32 1.0, %v3682_v15  ;;  %v2951_v31 = vpop.f32.mrb[67].mxu1  ;;  %v2840_v61 = vadd.f32 %v2839_v8, %v2838_v6  ;;  %v2342_v7 = vadd.f32 %v2949_v58, %v2181_v0 }
 0x269   : > { %v3686_v21 = vpop.eup %3685  ;;  %3705 = vrcp.f32 %v1433_v34  ;;  %v1434_v24 = vadd.f32 1.0, %v3684_v38  ;;  %v2952_v59 = vadd.f32 %v2951_v31, %v2950_v9 }
 0x26a   : > { %v3688_v37 = vpop.eup %3687  ;;  %3707 = vrcp.f32 %v1432_v3  ;;  %v2184_v44 = vadd.f32 %v2840_v61, %v5208_v57  ;;  %v1804_v14 = vmul.f32 %v3686_v21, %v5109_v4  ;;  %2468 = vst [vmem:[%s5219_s12] sm:$0xff] %v2342_v7 }
 0x26b   : > { %v3690_v52 = vpop.eup %3689  ;;  %3709 = vrcp.f32 %v1434_v24  ;;  %v1806_v32 = vmul.f32 %v3688_v37, %v5129_v28 }
 0x26c   : > { %v3692_v30 = vpop.eup %3691  ;;  %v1809_v25 = vmul.f32 %v3690_v52, %v5134_v35  ;;  %v2345_v54 = vadd.f32 %v2952_v59, %v2184_v44 }
 0x26d   : > { %v3694_v48 = vpop.eup %3693  ;;  %v1808_v55 = vmul.f32 %v3692_v30, %v5138_v62 }
 0x26e   : > { %v3696_v1 = vpop.eup %3695  ;;  %v1810_v12 = vmul.f32 %v3694_v48, %v5142_v41  ;;  %v1877_v36 = vpack.c.bf16 %v1809_v25, %v1805_v40  ;;  %2469 = vst [vmem:[%s5219_s12 + $0x8] sm:$0xff] %v2345_v54 }
 0x26f   : > { %v3698_v43 = vpop.eup %3697  ;;  %v1876_v35 = vpack.c.bf16 %v1808_v55, %v1804_v14  ;;  %v1811_v22 = vmul.f32 %v3696_v1, %v5147_v33 }
 0x270   : > { %v3700_v10 = vpop.eup %3699  ;;  %v1878_v4 = vpack.c.bf16 %v1810_v12, %v1806_v32  ;;  %v1813_v46 = vmul.f32 %v3698_v43, %v5152_v50 }
 0x271   : > { %v3702_v26 = vpop.eup %3701  ;;  %2290 = vmatprep.mubr.bf16.mxu0 %v1876_v35  ;;  %v1812_v27 = vmul.f32 %v3700_v10, %v5156_v16 }
 0x272   : > { %v3704_v62 = vpop.eup %3703  ;;  %2451 = vmatprep.mubr.bf16.mxu1 %v1878_v4  ;;  %2291 = vmatmul.mubr.bf16.gmra.mrb[120].mxu0 %v1875_v60  ;;  %v1814_v13 = vmul.f32 %v3702_v26, %v5160_v18 }
 0x273   : > { %v3706_v29 = vpop.eup %3705  ;;  %v1815_v28 = vmul.f32 %v3704_v62, %v5164_v5  ;;  %2452 = vmatmul.mubr.bf16.gmra.mrb[120].mxu1 %v1877_v36 }
 0x274   : > { %v3708_v41 = vpop.eup %3707  ;;  %v1817_v42 = vmul.f32 %v3706_v29, %v5168_v39 }
 0x275   : > { %v3710_v20 = vpop.eup %3709  ;;  %v1816_v11 = vmul.f32 %v3708_v41, %v5174_v45  ;;  %v1879_v23 = vpack.c.bf16 %v1815_v28, %v1811_v22 }
 0x276   : > { %v2841_v53 = vpop.f32.mrb[68].mxu0  ;;  %v1818_v63 = vmul.f32 %v3710_v20, %v5185_v17  ;;  %v1881_v33 = vpack.c.bf16 %v1817_v42, %v1813_v46 }
 0x277   : > { %v2953_v60 = vpop.f32.mrb[68].mxu1  ;;  %v2842_v5 = vpop.f32.mrb[69].mxu0  ;;  %v1880_v49 = vpack.c.bf16 %v1816_v11, %v1812_v27 }
 0x278   : > { %v2843_v56 = vadd.f32 %v2842_v5, %v2841_v53  ;;  %v2954_v2 = vpop.f32.mrb[69].mxu1  ;;  %v2844_v50 = vpop.f32.mrb[70].mxu0  ;;  %v1882_v39 = vpack.c.bf16 %v1818_v63, %v1814_v13 }
 0x279   : > { %v2955_v19 = vadd.f32 %v2954_v2, %v2953_v60  ;;  %v2956_v47 = vpop.f32.mrb[70].mxu1  ;;  %v2845_v16 = vpop.f32.mrb[71].mxu0  ;;  %2298 = vmatprep.mubr.bf16.mxu0 %v1880_v49 }
 0x27a   : > { %v2189_v45 = vadd.f32 %v2843_v56, %v5208_v57  ;;  %v2846_v15 = vadd.f32 %v2845_v16, %v2844_v50  ;;  %v2957_v18 = vpop.f32.mrb[71].mxu1  ;;  %2459 = vmatprep.mubr.bf16.mxu1 %v1882_v39  ;;  %2299 = vmatmul.mubr.bf16.gmra.mrb[124].mxu0 %v1879_v23 }
 0x27b   : > { %v2958_v17 = vadd.f32 %v2957_v18, %v2956_v47  ;;  %2460 = vmatmul.mubr.bf16.gmra.mrb[124].mxu1 %v1881_v33 }
 0x27c   : > { %v2350_v34 = vadd.f32 %v2955_v19, %v2189_v45  ;;  %v2192_v51 = vadd.f32 %v2846_v15, %v5208_v57 }
 0x27e   : > { %2470 = vst [vmem:[%s5219_s12 + $0x10] sm:$0xff] %v2350_v34  ;;  %v2353_v58 = vadd.f32 %v2958_v17, %v2192_v51  ;;  %v2847_v6 = vpop.f32.mrb[72].mxu0 }
 0x27f   : > { %v2959_v9 = vpop.f32.mrb[72].mxu1  ;;  %v2848_v38 = vpop.f32.mrb[73].mxu0 }
 0x280   : > { %2471 = vst [vmem:[%s5219_s12 + $0x18] sm:$0xff] %v2353_v58  ;;  %v2849_v3 = vadd.f32 %v2848_v38, %v2847_v6  ;;  %v2960_v8 = vpop.f32.mrb[73].mxu1  ;;  %v2850_v31 = vpop.f32.mrb[74].mxu0 }
 0x281   : > { %v2961_v21 = vadd.f32 %v2960_v8, %v2959_v9  ;;  %v2962_v24 = vpop.f32.mrb[74].mxu1  ;;  %v2851_v0 = vpop.f32.mrb[75].mxu0 }
 0x282   : > { %v2197_v61 = vadd.f32 %v2849_v3, %v5208_v57  ;;  %v2852_v37 = vadd.f32 %v2851_v0, %v2850_v31  ;;  %v2963_v59 = vpop.f32.mrb[75].mxu1 }
 0x283   : > { %v2964_v52 = vadd.f32 %v2963_v59, %v2962_v24 }
 0x284   : > { %v2358_v7 = vadd.f32 %v2961_v21, %v2197_v61  ;;  %v2200_v44 = vadd.f32 %v2852_v37, %v5208_v57 }
 0x286   : > { %2472 = vst [vmem:[%s5219_s12 + $0x20] sm:$0xff] %v2358_v7  ;;  %v2361_v30 = vadd.f32 %v2964_v52, %v2200_v44 }
 0x288   : > { %2473 = vst [vmem:[%s5219_s12 + $0x28] sm:$0xff] %v2361_v30 }
 0x293   : > { %v2853_v40 = vpop.f32.mrb[76].mxu0 }
 0x294   : > { %v2965_v25 = vpop.f32.mrb[76].mxu1  ;;  %v2854_v48 = vpop.f32.mrb[77].mxu0 }
 0x295   : > { %v2855_v14 = vadd.f32 %v2854_v48, %v2853_v40  ;;  %v2966_v55 = vpop.f32.mrb[77].mxu1  ;;  %v2856_v54 = vpop.f32.mrb[78].mxu0 }
 0x296   : > { %v2967_v1 = vadd.f32 %v2966_v55, %v2965_v25  ;;  %v2968_v32 = vpop.f32.mrb[78].mxu1  ;;  %v2857_v12 = vpop.f32.mrb[79].mxu0 }
 0x297   : > { %v2205_v36 = vadd.f32 %v2855_v14, %v5208_v57  ;;  %v2858_v43 = vadd.f32 %v2857_v12, %v2856_v54  ;;  %v2969_v35 = vpop.f32.mrb[79].mxu1 }
 0x298   : > { %v2970_v10 = vadd.f32 %v2969_v35, %v2968_v32 }
 0x299   : > { %v2366_v4 = vadd.f32 %v2967_v1, %v2205_v36  ;;  %v2208_v26 = vadd.f32 %v2858_v43, %v5208_v57 }
 0x29b   : > { %2474 = vst [vmem:[%s5219_s12 + $0x30] sm:$0xff] %v2366_v4  ;;  %v2369_v62 = vadd.f32 %v2970_v10, %v2208_v26  ;;  %v2859_v29 = vpop.f32.mrb[80].mxu0 }
 0x29c   : > { %v2860_v22 = vpop.f32.mrb[81].mxu0 }
 0x29d   : > { %2475 = vst [vmem:[%s5219_s12 + $0x38] sm:$0xff] %v2369_v62  ;;  %v2861_v28 = vadd.f32 %v2860_v22, %v2859_v29  ;;  %v2862_v41 = vpop.f32.mrb[82].mxu0 }
 0x29e   : > { %v2863_v46 = vpop.f32.mrb[83].mxu0 }
 0x29f   : > { %v2864_v42 = vadd.f32 %v2863_v46, %v2862_v41  ;;  %v2213_v27 = vadd.f32 %v2861_v28, %v5208_v57 }
 0x2a1   : > { %v2216_v13 = vadd.f32 %v2864_v42, %v5208_v57 }
 0x2aa   : > { %v2971_v20 = vpop.f32.mrb[80].mxu1 }
 0x2ab   : > { %v2972_v11 = vpop.f32.mrb[81].mxu1 }
 0x2ac   : > { %v2973_v23 = vadd.f32 %v2972_v11, %v2971_v20  ;;  %v2974_v53 = vpop.f32.mrb[82].mxu1 }
 0x2ad   : > { %v2975_v63 = vpop.f32.mrb[83].mxu1 }
 0x2ae   : > { %v2374_v33 = vadd.f32 %v2973_v23, %v2213_v27  ;;  %v2976_v60 = vadd.f32 %v2975_v63, %v2974_v53 }
 0x2b0   : > { %2476 = vst [vmem:[%s5219_s12 + $0x40] sm:$0xff] %v2374_v33  ;;  %v2377_v5 = vadd.f32 %v2976_v60, %v2216_v13  ;;  %v2865_v49 = vpop.f32.mrb[84].mxu0 }
 0x2b1   : > { %v2866_v2 = vpop.f32.mrb[85].mxu0 }
 0x2b2   : > { %2477 = vst [vmem:[%s5219_s12 + $0x48] sm:$0xff] %v2377_v5  ;;  %v2977_v56 = vpop.f32.mrb[84].mxu1  ;;  %v2867_v50 = vadd.f32 %v2866_v2, %v2865_v49  ;;  %v2868_v19 = vpop.f32.mrb[86].mxu0 }
 0x2b3   : > { %v2978_v39 = vpop.f32.mrb[85].mxu1  ;;  %v2869_v45 = vpop.f32.mrb[87].mxu0 }
 0x2b4   : > { %v2979_v47 = vadd.f32 %v2978_v39, %v2977_v56  ;;  %v2980_v16 = vpop.f32.mrb[86].mxu1  ;;  %v2221_v15 = vadd.f32 %v2867_v50, %v5208_v57  ;;  %v2870_v18 = vadd.f32 %v2869_v45, %v2868_v19 }
 0x2b5   : > { %v2981_v17 = vpop.f32.mrb[87].mxu1 }
 0x2b6   : > { %v2982_v34 = vadd.f32 %v2981_v17, %v2980_v16  ;;  %v2382_v51 = vadd.f32 %v2979_v47, %v2221_v15  ;;  %v2224_v58 = vadd.f32 %v2870_v18, %v5208_v57 }
 0x2b8   : > { %2478 = vst [vmem:[%s5219_s12 + $0x50] sm:$0xff] %v2382_v51  ;;  %v2385_v6 = vadd.f32 %v2982_v34, %v2224_v58 }
 0x2ba   : > { %2479 = vst [vmem:[%s5219_s12 + $0x58] sm:$0xff] %v2385_v6 }
 0x2c5   : > { %v2871_v9 = vpop.f32.mrb[88].mxu0 }
 0x2c6   : > { %v2983_v38 = vpop.f32.mrb[88].mxu1  ;;  %v2872_v3 = vpop.f32.mrb[89].mxu0 }
 0x2c7   : > { %v2873_v8 = vadd.f32 %v2872_v3, %v2871_v9  ;;  %v2984_v31 = vpop.f32.mrb[89].mxu1  ;;  %v2874_v21 = vpop.f32.mrb[90].mxu0 }
 0x2c8   : > { %v2985_v24 = vadd.f32 %v2984_v31, %v2983_v38  ;;  %v2986_v0 = vpop.f32.mrb[90].mxu1  ;;  %v2875_v61 = vpop.f32.mrb[91].mxu0 }
 0x2c9   : > { %v2229_v37 = vadd.f32 %v2873_v8, %v5208_v57  ;;  %v2876_v59 = vadd.f32 %v2875_v61, %v2874_v21  ;;  %v2987_v52 = vpop.f32.mrb[91].mxu1 }
 0x2ca   : > { %v2988_v7 = vadd.f32 %v2987_v52, %v2986_v0 }
 0x2cb   : > { %v2390_v44 = vadd.f32 %v2985_v24, %v2229_v37  ;;  %v2232_v30 = vadd.f32 %v2876_v59, %v5208_v57 }
 0x2cd   : > { %2480 = vst [vmem:[%s5219_s12 + $0x60] sm:$0xff] %v2390_v44  ;;  %v2393_v40 = vadd.f32 %v2988_v7, %v2232_v30  ;;  %v2877_v25 = vpop.f32.mrb[92].mxu0 }
 0x2ce   : > { %v2989_v48 = vpop.f32.mrb[92].mxu1  ;;  %v2878_v14 = vpop.f32.mrb[93].mxu0 }
 0x2cf   : > { %2481 = vst [vmem:[%s5219_s12 + $0x68] sm:$0xff] %v2393_v40  ;;  %v2879_v55 = vadd.f32 %v2878_v14, %v2877_v25  ;;  %v2990_v54 = vpop.f32.mrb[93].mxu1  ;;  %v2880_v1 = vpop.f32.mrb[94].mxu0 }
 0x2d0   : > { %v2991_v32 = vadd.f32 %v2990_v54, %v2989_v48  ;;  %v2992_v12 = vpop.f32.mrb[94].mxu1  ;;  %v2881_v36 = vpop.f32.mrb[95].mxu0 }
 0x2d1   : > { %v2237_v43 = vadd.f32 %v2879_v55, %v5208_v57  ;;  %v2882_v35 = vadd.f32 %v2881_v36, %v2880_v1  ;;  %v2993_v10 = vpop.f32.mrb[95].mxu1 }
 0x2d2   : > { %v2994_v4 = vadd.f32 %v2993_v10, %v2992_v12 }
 0x2d3   : > { %v2398_v26 = vadd.f32 %v2991_v32, %v2237_v43  ;;  %v2240_v62 = vadd.f32 %v2882_v35, %v5208_v57 }
 0x2d5   : > { %2482 = vst [vmem:[%s5219_s12 + $0x70] sm:$0xff] %v2398_v26  ;;  %v2401_v29 = vadd.f32 %v2994_v4, %v2240_v62 }
 0x2d7   : > { %2483 = vst [vmem:[%s5219_s12 + $0x78] sm:$0xff] %v2401_v29 }
 0x2e2   : > { %v2883_v22 = vpop.f32.mrb[96].mxu0 }
 0x2e3   : > { %v2995_v28 = vpop.f32.mrb[96].mxu1  ;;  %v2884_v41 = vpop.f32.mrb[97].mxu0 }
 0x2e4   : > { %v2885_v46 = vadd.f32 %v2884_v41, %v2883_v22  ;;  %v2996_v42 = vpop.f32.mrb[97].mxu1  ;;  %v2886_v20 = vpop.f32.mrb[98].mxu0 }
 0x2e5   : > { %v2997_v27 = vadd.f32 %v2996_v42, %v2995_v28  ;;  %v2998_v11 = vpop.f32.mrb[98].mxu1  ;;  %v2887_v23 = vpop.f32.mrb[99].mxu0 }
 0x2e6   : > { %v2245_v53 = vadd.f32 %v2885_v46, %v5208_v57  ;;  %v2888_v13 = vadd.f32 %v2887_v23, %v2886_v20  ;;  %v2999_v63 = vpop.f32.mrb[99].mxu1 }
 0x2e7   : > { %v3000_v33 = vadd.f32 %v2999_v63, %v2998_v11 }
 0x2e8   : > { %v2406_v60 = vadd.f32 %v2997_v27, %v2245_v53  ;;  %v2248_v5 = vadd.f32 %v2888_v13, %v5208_v57 }
 0x2ea   : > { %2484 = vst [vmem:[%s5219_s12 + $0x80] sm:$0xff] %v2406_v60  ;;  %v2409_v49 = vadd.f32 %v3000_v33, %v2248_v5 }
 0x2ec   : > { %2485 = vst [vmem:[%s5219_s12 + $0x88] sm:$0xff] %v2409_v49 }
 0x2f7   : > { %v2889_v56 = vpop.f32.mrb[100].mxu0 }
 0x2f8   : > { %v3001_v2 = vpop.f32.mrb[100].mxu1  ;;  %v2890_v50 = vpop.f32.mrb[101].mxu0 }
 0x2f9   : > { %v2891_v39 = vadd.f32 %v2890_v50, %v2889_v56  ;;  %v3002_v19 = vpop.f32.mrb[101].mxu1  ;;  %v2892_v47 = vpop.f32.mrb[102].mxu0 }
 0x2fa   : > { %v3003_v16 = vadd.f32 %v3002_v19, %v3001_v2  ;;  %v3004_v45 = vpop.f32.mrb[102].mxu1  ;;  %v2893_v15 = vpop.f32.mrb[103].mxu0 }
 0x2fb   : > { %v2253_v18 = vadd.f32 %v2891_v39, %v5208_v57  ;;  %v2894_v17 = vadd.f32 %v2893_v15, %v2892_v47  ;;  %v3005_v34 = vpop.f32.mrb[103].mxu1 }
 0x2fc   : > { %v3006_v51 = vadd.f32 %v3005_v34, %v3004_v45 }
 0x2fd   : > { %v2414_v58 = vadd.f32 %v3003_v16, %v2253_v18  ;;  %v2256_v6 = vadd.f32 %v2894_v17, %v5208_v57 }
 0x2ff   : > { %2486 = vst [vmem:[%s5219_s12 + $0x90] sm:$0xff] %v2414_v58  ;;  %v2417_v9 = vadd.f32 %v3006_v51, %v2256_v6  ;;  %v2895_v38 = vpop.f32.mrb[104].mxu0 }
 0x300   : > { %v3007_v3 = vpop.f32.mrb[104].mxu1  ;;  %v2896_v8 = vpop.f32.mrb[105].mxu0 }
 0x301   : > { %2487 = vst [vmem:[%s5219_s12 + $0x98] sm:$0xff] %v2417_v9  ;;  %v2897_v31 = vadd.f32 %v2896_v8, %v2895_v38  ;;  %v3008_v21 = vpop.f32.mrb[105].mxu1  ;;  %v2898_v24 = vpop.f32.mrb[106].mxu0 }
 0x302   : > { %v3009_v0 = vadd.f32 %v3008_v21, %v3007_v3  ;;  %v3010_v61 = vpop.f32.mrb[106].mxu1  ;;  %v2899_v37 = vpop.f32.mrb[107].mxu0 }
 0x303   : > { %v2261_v59 = vadd.f32 %v2897_v31, %v5208_v57  ;;  %v2900_v52 = vadd.f32 %v2899_v37, %v2898_v24  ;;  %v3011_v7 = vpop.f32.mrb[107].mxu1 }
 0x304   : > { %v3012_v44 = vadd.f32 %v3011_v7, %v3010_v61 }
 0x305   : > { %v2422_v30 = vadd.f32 %v3009_v0, %v2261_v59  ;;  %v2264_v40 = vadd.f32 %v2900_v52, %v5208_v57 }
 0x307   : > { %2488 = vst [vmem:[%s5219_s12 + $0xa0] sm:$0xff] %v2422_v30  ;;  %v2425_v25 = vadd.f32 %v3012_v44, %v2264_v40 }
 0x309   : > { %2489 = vst [vmem:[%s5219_s12 + $0xa8] sm:$0xff] %v2425_v25 }
 0x314   : > { %v2901_v48 = vpop.f32.mrb[108].mxu0 }
 0x315   : > { %v3013_v14 = vpop.f32.mrb[108].mxu1  ;;  %v2902_v55 = vpop.f32.mrb[109].mxu0 }
 0x316   : > { %v2903_v54 = vadd.f32 %v2902_v55, %v2901_v48  ;;  %v3014_v1 = vpop.f32.mrb[109].mxu1  ;;  %v2904_v32 = vpop.f32.mrb[110].mxu0 }
 0x317   : > { %v3015_v12 = vadd.f32 %v3014_v1, %v3013_v14  ;;  %v3016_v36 = vpop.f32.mrb[110].mxu1  ;;  %v2905_v43 = vpop.f32.mrb[111].mxu0 }
 0x318   : > { %v2269_v35 = vadd.f32 %v2903_v54, %v5208_v57  ;;  %v2906_v10 = vadd.f32 %v2905_v43, %v2904_v32  ;;  %v3017_v4 = vpop.f32.mrb[111].mxu1 }
 0x319   : > { %v3018_v26 = vadd.f32 %v3017_v4, %v3016_v36 }
 0x31a   : > { %v2430_v62 = vadd.f32 %v3015_v12, %v2269_v35  ;;  %v2272_v29 = vadd.f32 %v2906_v10, %v5208_v57 }
 0x31c   : > { %2490 = vst [vmem:[%s5219_s12 + $0xb0] sm:$0xff] %v2430_v62  ;;  %v2433_v22 = vadd.f32 %v3018_v26, %v2272_v29  ;;  %v2907_v28 = vpop.f32.mrb[112].mxu0 }
 0x31d   : > { %v3019_v41 = vpop.f32.mrb[112].mxu1  ;;  %v2908_v46 = vpop.f32.mrb[113].mxu0 }
 0x31e   : > { %2491 = vst [vmem:[%s5219_s12 + $0xb8] sm:$0xff] %v2433_v22  ;;  %v2909_v42 = vadd.f32 %v2908_v46, %v2907_v28  ;;  %v3020_v20 = vpop.f32.mrb[113].mxu1  ;;  %v2910_v27 = vpop.f32.mrb[114].mxu0 }
 0x31f   : > { %v3021_v11 = vadd.f32 %v3020_v20, %v3019_v41  ;;  %v3022_v23 = vpop.f32.mrb[114].mxu1  ;;  %v2911_v53 = vpop.f32.mrb[115].mxu0 }
 0x320   : > { %v2277_v13 = vadd.f32 %v2909_v42, %v5208_v57  ;;  %v2912_v63 = vadd.f32 %v2911_v53, %v2910_v27  ;;  %v3023_v33 = vpop.f32.mrb[115].mxu1 }
 0x321   : > { %v3024_v60 = vadd.f32 %v3023_v33, %v3022_v23 }
 0x322   : > { %v2438_v5 = vadd.f32 %v3021_v11, %v2277_v13  ;;  %v2280_v49 = vadd.f32 %v2912_v63, %v5208_v57 }
 0x324   : > { %2492 = vst [vmem:[%s5219_s12 + $0xc0] sm:$0xff] %v2438_v5  ;;  %v2441_v56 = vadd.f32 %v3024_v60, %v2280_v49 }
 0x326   : > { %2493 = vst [vmem:[%s5219_s12 + $0xc8] sm:$0xff] %v2441_v56 }
 0x331   : > { %v2913_v2 = vpop.f32.mrb[116].mxu0 }
 0x332   : > { %v3025_v50 = vpop.f32.mrb[116].mxu1  ;;  %v2914_v39 = vpop.f32.mrb[117].mxu0 }
 0x333   : > { %v2915_v19 = vadd.f32 %v2914_v39, %v2913_v2  ;;  %v3026_v47 = vpop.f32.mrb[117].mxu1  ;;  %v2916_v16 = vpop.f32.mrb[118].mxu0 }
 0x334   : > { %v3027_v45 = vadd.f32 %v3026_v47, %v3025_v50  ;;  %v3028_v15 = vpop.f32.mrb[118].mxu1  ;;  %v2917_v18 = vpop.f32.mrb[119].mxu0 }
 0x335   : > { %v2285_v17 = vadd.f32 %v2915_v19, %v5208_v57  ;;  %v2918_v34 = vadd.f32 %v2917_v18, %v2916_v16  ;;  %v3029_v51 = vpop.f32.mrb[119].mxu1 }
 0x336   : > { %v3030_v58 = vadd.f32 %v3029_v51, %v3028_v15 }
 0x337   : > { %v2446_v6 = vadd.f32 %v3027_v45, %v2285_v17  ;;  %v2288_v9 = vadd.f32 %v2918_v34, %v5208_v57 }
 0x339   : > { %2494 = vst [vmem:[%s5219_s12 + $0xd0] sm:$0xff] %v2446_v6  ;;  %v2449_v38 = vadd.f32 %v3030_v58, %v2288_v9 }
 0x33b   : > { %2495 = vst [vmem:[%s5219_s12 + $0xd8] sm:$0xff] %v2449_v38 }
 0x345   : > { %v2919_v3 = vpop.f32.mrb[120].mxu0 }
 0x346   : > { %v3031_v8 = vpop.f32.mrb[120].mxu1  ;;  %v2920_v31 = vpop.f32.mrb[121].mxu0 }
 0x347   : > { %v2921_v21 = vadd.f32 %v2920_v31, %v2919_v3  ;;  %v3032_v24 = vpop.f32.mrb[121].mxu1  ;;  %v2922_v0 = vpop.f32.mrb[122].mxu0 }
 0x348   : > { %v3033_v61 = vadd.f32 %v3032_v24, %v3031_v8  ;;  %v3034_v37 = vpop.f32.mrb[122].mxu1  ;;  %v2923_v59 = vpop.f32.mrb[123].mxu0 }
 0x349   : > { %v2293_v52 = vadd.f32 %v2921_v21, %v5208_v57  ;;  %v2924_v7 = vadd.f32 %v2923_v59, %v2922_v0  ;;  %v3035_v44 = vpop.f32.mrb[123].mxu1 }
 0x34a   : > { %v3036_v30 = vadd.f32 %v3035_v44, %v3034_v37 }
 0x34b   : > { %v2454_v40 = vadd.f32 %v3033_v61, %v2293_v52  ;;  %v2296_v25 = vadd.f32 %v2924_v7, %v5208_v57 }
 0x34d   : > { %2496 = vst [vmem:[%s5219_s12 + $0xe0] sm:$0xff] %v2454_v40  ;;  %v2457_v48 = vadd.f32 %v3036_v30, %v2296_v25  ;;  %v2925_v14 = vpop.f32.mrb[124].mxu0 }
 0x34e   : > { %v3037_v55 = vpop.f32.mrb[124].mxu1  ;;  %v2926_v54 = vpop.f32.mrb[125].mxu0 }
 0x34f   : > { %2497 = vst [vmem:[%s5219_s12 + $0xe8] sm:$0xff] %v2457_v48  ;;  %v2927_v1 = vadd.f32 %v2926_v54, %v2925_v14  ;;  %v3038_v32 = vpop.f32.mrb[125].mxu1  ;;  %v2928_v12 = vpop.f32.mrb[126].mxu0 }
 0x350   : > { %v3039_v36 = vadd.f32 %v3038_v32, %v3037_v55  ;;  %v3040_v43 = vpop.f32.mrb[126].mxu1  ;;  %v2929_v35 = vpop.f32.mrb[127].mxu0 }
 0x351   : > { %v2301_v10 = vadd.f32 %v2927_v1, %v5208_v57  ;;  %v2930_v4 = vadd.f32 %v2929_v35, %v2928_v12  ;;  %v3041_v26 = vpop.f32.mrb[127].mxu1 }
 0x352   : > { %v3042_v62 = vadd.f32 %v3041_v26, %v3040_v43 }
 0x353   : > { %v2462_v29 = vadd.f32 %v3039_v36, %v2301_v10  ;;  %v2304_v22 = vadd.f32 %v2930_v4, %v5208_v57 }
 0x355   : > { %2498 = vst [vmem:[%s5219_s12 + $0xf0] sm:$0xff] %v2462_v29  ;;  %v2465_v28 = vadd.f32 %v3042_v62, %v2304_v22 }
 0x357   : > { %2499 = vst [vmem:[%s5219_s12 + $0xf8] sm:$0xff] %v2465_v28 }
 0x358   : > { %3810 = shalt.err (!%p3807_p2)
}
 0x359   : > { %s3811_s6 = scalar_lea.hbm %s5299_s11, 4096  ;;  %s3815_s10 = scalar_lea.hbm %s5352_s5, 8192 }
 0x35a   : > { %p3812_p13 = scmp.ne.s32.totalorder %s5299_s11, %s3811_s6  ;;  %p3816_p4 = scmp.lt.u32.totalorder %s5299_s11, %s5352_s5 }
 0x35b   : > { %p3817_p7 = scmp.lt.u32.totalorder %s3815_s10, %s3811_s6  ;;  %p3819_p11 = scmp.lt.u32.totalorder %s3811_s6, %s5299_s11 }
 0x35c   : > { %p3813_p6 = pnand %p3812_p13, %p5486_p0 }
 0x35d   : > { %p3818_p8 = por %p3817_p7, %p3816_p4 }
 0x35e   : > { %p3814_p10 = pneg %p3813_p6 }
 0x35f   : > { %p3820_p1 = por %p3819_p11, %p3818_p8 }
 0x361   : > { %p3821_p3 = pnand %p3820_p1, %p3814_p10 }
 0x363   : > { %3824 = shalt.err (!%p3821_p3)
}
 0x364   : > { %s3880_s13 = smov 128   ;;  %s3881_s8 = smov 8  }
 0x365   : > { %3053 = dma.vmem_to_hbm [thread:$0]  (%p5486_p0), %s5301_s29, 4096, %s5299_s11, %s2501_s14, %s3880_s13, %s3880_s13, %s3881_s8  }
 0x366 PF: > { %s2529_s9 = sand.u32 1, %s3855_s18   ;;  %p5487_p5 = scmp.ne.s32.totalorder %s5360_s25, 0 }
 0x367   : > { %p5488_p9 = scmp.ge.s32.totalorder %s3867_s21, 2  ;;  %s2530_s22 = scalar_lea.sflag [#allocation4], %s2529_s9 }
 0x369   : > { %p3067_p12 = pnand %p5488_p9, %p5487_p5 }
 0x36b   : > { %3850 = dma.done.wait (!%p3067_p12), %s2530_s22, 4096  }
 0x36c   : > { %3852 = vsyncadd (!%p3067_p12), %s2530_s22, 4294963200  ;;  %p19_p2 = scmp.ge.s32.totalorder %s4022_s16, 4   ;;  %s5489_s18 = smov %s3859_s19 }
 0x36d   : > { %s5490_s19 = smov %s3863_s20  ;;  %s5491_s20 = smov %s4031_s27 }
 0x36e   : > { %s5492_s21 = smov %s4022_s16  ;;  %21 = sbr.rel (!%p19_p2) target bundleno = 6 (0x6), region = 93 }
 0x375   :  { %2535 = vsyncpa [#allocation3], 1 }
 0x376   :  { %2537 = vsyncpa [#allocation3 + $0x1], 1 }
 0x377   :  { %2538 = vsyncpa [#allocation6], 1 }
 0x378   :  { %2539 = vsyncpa [#allocation4], 1 }
 0x379   :  { %2541 = vsyncpa [#allocation4 + $0x1], 1 }

// kernel: tpu_custom_call.1
= control target key start
LH: loop header
LB: loop body
LE: loop exit
PB: predicated region body
PF: predicated region fallthrough
CT: control target
= control target key end

     0   :  { %10 = vsyncpa [#allocation3], 0  ;;  %s5347_s0 = inlined_call_operand.hbm [shape: f32[512,128], index: 0, kind: input, shape index: {}]   ;;  %s5348_s1 = inlined_call_operand.hbm [shape: bf16[128,512], index: 1, kind: input, shape index: {}]   ;;  %s5349_s2 = inlined_call_operand.vmem [shape: f32[1,512], index: 2, kind: input, shape index: {}]   ;;  %s5350_s3 = inlined_call_operand.hbm [shape: bf16[512,128], index: 3, kind: input, shape index: {}]   ;;  %s5351_s4 = inlined_call_operand.vmem [shape: f32[1,128], index: 4, kind: input, shape index: {}]   ;;  %s5352_s5 = inlined_call_operand.hbm [shape: f32[512,128], index: 5, kind: output, shape index: {}]  }
   0x1   :  { %12 = vsyncpa [#allocation3 + $0x1], 0 }
   0x2   :  { %13 = vsyncpa [#allocation6], 0 }
   0x3   :  { %14 = vsyncpa [#allocation4], 0 }
   0x4   :  { %16 = vsyncpa [#allocation4 + $0x1], 0  ;;  %s3912_s18 = smov 0   ;;  %s3914_s19 = smov 0  }
   0x5   :  { %s3916_s20 = smov 0   ;;  %s3918_s21 = smov 0  }
   0x6 LB: > { %s3933_s22 = sadd.s32 4294967295, %s3867_s21   ;;  %s2606_s23 = sadd.s32 4294967294, %s3867_s21   ;;  %s3867_s21 = sphi %s3918_s21, %s5492_s21   ;;  %s3863_s20 = sphi %s3916_s20, %s5491_s20   ;;  %s3859_s19 = sphi %s3914_s19, %s5490_s19   ;;  %s3855_s18 = sphi %s3912_s18, %s5489_s18  }
   0x7   : > { %p42_p0 = scmp.ne.s32.totalorder %s3859_s19, %s3855_s18  ;;  %p5353_p1 = scmp.eq.s32.totalorder %s3933_s22, 0 }
   0x8   : > { %p156_p3 = scmp.eq.s32.totalorder %s2606_s23, 1  ;;  %p2607_p5 = scmp.ge.s32.totalorder %s3867_s21, 1 }
   0x9   : > { %p3942_p4 = por %p5353_p1, %p42_p0  ;;  %p163_p7 = scmp.lt.s32.totalorder %s3867_s21, 3 }
   0xa   : > { %p3947_p6 = por %p156_p3, %p42_p0  ;;  %s3869_s27 = smov [#allocation5]  }
   0xb   : > { %s5359_s24 = scalar_select %p3942_p4, 1, 0 }
   0xc   : > { %s5360_s25 = scalar_select %p3947_p6, 1, 0 }
   0xd   : > { %p3952_p8 = pnand %p2607_p5, %p163_p7  ;;  %s175_s28 = sshll.u32 %s3869_s27, 4  ;;  %s3956_s28 = int_to_ptr.vmem [resolvable:$true] %s175_s28 }
   0xe   : > { %s3870_s30 = smov [#allocation7]   ;;  %s3711_s9 = scalar_lea.hbm %s5348_s1, 4096 }
   0xf   : > { %p3055_p9 = pneg %p3952_p8  ;;  %s191_s6 = sshll.u32 %s3870_s30, 4  ;;  %s3967_s6 = int_to_ptr.vmem [resolvable:$true] %s191_s6 }
  0x10   : > { %p3712_p12 = scmp.ne.s32.totalorder %s5348_s1, %s3711_s9  ;;  %p3718_p5 = scmp.lt.u32.totalorder %s3711_s9, %s5348_s1 }
  0x11   : > { %p3963_p11 = pnand %p3055_p9, %p5353_p1 }
  0x13   : > { %p3713_p13 = pneg %p3963_p11 }
  0x15   : > { %p3714_p0 = pnand %p3713_p13, %p3712_p12 }
  0x17   : > { %p3715_p3 = pneg %p3714_p0 }
  0x19   : > { %p3720_p7 = pnand %p3718_p5, %p3715_p3 }
  0x1b   : > { %3723 = shalt.err (!%p3720_p7)
}
  0x1c   : > { %s3724_s14 = scalar_lea.vmem %s3956_s28, 4096  ;;  %p3732_p2 = scmp.lt.s32.totalorder %s3956_s28, %s3956_s28 }
  0x1d   : > { %p3725_p9 = scmp.ne.s32.totalorder %s3956_s28, %s3724_s14  ;;  %p3733_p12 = scmp.lt.s32.totalorder %s3724_s14, %s3724_s14 }
  0x1f   : > { %p3727_p10 = pnand %p3725_p9, %p3713_p13  ;;  %p3734_p0 = por %p3733_p12, %p3732_p2 }
  0x21   : > { %p3728_p1 = pneg %p3727_p10 }
  0x23   : > { %p3735_p6 = pnand %p3734_p0, %p3728_p1 }
  0x25   : > { %3738 = shalt.err (!%p3735_p6)
}
  0x26   : > { %s3871_s15 = smov 256   ;;  %s3872_s16 = smov 16  }
  0x27   : > { %3058 = dma.hbm_to_vmem [thread:$0]  (!%p3963_p11), %s5348_s1, 4096, %s3956_s28, [#allocation6], %s3871_s15, %s3871_s15, %s3872_s16  }
  0x28   : > { %s3739_s7 = scalar_lea.hbm %s5350_s3, 4096 }
  0x29   : > { %p3740_p2 = scmp.ne.s32.totalorder %s5350_s3, %s3739_s7  ;;  %p3746_p10 = scmp.lt.u32.totalorder %s3739_s7, %s5350_s3 }
  0x2b   : > { %p3742_p1 = pnand %p3740_p2, %p3713_p13 }
  0x2d   : > { %p3743_p6 = pneg %p3742_p1 }
  0x2f   : > { %p3748_p3 = pnand %p3746_p10, %p3743_p6 }
  0x31   : > { %3751 = shalt.err (!%p3748_p3)
}
  0x32   : > { %s3752_s28 = scalar_lea.vmem %s3967_s6, 4096  ;;  %p3760_p12 = scmp.lt.s32.totalorder %s3967_s6, %s3967_s6 }
  0x33   : > { %p3753_p5 = scmp.ne.s32.totalorder %s3967_s6, %s3752_s28  ;;  %p3761_p0 = scmp.lt.s32.totalorder %s3752_s28, %s3752_s28 }
  0x35   : > { %p3755_p7 = pnand %p3753_p5, %p3713_p13  ;;  %p3762_p2 = por %p3761_p0, %p3760_p12 }
  0x37   : > { %p3756_p9 = pneg %p3755_p7 }
  0x39   : > { %p3763_p1 = pnand %p3762_p2, %p3756_p9 }
  0x3b   : > { %3766 = shalt.err (!%p3763_p1)
}
  0x3c   : > { %s3873_s12 = smov 64   ;;  %s3874_s13 = smov 4  }
  0x3d   : > { %3061 = dma.hbm_to_vmem [thread:$0]  (!%p3963_p11), %s5350_s3, 4096, %s3967_s6, [#allocation6], %s3873_s12, %s3873_s12, %s3874_s13  }
  0x3e   : > { %s4022_s16 = sadd.s32 1, %s3867_s21   ;;  %s29_s23 = sadd.s32 1, %s3863_s20 }
  0x3f   : > { %s26_s17 = ssub.s32 %s3867_s21, %s4022_s16  ;;  %p36_p6 = scmp.ne.s32.totalorder %s3863_s20, %s3859_s19 }
  0x40   : > { %p27_p13 = scmp.eq.s32.totalorder %s26_s17, 0  ;;  %p37_p10 = scmp.eq.s32.totalorder %s3867_s21, 0 }
  0x41   : > { %p5363_p5 = scmp.eq.s32.totalorder %s3933_s22, 1  ;;  %p3072_p9 = scmp.lt.s32.totalorder %s3867_s21, 2 }
  0x42   : > { %s4031_s27 = scalar_select %p27_p13, %s3863_s20, %s29_s23  }
  0x43   : > { %p38_p3 = por %p37_p10, %p36_p6  ;;  %p4035_p7 = por %p5363_p5, %p36_p6 }
  0x44   : > { %s208_s29 = sand.u32 1, %s3863_s20   ;;  %s2817_s6 = sshll.u32 %s3867_s21, 12 }
  0x45   : > { %s5364_s30 = scalar_select %p4035_p7, 1, 0 }
  0x46   : > { %s2611_s7 = sshll.u32 %s208_s29, 8  ;;  %s4045_s10 = scalar_lea.hbm %s5347_s0, %s2817_s6 }
  0x47   : > { %s212_s11 = scalar_lea.vmem [#allocation2], %s2611_s7  ;;  %p4049_p11 = pnand %p3072_p9, %p38_p3 }
  0x48   : > { %s219_s28 = sshll.u32 %s212_s11, 4  ;;  %s4053_s13 = scalar_lea.sflag [#allocation3], %s208_s29  ;;  %s4047_s28 = int_to_ptr.vmem [resolvable:$true] %s219_s28 }
  0x49   : > { %s3767_s14 = scalar_lea.hbm %s4045_s10, 4096  ;;  %p3769_p0 = pneg %p4049_p11 }
  0x4a   : > { %p3768_p12 = scmp.ne.s32.totalorder %s4045_s10, %s3767_s14  ;;  %s3772_s23 = scalar_lea.hbm %s5347_s0, 8192 }
  0x4b   : > { %p3773_p13 = scmp.lt.u32.totalorder %s4045_s10, %s5347_s0  ;;  %p3774_p6 = scmp.lt.u32.totalorder %s3772_s23, %s3767_s14 }
  0x4c   : > { %p3770_p2 = pnand %p3769_p0, %p3768_p12  ;;  %p3776_p3 = scmp.lt.u32.totalorder %s3767_s14, %s4045_s10 }
  0x4d   : > { %p3775_p10 = por %p3774_p6, %p3773_p13 }
  0x4e   : > { %p3771_p1 = pneg %p3770_p2 }
  0x4f   : > { %p3777_p5 = por %p3776_p3, %p3775_p10 }
  0x51   : > { %p3778_p9 = pnand %p3777_p5, %p3771_p1 }
  0x53   : > { %3781 = shalt.err (!%p3778_p9)
}
  0x54   : > { %s3782_s29 = scalar_lea.vmem %s4047_s28, 4096  ;;  %s3875_s8 = smov [#allocation2]  }
  0x55   : > { %p3783_p12 = scmp.ne.s32.totalorder %s4047_s28, %s3782_s29  ;;  %s3787_s9 = sshll.u32 %s3875_s8, 4  ;;  %s3788_s9 = int_to_ptr.vmem [resolvable:$false] %s3787_s9 }
  0x56   : > { %s3789_s11 = scalar_lea.vmem %s3788_s9, 8192  ;;  %p3790_p4 = scmp.lt.s32.totalorder %s4047_s28, %s3788_s9 }
  0x57   : > { %p3785_p2 = pnand %p3783_p12, %p3769_p0  ;;  %p3791_p13 = scmp.lt.s32.totalorder %s3789_s11, %s3782_s29 }
  0x59   : > { %p3786_p7 = pneg %p3785_p2  ;;  %p3792_p6 = por %p3791_p13, %p3790_p4 }
  0x5b   : > { %p3793_p10 = pnand %p3792_p6, %p3786_p7 }
  0x5d   : > { %3796 = shalt.err (!%p3793_p10)
}
  0x5e   : > { %s3876_s14 = smov 128   ;;  %s3877_s15 = smov 8  }
  0x5f   : > { %3065 = dma.hbm_to_vmem [thread:$0]  (!%p4049_p11), %s4045_s10, 4096, %s4047_s28, %s4053_s13, %s3876_s14, %s3876_s14, %s3877_s15  }
  0x60   : > { %231 = sbr.rel (%p3952_p8) target bundleno = 870 (0x366), region = 40 }
  0x67   : > { %s4084_s17 = sand.u32 1, %s3859_s19   ;;  %p5366_p4 = scmp.ne.s32.totalorder %s5359_s24, 0 }
  0x68   : > { %s2615_s23 = sshll.u32 %s4084_s17, 8  ;;  %s234_s7 = scalar_lea.sflag [#allocation3], %s4084_s17 }
  0x69   : > { %s4090_s6 = scalar_lea.vmem [#allocation2], %s2615_s23 }
  0x6a   : > { %3842 = dma.done.wait (%p5366_p4), %s234_s7, 4096  }
  0x6b   : > { %3844 = vsyncadd (%p5366_p4), %s234_s7, 4294963200  ;;  %p5367_p7 = scmp.eq.s32.totalorder %s3933_s22, 0 }
  0x6d   : > { %3846 = dma.done.wait (%p5367_p7), [#allocation6], 8192   ;;  %p5368_p8 = pmov %p5367_p7 }
  0x6e   : > { %v3878_v0 = vmov 0   ;;  %v3119_v1 = vld [vmem:[#allocation5 + $0x4] ss:$16 sps:$4 sm:$0xff]   ;;  %v3121_v2 = vld [vmem:[#allocation5 + $0xc] ss:$16 sps:$4 sm:$0xff]   ;;  %s5219_s12 = scalar_lea.vmem [#allocation8], %s2615_s23 }
  0x6f   : > { %3848 = vsyncadd (%p5368_p8), [#allocation6], 4294959104  ;;  %569 = vmatprep.mubr.bf16.mxu0 %v3878_v0  ;;  %762 = vmatprep.mubr.bf16.mxu1 %v3878_v0  ;;  %v3123_v3 = vld [vmem:[#allocation5] ss:$16 sps:$4 sm:$0xff]   ;;  %v3124_v4 = vld [vmem:[#allocation5 + $0x8] ss:$16 sps:$4 sm:$0xff]  }
  0x70   : > { %537 = vmatprep.subr.bf16.mxu0 %v3119_v1  ;;  %730 = vmatprep.subr.bf16.mxu1 %v3121_v2  ;;  %v3125_v5 = vld [vmem:[#allocation5 + $0x24] ss:$16 sps:$4 sm:$0xff]   ;;  %v3127_v6 = vld [vmem:[#allocation5 + $0x2c] ss:$16 sps:$4 sm:$0xff]   ;;  %v3129_v7 = vld [vmem:[#allocation5 + $0x20] ss:$16 sps:$4 sm:$0xff]  }
  0x71   : > { %538 = vmatpush1.bf16.msra.mxu0 %v3123_v3  ;;  %731 = vmatpush1.bf16.msra.mxu1 %v3124_v4  ;;  %v3130_v8 = vld [vmem:[#allocation5 + $0x28] ss:$16 sps:$4 sm:$0xff]   ;;  %v3131_v9 = vld [vmem:[#allocation5 + $0x44] ss:$16 sps:$4 sm:$0xff]   ;;  %v3133_v10 = vld [vmem:[#allocation5 + $0x4c] ss:$16 sps:$4 sm:$0xff]  }
  0x72   : > { %539 = vmatprep.subr.bf16.mxu0 %v3125_v5  ;;  %732 = vmatprep.subr.bf16.mxu1 %v3127_v6  ;;  %v3135_v11 = vld [vmem:[#allocation5 + $0x40] ss:$16 sps:$4 sm:$0xff]   ;;  %v3136_v12 = vld [vmem:[#allocation5 + $0x48] ss:$16 sps:$4 sm:$0xff]   ;;  %v3137_v13 = vld [vmem:[#allocation5 + $0x64] ss:$16 sps:$4 sm:$0xff]  }
  0x73   : > { %v3139_v14 = vld [vmem:[#allocation5 + $0x6c] ss:$16 sps:$4 sm:$0xff]   ;;  %v3141_v15 = vld [vmem:[#allocation5 + $0x60] ss:$16 sps:$4 sm:$0xff]   ;;  %v3142_v16 = vld [vmem:[#allocation5 + $0x68] ss:$16 sps:$4 sm:$0xff]  }
  0x74   : > { %v3143_v17 = vld [vmem:[#allocation5 + $0x84] ss:$16 sps:$4 sm:$0xff]   ;;  %v3145_v18 = vld [vmem:[#allocation5 + $0x8c] ss:$16 sps:$4 sm:$0xff]   ;;  %v3147_v19 = vld [vmem:[#allocation5 + $0x80] ss:$16 sps:$4 sm:$0xff]  }
  0x75   : > { %540 = vmatpush1.bf16.msra.mxu0 %v3129_v7  ;;  %733 = vmatpush1.bf16.msra.mxu1 %v3130_v8  ;;  %v3148_v20 = vld [vmem:[#allocation5 + $0x88] ss:$16 sps:$4 sm:$0xff]   ;;  %v3149_v21 = vld [vmem:[#allocation5 + $0xa4] ss:$16 sps:$4 sm:$0xff]   ;;  %v3151_v22 = vld [vmem:[#allocation5 + $0xac] ss:$16 sps:$4 sm:$0xff]  }
  0x76   : > { %541 = vmatprep.subr.bf16.mxu0 %v3131_v9  ;;  %734 = vmatprep.subr.bf16.mxu1 %v3133_v10  ;;  %v3153_v23 = vld [vmem:[#allocation5 + $0xa0] ss:$16 sps:$4 sm:$0xff]   ;;  %v3154_v24 = vld [vmem:[#allocation5 + $0xa8] ss:$16 sps:$4 sm:$0xff]   ;;  %v3155_v25 = vld [vmem:[#allocation5 + $0xc4] ss:$16 sps:$4 sm:$0xff]  }
  0x77   : > { %v3157_v26 = vld [vmem:[#allocation5 + $0xcc] ss:$16 sps:$4 sm:$0xff]   ;;  %v3159_v27 = vld [vmem:[#allocation5 + $0xc0] ss:$16 sps:$4 sm:$0xff]   ;;  %v3160_v28 = vld [vmem:[#allocation5 + $0xc8] ss:$16 sps:$4 sm:$0xff]  }
  0x78   : > { %v3161_v29 = vld [vmem:[#allocation5 + $0xe4] ss:$16 sps:$4 sm:$0xff]   ;;  %v3163_v30 = vld [vmem:[#allocation5 + $0xec] ss:$16 sps:$4 sm:$0xff]   ;;  %v3165_v31 = vld [vmem:[#allocation5 + $0xe0] ss:$16 sps:$4 sm:$0xff]  }
  0x79   : > { %542 = vmatpush1.bf16.msra.mxu0 %v3135_v11  ;;  %735 = vmatpush1.bf16.msra.mxu1 %v3136_v12  ;;  %v3166_v32 = vld [vmem:[#allocation5 + $0xe8] ss:$16 sps:$4 sm:$0xff]   ;;  %v275_v33 = vld [vmem:[%s4090_s6] sm:$0xff]  ;;  %v277_v38 = vld [vmem:[%s4090_s6 + $0x10] sm:$0xff]  ;;  %s2818_s13 = sshll.u32 %s3933_s22, 12  ;;  %s2514_s29 = sshll.u32 %s5219_s12, 4  ;;  %s5301_s29 = int_to_ptr.vmem [resolvable:$true] %s2514_s29 }
  0x7a   : > { %543 = vmatprep.subr.bf16.mxu0 %v3137_v13  ;;  %736 = vmatprep.subr.bf16.mxu1 %v3139_v14  ;;  %v276_v34 = vld [vmem:[%s4090_s6 + $0x8] sm:$0xff]  ;;  %v3167_v36 = vld [vmem:[#allocation7 + $0x40] sm:$0xff]   ;;  %v278_v39 = vld [vmem:[%s4090_s6 + $0x18] sm:$0xff]  ;;  %s5299_s11 = scalar_lea.hbm %s5352_s5, %s2818_s13  ;;  %s2501_s14 = scalar_lea.sflag [#allocation4], %s4084_s17 }
  0x7b   : > { %v307_v35 = vpack.c.bf16 %v276_v34, %v275_v33  ;;  %v3168_v37 = vld [vmem:[#allocation7] sm:$0xff]   ;;  %v3171_v42 = vld [vmem:[#allocation7 + $0x48] sm:$0xff]   ;;  %v308_v45 = vpack.c.bf16 %v278_v39, %v277_v38  ;;  %v3175_v47 = vld [vmem:[#allocation7 + $0x50] sm:$0xff]   ;;  %s3797_s22 = scalar_lea.vmem %s5301_s29, 4096  ;;  %p5486_p0 = scmp.ne.s32.totalorder %s5364_s30, 0 }
  0x7c   : > { %v3169_v40 = vld [vmem:[#allocation7 + $0xc0] sm:$0xff]   ;;  %v3172_v43 = vld [vmem:[#allocation7 + $0x8] sm:$0xff]   ;;  %v3176_v48 = vld [vmem:[#allocation7 + $0x10] sm:$0xff]   ;;  %p3798_p11 = scmp.ne.s32.totalorder %s5301_s29, %s3797_s22  ;;  %s3879_s15 = smov [#allocation8]  }
  0x7d   : > { %544 = vmatpush1.bf16.msra.mxu0 %v3141_v15  ;;  %737 = vmatpush1.bf16.msra.mxu1 %v3142_v16  ;;  %v3170_v41 = vld [vmem:[#allocation7 + $0x80] sm:$0xff]   ;;  %v3173_v44 = vld [vmem:[#allocation7 + $0xc8] sm:$0xff]   ;;  %v3177_v51 = vld [vmem:[#allocation7 + $0xd0] sm:$0xff]   ;;  %s3801_s23 = sshll.u32 %s3879_s15, 4  ;;  %s3802_s23 = int_to_ptr.vmem [resolvable:$false] %s3801_s23 }
  0x7e   : > { %545 = vmatprep.subr.bf16.mxu0 %v3143_v17  ;;  %738 = vmatprep.subr.bf16.mxu1 %v3145_v18  ;;  %v3174_v46 = vld [vmem:[#allocation7 + $0x88] sm:$0xff]   ;;  %v279_v49 = vld [vmem:[%s4090_s6 + $0x20] sm:$0xff]  ;;  %v3178_v52 = vld [vmem:[#allocation7 + $0x90] sm:$0xff]   ;;  %p3799_p1 = pnand %p3798_p11, %p5486_p0  ;;  %s3803_s7 = scalar_lea.vmem %s3802_s23, 8192 }
  0x7f   : > { %v280_v50 = vld [vmem:[%s4090_s6 + $0x28] sm:$0xff]  ;;  %v3179_v53 = vld [vmem:[#allocation7 + $0x58] sm:$0xff]   ;;  %v3183_v58 = vld [vmem:[#allocation7 + $0x60] sm:$0xff]   ;;  %p3804_p5 = scmp.lt.s32.totalorder %s5301_s29, %s3802_s23  ;;  %p3805_p9 = scmp.lt.s32.totalorder %s3803_s7, %s3797_s22 }
  0x80   : > { %v3180_v54 = vld [vmem:[#allocation7 + $0x18] sm:$0xff]   ;;  %v309_v56 = vpack.c.bf16 %v280_v50, %v279_v49  ;;  %v3184_v59 = vld [vmem:[#allocation7 + $0x20] sm:$0xff]   ;;  %v281_v60 = vld [vmem:[%s4090_s6 + $0x30] sm:$0xff]  ;;  %p3800_p3 = pneg %p3799_p1 }
  0x81   : > { %546 = vmatpush1.bf16.msra.mxu0 %v3147_v19  ;;  %739 = vmatpush1.bf16.msra.mxu1 %v3148_v20  ;;  %v3181_v55 = vld [vmem:[#allocation7 + $0xd8] sm:$0xff]   ;;  %v3185_v62 = vld [vmem:[#allocation7 + $0xe0] sm:$0xff]   ;;  %v3187_v1 = vld [vmem:[#allocation7 + $0x68] sm:$0xff]   ;;  %p3806_p12 = por %p3805_p9, %p3804_p5 }
  0x82   : > { %547 = vmatprep.subr.bf16.mxu0 %v3149_v21  ;;  %740 = vmatprep.subr.bf16.mxu1 %v3151_v22  ;;  %v3182_v57 = vld [vmem:[#allocation7 + $0x98] sm:$0xff]   ;;  %v3186_v63 = vld [vmem:[#allocation7 + $0xa0] sm:$0xff]   ;;  %v3188_v2 = vld [vmem:[#allocation7 + $0x28] sm:$0xff]  }
  0x83   : > { %v282_v61 = vld [vmem:[%s4090_s6 + $0x38] sm:$0xff]  ;;  %v3189_v3 = vld [vmem:[#allocation7 + $0xe8] sm:$0xff]   ;;  %v283_v6 = vld [vmem:[%s4090_s6 + $0x40] sm:$0xff]  ;;  %p3807_p2 = pnand %p3806_p12, %p3800_p3 }
  0x84   : > { %v310_v4 = vpack.c.bf16 %v282_v61, %v281_v60  ;;  %v3190_v5 = vld [vmem:[#allocation7 + $0xa8] sm:$0xff]   ;;  %v285_v9 = vld [vmem:[%s4090_s6 + $0x50] sm:$0xff]  ;;  %v286_v10 = vld [vmem:[%s4090_s6 + $0x58] sm:$0xff] }
  0x85   : > { %548 = vmatpush1.bf16.msra.mxu0 %v3153_v23  ;;  %741 = vmatpush1.bf16.msra.mxu1 %v3154_v24  ;;  %v284_v7 = vld [vmem:[%s4090_s6 + $0x48] sm:$0xff]  ;;  %v312_v11 = vpack.c.bf16 %v286_v10, %v285_v9  ;;  %v287_v12 = vld [vmem:[%s4090_s6 + $0x60] sm:$0xff]  ;;  %v289_v15 = vld [vmem:[%s4090_s6 + $0x70] sm:$0xff] }
  0x86   : > { %549 = vmatprep.subr.bf16.mxu0 %v3155_v25  ;;  %742 = vmatprep.subr.bf16.mxu1 %v3157_v26  ;;  %v311_v8 = vpack.c.bf16 %v284_v7, %v283_v6  ;;  %v288_v13 = vld [vmem:[%s4090_s6 + $0x68] sm:$0xff]  ;;  %v290_v16 = vld [vmem:[%s4090_s6 + $0x78] sm:$0xff]  ;;  %v291_v18 = vld [vmem:[%s4090_s6 + $0x80] sm:$0xff] }
  0x87   : > { %v313_v14 = vpack.c.bf16 %v288_v13, %v287_v12  ;;  %v314_v17 = vpack.c.bf16 %v290_v16, %v289_v15  ;;  %v292_v19 = vld [vmem:[%s4090_s6 + $0x88] sm:$0xff]  ;;  %v293_v21 = vld [vmem:[%s4090_s6 + $0x90] sm:$0xff]  ;;  %v294_v22 = vld [vmem:[%s4090_s6 + $0x98] sm:$0xff] }
  0x88   : > { %v315_v20 = vpack.c.bf16 %v292_v19, %v291_v18  ;;  %v316_v23 = vpack.c.bf16 %v294_v22, %v293_v21  ;;  %v295_v24 = vld [vmem:[%s4090_s6 + $0xa0] sm:$0xff]  ;;  %v296_v25 = vld [vmem:[%s4090_s6 + $0xa8] sm:$0xff]  ;;  %v301_v33 = vld [vmem:[%s4090_s6 + $0xd0] sm:$0xff] }
  0x89   : > { %550 = vmatpush1.bf16.msra.mxu0 %v3159_v27  ;;  %743 = vmatpush1.bf16.msra.mxu1 %v3160_v28  ;;  %v317_v26 = vpack.c.bf16 %v296_v25, %v295_v24  ;;  %v297_v27 = vld [vmem:[%s4090_s6 + $0xb0] sm:$0xff]  ;;  %v298_v28 = vld [vmem:[%s4090_s6 + $0xb8] sm:$0xff] }
  0x8a   : > { %551 = vmatprep.subr.bf16.mxu0 %v3161_v29  ;;  %744 = vmatprep.subr.bf16.mxu1 %v3163_v30  ;;  %v318_v29 = vpack.c.bf16 %v298_v28, %v297_v27  ;;  %v299_v30 = vld [vmem:[%s4090_s6 + $0xc0] sm:$0xff]  ;;  %v302_v34 = vld [vmem:[%s4090_s6 + $0xd8] sm:$0xff]  ;;  %v305_v39 = vld [vmem:[%s4090_s6 + $0xf0] sm:$0xff] }
  0x8b   : > { %v3198_v49 = vld [vmem:[#allocation7 + $0xb8] sm:$0xff]  }
  0x8d   : > { %552 = vmatpush1.bf16.msra.mxu0 %v3165_v31  ;;  %745 = vmatpush1.bf16.msra.mxu1 %v3166_v32  ;;  %v300_v31 = vld [vmem:[%s4090_s6 + $0xc8] sm:$0xff] }
  0x8e   : > { %2819 = vmatprep.subr.bf16.mxu0 %v3167_v36  ;;  %2931 = vmatprep.subr.bf16.mxu1 %v3169_v40  ;;  %v319_v32 = vpack.c.bf16 %v300_v31, %v299_v30  ;;  %v303_v36 = vld [vmem:[%s4090_s6 + $0xe0] sm:$0xff]  ;;  %v306_v40 = vld [vmem:[%s4090_s6 + $0xf8] sm:$0xff] }
  0x90   : > { %570 = vmatmul.mubr.bf16.vlgmr.msra.gmra.mrb[0].mxu0 %v307_v35  ;;  %763 = vmatmul.mubr.bf16.vlgmr.msra.gmra.mrb[0].mxu1 %v307_v35  ;;  %v320_v35 = vpack.c.bf16 %v302_v34, %v301_v33 }
  0x91   : > { %579 = vmatprep.mubr.bf16.mxu0 %v3878_v0  ;;  %772 = vmatprep.mubr.bf16.mxu1 %v3878_v0 }
  0x92   : > { %2820 = vmatpush3.bf16.msra.mxu0 %v3168_v37  ;;  %2932 = vmatpush3.bf16.msra.mxu1 %v3170_v41  ;;  %v304_v37 = vld [vmem:[%s4090_s6 + $0xe8] sm:$0xff]  ;;  %v3191_v41 = vld [vmem:[#allocation7 + $0x70] sm:$0xff]  }
  0x93   : > { %2821 = vmatprep.subr.bf16.mxu0 %v3171_v42  ;;  %2933 = vmatprep.subr.bf16.mxu1 %v3173_v44  ;;  %v321_v38 = vpack.c.bf16 %v304_v37, %v303_v36  ;;  %v3193_v42 = vld [vmem:[#allocation7 + $0xf0] sm:$0xff]  }
  0x94   : > { %v3194_v44 = vld [vmem:[#allocation7 + $0xb0] sm:$0xff]  }
  0x96   : > { %2822 = vmatpush3.bf16.msra.mxu0 %v3172_v43  ;;  %2934 = vmatpush3.bf16.msra.mxu1 %v3174_v46  ;;  %v3192_v43 = vld [vmem:[#allocation7 + $0x30] sm:$0xff]   ;;  %v3195_v46 = vld [vmem:[#allocation7 + $0x78] sm:$0xff]  }
  0x97   : > { %2823 = vmatprep.subr.bf16.mxu0 %v3175_v47  ;;  %2935 = vmatprep.subr.bf16.mxu1 %v3177_v51  ;;  %v3197_v47 = vld [vmem:[#allocation7 + $0xf8] sm:$0xff]  }
  0x98   : > { %580 = vmatmul.mubr.bf16.gmra.mrb[4].mxu0 %v308_v45  ;;  %773 = vmatmul.mubr.bf16.gmra.mrb[4].mxu1 %v308_v45  ;;  %v322_v45 = vpack.c.bf16 %v306_v40, %v305_v39 }
  0x99   : > { %589 = vmatprep.mubr.bf16.mxu0 %v3878_v0  ;;  %782 = vmatprep.mubr.bf16.mxu1 %v3878_v0 }
  0x9a   : > { %2824 = vmatpush3.bf16.msra.mxu0 %v3176_v48  ;;  %2936 = vmatpush3.bf16.msra.mxu1 %v3178_v52  ;;  %v3196_v48 = vld [vmem:[#allocation7 + $0x38] sm:$0xff]  }
  0x9b   : > { %2825 = vmatprep.subr.bf16.mxu0 %v3179_v53  ;;  %2937 = vmatprep.subr.bf16.mxu1 %v3181_v55  ;;  %v355_v53 = vld [vmem:[%s5349_s2] sm:$0xf] }
  0x9e   : > { %2826 = vmatpush3.bf16.msra.mxu0 %v3180_v54  ;;  %2938 = vmatpush3.bf16.msra.mxu1 %v3182_v57 }
  0x9f   : > { %2827 = vmatprep.subr.bf16.mxu0 %v3183_v58  ;;  %2939 = vmatprep.subr.bf16.mxu1 %v3185_v62 }
  0xa0   : > { %590 = vmatmul.mubr.bf16.gmra.mrb[8].mxu0 %v309_v56  ;;  %783 = vmatmul.mubr.bf16.gmra.mrb[8].mxu1 %v309_v56 }
  0xa1   : > { %599 = vmatprep.mubr.bf16.mxu0 %v3878_v0  ;;  %792 = vmatprep.mubr.bf16.mxu1 %v3878_v0 }
  0xa2   : > { %2828 = vmatpush3.bf16.msra.mxu0 %v3184_v59  ;;  %2940 = vmatpush3.bf16.msra.mxu1 %v3186_v63 }
  0xa3   : > { %2829 = vmatprep.subr.bf16.mxu0 %v3187_v1  ;;  %2941 = vmatprep.subr.bf16.mxu1 %v3189_v3 }
  0xa6   : > { %2830 = vmatpush3.bf16.msra.mxu0 %v3188_v2  ;;  %2942 = vmatpush3.bf16.msra.mxu1 %v3190_v5 }
  0xa7   : > { %2831 = vmatprep.subr.bf16.mxu0 %v3191_v41  ;;  %2943 = vmatprep.subr.bf16.mxu1 %v3193_v42 }
  0xa8   : > { %600 = vmatmul.mubr.bf16.gmra.mrb[12].mxu0 %v310_v4  ;;  %793 = vmatmul.mubr.bf16.gmra.mrb[12].mxu1 %v310_v4 }
  0xa9   : > { %609 = vmatprep.mubr.bf16.mxu0 %v3878_v0  ;;  %802 = vmatprep.mubr.bf16.mxu1 %v3878_v0 }
  0xaa   : > { %2832 = vmatpush3.bf16.msra.mxu0 %v3192_v43  ;;  %2944 = vmatpush3.bf16.msra.mxu1 %v3194_v44 }
  0xab   : > { %2833 = vmatprep.subr.bf16.mxu0 %v3195_v46  ;;  %2945 = vmatprep.subr.bf16.mxu1 %v3197_v47 }
  0xae   : > { %2834 = vmatpush3.bf16.msra.mxu0 %v3196_v48  ;;  %2946 = vmatpush3.bf16.msra.mxu1 %v3198_v49 }
  0xb0   : > { %610 = vmatmul.mubr.bf16.gmra.mrb[16].mxu0 %v311_v8  ;;  %803 = vmatmul.mubr.bf16.gmra.mrb[16].mxu1 %v311_v8 }
  0xb1   : > { %619 = vmatprep.mubr.bf16.mxu0 %v3878_v0  ;;  %812 = vmatprep.mubr.bf16.mxu1 %v3878_v0 }
  0xb8   : > { %620 = vmatmul.mubr.bf16.gmra.mrb[20].mxu0 %v312_v11  ;;  %813 = vmatmul.mubr.bf16.gmra.mrb[20].mxu1 %v312_v11 }
  0xb9   : > { %629 = vmatprep.mubr.bf16.mxu0 %v3878_v0  ;;  %822 = vmatprep.mubr.bf16.mxu1 %v3878_v0 }
  0xc0   : > { %630 = vmatmul.mubr.bf16.gmra.mrb[24].mxu0 %v313_v14  ;;  %823 = vmatmul.mubr.bf16.gmra.mrb[24].mxu1 %v313_v14 }
  0xc1   : > { %639 = vmatprep.mubr.bf16.mxu0 %v3878_v0  ;;  %832 = vmatprep.mubr.bf16.mxu1 %v3878_v0 }
  0xc8   : > { %640 = vmatmul.mubr.bf16.gmra.mrb[28].mxu0 %v314_v17  ;;  %833 = vmatmul.mubr.bf16.gmra.mrb[28].mxu1 %v314_v17 }
  0xc9   : > { %649 = vmatprep.mubr.bf16.mxu0 %v3878_v0  ;;  %842 = vmatprep.mubr.bf16.mxu1 %v3878_v0 }
  0xd0   : > { %650 = vmatmul.mubr.bf16.gmra.mrb[32].mxu0 %v315_v20  ;;  %843 = vmatmul.mubr.bf16.gmra.mrb[32].mxu1 %v315_v20 }
  0xd1   : > { %659 = vmatprep.mubr.bf16.mxu0 %v3878_v0  ;;  %852 = vmatprep.mubr.bf16.mxu1 %v3878_v0 }
  0xd8   : > { %660 = vmatmul.mubr.bf16.gmra.mrb[36].mxu0 %v316_v23  ;;  %853 = vmatmul.mubr.bf16.gmra.mrb[36].mxu1 %v316_v23 }
  0xd9   : > { %669 = vmatprep.mubr.bf16.mxu0 %v3878_v0  ;;  %862 = vmatprep.mubr.bf16.mxu1 %v3878_v0 }
  0xe0   : > { %670 = vmatmul.mubr.bf16.gmra.mrb[40].mxu0 %v317_v26  ;;  %863 = vmatmul.mubr.bf16.gmra.mrb[40].mxu1 %v317_v26 }
  0xe1   : > { %679 = vmatprep.mubr.bf16.mxu0 %v3878_v0  ;;  %872 = vmatprep.mubr.bf16.mxu1 %v3878_v0 }
  0xe8   : > { %680 = vmatmul.mubr.bf16.gmra.mrb[44].mxu0 %v318_v29  ;;  %873 = vmatmul.mubr.bf16.gmra.mrb[44].mxu1 %v318_v29 }
  0xe9   : > { %689 = vmatprep.mubr.bf16.mxu0 %v3878_v0  ;;  %882 = vmatprep.mubr.bf16.mxu1 %v3878_v0 }
  0xf0   : > { %690 = vmatmul.mubr.bf16.gmra.mrb[48].mxu0 %v319_v32  ;;  %883 = vmatmul.mubr.bf16.gmra.mrb[48].mxu1 %v319_v32 }
  0xf1   : > { %699 = vmatprep.mubr.bf16.mxu0 %v3878_v0  ;;  %892 = vmatprep.mubr.bf16.mxu1 %v3878_v0 }
  0xf8   : > { %700 = vmatmul.mubr.bf16.gmra.mrb[52].mxu0 %v320_v35  ;;  %893 = vmatmul.mubr.bf16.gmra.mrb[52].mxu1 %v320_v35 }
  0xf9   : > { %709 = vmatprep.mubr.bf16.mxu0 %v3878_v0  ;;  %902 = vmatprep.mubr.bf16.mxu1 %v3878_v0 }
 0x100   : > { %710 = vmatmul.mubr.bf16.gmra.mrb[56].mxu0 %v321_v38  ;;  %903 = vmatmul.mubr.bf16.gmra.mrb[56].mxu1 %v321_v38 }
 0x101   : > { %719 = vmatprep.mubr.bf16.mxu0 %v3878_v0  ;;  %912 = vmatprep.mubr.bf16.mxu1 %v3878_v0  ;;  %v357_v0 = vlaneseq }
 0x103   : > { %v358_v50 = vshrl.u32 %v357_v0, 7 }
 0x105   : > { %v359_v51 = vsub.s32 0, %v358_v50  ;;  %v367_v52 = vsub.s32 2, %v358_v50  ;;  %v363_v54 = vsub.s32 1, %v358_v50  ;;  %v371_v55 = vsub.s32 3, %v358_v50 }
 0x107   : > { %v4167_v56 = vrot.slane %v355_v53, %v359_v51  ;;  %v4169_v57 = vrot.slane %v355_v53, %v367_v52  ;;  %v4171_v58 = vrot.slane %v355_v53, %v363_v54  ;;  %v4173_v59 = vrot.slane %v355_v53, %v371_v55 }
 0x108   : > { %720 = vmatmul.mubr.bf16.gmra.mrb[60].mxu0 %v322_v45  ;;  %913 = vmatmul.mubr.bf16.gmra.mrb[60].mxu1 %v322_v45 }
 0x163   : > { %v571_v60 = vpop.f32.mrb[0].mxu0  ;;  %v764_v61 = vpop.f32.mrb[0].mxu1 }
 0x164   : > { %v4176_v62 = vadd.f32 %v571_v60, %v4167_v56  ;;  %v4179_v63 = vadd.f32 %v764_v61, %v4169_v57  ;;  %v573_v1 = vpop.f32.mrb[1].mxu0  ;;  %v766_v2 = vpop.f32.mrb[1].mxu1 }
 0x165   : > { %v4182_v3 = vadd.f32 %v573_v1, %v4171_v58  ;;  %v4185_v4 = vadd.f32 %v766_v2, %v4173_v59  ;;  %v575_v5 = vpop.f32.mrb[2].mxu0  ;;  %v768_v6 = vpop.f32.mrb[2].mxu1 }
 0x166   : > { %v2651_v7 = vmul.f32 -1.442695, %v4176_v62  ;;  %v2653_v8 = vmul.f32 -1.442695, %v4179_v63  ;;  %v4190_v9 = vadd.f32 %v575_v5, %v4167_v56  ;;  %v4193_v10 = vadd.f32 %v768_v6, %v4169_v57  ;;  %v577_v11 = vpop.f32.mrb[3].mxu0  ;;  %v770_v12 = vpop.f32.mrb[3].mxu1 }
 0x167   : > { %v2652_v13 = vmul.f32 -1.442695, %v4182_v3  ;;  %v2654_v14 = vmul.f32 -1.442695, %v4185_v4  ;;  %v4198_v15 = vadd.f32 %v577_v11, %v4171_v58  ;;  %v4201_v16 = vadd.f32 %v770_v12, %v4173_v59 }
 0x168   : > { %3199 = vpow2.f32 %v2651_v7  ;;  %v2655_v17 = vmul.f32 -1.442695, %v4190_v9  ;;  %v2657_v18 = vmul.f32 -1.442695, %v4193_v10 }
 0x169   : > { %3201 = vpow2.f32 %v2653_v8  ;;  %v2656_v19 = vmul.f32 -1.442695, %v4198_v15  ;;  %v2658_v20 = vmul.f32 -1.442695, %v4201_v16 }
 0x16a   : > { %3203 = vpow2.f32 %v2652_v13 }
 0x16b   : > { %3205 = vpow2.f32 %v2654_v14  ;;  %v581_v21 = vpop.f32.mrb[4].mxu0  ;;  %v774_v22 = vpop.f32.mrb[4].mxu1 }
 0x16c   : > { %3207 = vpow2.f32 %v2655_v17  ;;  %v4208_v23 = vadd.f32 %v581_v21, %v4167_v56  ;;  %v4211_v24 = vadd.f32 %v774_v22, %v4169_v57  ;;  %v583_v25 = vpop.f32.mrb[5].mxu0  ;;  %v776_v26 = vpop.f32.mrb[5].mxu1 }
 0x16d   : > { %3209 = vpow2.f32 %v2657_v18  ;;  %v4214_v27 = vadd.f32 %v583_v25, %v4171_v58  ;;  %v4217_v28 = vadd.f32 %v776_v26, %v4173_v59  ;;  %v585_v29 = vpop.f32.mrb[6].mxu0  ;;  %v778_v30 = vpop.f32.mrb[6].mxu1 }
 0x16e   : > { %3211 = vpow2.f32 %v2656_v19  ;;  %v2659_v31 = vmul.f32 -1.442695, %v4208_v23  ;;  %v2661_v32 = vmul.f32 -1.442695, %v4211_v24  ;;  %v4222_v33 = vadd.f32 %v585_v29, %v4167_v56  ;;  %v587_v34 = vpop.f32.mrb[7].mxu0  ;;  %v780_v35 = vpop.f32.mrb[7].mxu1 }
 0x16f   : > { %3213 = vpow2.f32 %v2658_v20  ;;  %v2660_v36 = vmul.f32 -1.442695, %v4214_v27  ;;  %v2662_v37 = vmul.f32 -1.442695, %v4217_v28  ;;  %v4228_v6 = vadd.f32 %v778_v30, %v4169_v57 }
 0x170   : > { %3215 = vpow2.f32 %v2659_v31  ;;  %v2663_v38 = vmul.f32 -1.442695, %v4222_v33  ;;  %v4231_v13 = vadd.f32 %v587_v34, %v4171_v58  ;;  %v4234_v19 = vadd.f32 %v780_v35, %v4173_v59 }
 0x171   : > { %3217 = vpow2.f32 %v2661_v32  ;;  %v2665_v26 = vmul.f32 -1.442695, %v4228_v6 }
 0x172   : > { %v3200_v39 = vpop.eup %3199  ;;  %3219 = vpow2.f32 %v2660_v36 }
 0x173   : > { %v3202_v40 = vpop.eup %3201  ;;  %v1307_v41 = vadd.f32 1.0, %v3200_v39  ;;  %3221 = vpow2.f32 %v2662_v37  ;;  %v591_v42 = vpop.f32.mrb[8].mxu0 }
 0x174   : > { %v784_v43 = vpop.f32.mrb[8].mxu1  ;;  %v3204_v44 = vpop.eup %3203  ;;  %v1309_v45 = vadd.f32 1.0, %v3202_v40  ;;  %3223 = vpow2.f32 %v2663_v38  ;;  %v4240_v29 = vadd.f32 %v591_v42, %v4167_v56 }
 0x175   : > { %v593_v46 = vpop.f32.mrb[9].mxu0  ;;  %v786_v47 = vpop.f32.mrb[9].mxu1  ;;  %3225 = vrcp.f32 %v1307_v41  ;;  %v1308_v49 = vadd.f32 1.0, %v3204_v44  ;;  %v4247_v35 = vadd.f32 %v784_v43, %v4169_v57  ;;  %v2664_v41 = vmul.f32 -1.442695, %v4231_v13 }
 0x176   : > { %v3206_v48 = vpop.eup %3205  ;;  %v595_v0 = vpop.f32.mrb[10].mxu0  ;;  %3227 = vrcp.f32 %v1309_v45  ;;  %v4250_v36 = vadd.f32 %v593_v46, %v4171_v58  ;;  %v4258_v42 = vadd.f32 %v786_v47, %v4173_v59  ;;  %v2666_v43 = vmul.f32 -1.442695, %v4234_v19 }
 0x177   : > { %v788_v50 = vpop.f32.mrb[10].mxu1  ;;  %v3208_v51 = vpop.eup %3207  ;;  %v1310_v52 = vadd.f32 1.0, %v3206_v48  ;;  %3229 = vrcp.f32 %v1308_v49  ;;  %v4264_v46 = vadd.f32 %v595_v0, %v4167_v56  ;;  %v2667_v49 = vmul.f32 -1.442695, %v4240_v29 }
 0x178   : > { %v597_v53 = vpop.f32.mrb[11].mxu0  ;;  %v3210_v54 = vpop.eup %3209  ;;  %v1311_v55 = vadd.f32 1.0, %v3208_v51  ;;  %v2668_v47 = vmul.f32 -1.442695, %v4250_v36 }
 0x179   : > { %v790_v60 = vpop.f32.mrb[11].mxu1  ;;  %v3212_v61 = vpop.eup %3211  ;;  %3231 = vrcp.f32 %v1310_v52  ;;  %v1313_v1 = vadd.f32 1.0, %v3210_v54  ;;  %v2669_v52 = vmul.f32 -1.442695, %v4247_v35  ;;  %v4270_v54 = vadd.f32 %v788_v50, %v4169_v57 }
 0x17a   : > { %v3214_v2 = vpop.eup %3213  ;;  %3233 = vrcp.f32 %v1311_v55  ;;  %v1312_v5 = vadd.f32 1.0, %v3212_v61  ;;  %v2670_v61 = vmul.f32 -1.442695, %v4258_v42  ;;  %v4274_v0 = vadd.f32 %v597_v53, %v4171_v58 }
 0x17b   : > { %v3216_v7 = vpop.eup %3215  ;;  %3235 = vrcp.f32 %v1313_v1  ;;  %v1314_v8 = vadd.f32 1.0, %v3214_v2  ;;  %v601_v14 = vpop.f32.mrb[12].mxu0  ;;  %v4277_v1 = vadd.f32 %v790_v60, %v4173_v59 }
 0x17c   : > { %v3218_v11 = vpop.eup %3217  ;;  %3237 = vrcp.f32 %v1312_v5  ;;  %v1315_v12 = vadd.f32 1.0, %v3216_v7  ;;  %v794_v20 = vpop.f32.mrb[12].mxu1 }
 0x17d   : > { %v3220_v17 = vpop.eup %3219  ;;  %3239 = vrcp.f32 %v1314_v8  ;;  %v1317_v18 = vadd.f32 1.0, %v3218_v11  ;;  %v4236_v21 = vpop.f32.mrb[13].mxu0  ;;  %v2671_v11 = vmul.f32 -1.442695, %v4264_v46 }
 0x17e   : > { %v3222_v22 = vpop.eup %3221  ;;  %3241 = vrcp.f32 %v1315_v12  ;;  %v1316_v25 = vadd.f32 1.0, %v3220_v17  ;;  %v4242_v30 = vpop.f32.mrb[13].mxu1 }
 0x17f   : > { %v4244_v31 = vpop.f32.mrb[14].mxu0  ;;  %v3224_v32 = vpop.eup %3223  ;;  %3243 = vrcp.f32 %v1317_v18  ;;  %v1318_v34 = vadd.f32 1.0, %v3222_v22  ;;  %v4297_v22 = vadd.f32 %v601_v14, %v4167_v56 }
 0x180   : > { %v4252_v37 = vpop.f32.mrb[14].mxu1  ;;  %v4254_v38 = vpop.f32.mrb[15].mxu0  ;;  %3245 = vrcp.f32 %v1316_v25  ;;  %v1319_v40 = vadd.f32 1.0, %v3224_v32  ;;  %v2673_v32 = vmul.f32 -1.442695, %v4270_v54 }
 0x181   : > { %v3226_v39 = vpop.eup %3225  ;;  %v4260_v44 = vpop.f32.mrb[15].mxu1  ;;  %3247 = vrcp.f32 %v1318_v34  ;;  %5369 = vst [vmem:[#allocation12_spill] sm:$0xff] %v4297_v22  ;;  %v4307_v34 = vadd.f32 %v794_v20, %v4169_v57 }
 0x182   : > { %v3228_v45 = vpop.eup %3227  ;;  %3249 = vrcp.f32 %v1319_v40  ;;  %v4284_v8 = vmul.f32 %v3226_v39, %v4176_v62  ;;  %v2672_v40 = vmul.f32 -1.442695, %v4274_v0 }
 0x183   : > { %v3230_v48 = vpop.eup %3229  ;;  %3251 = vpow2.f32 %v2665_v26  ;;  %v4279_v2 = vpop.f32.mrb[16].mxu0  ;;  %v1693_v17 = vmul.f32 %v3228_v45, %v4179_v63  ;;  %5370 = vst [vmem:[#allocation13_spill] sm:$0xff] %v4307_v34  ;;  %v2674_v45 = vmul.f32 -1.442695, %v4277_v1 }
 0x184   : > { %v3232_v51 = vpop.eup %3231  ;;  %3253 = vpow2.f32 %v2664_v41  ;;  %v4281_v5 = vpop.f32.mrb[16].mxu1 }
 0x185   : > { %v3234_v55 = vpop.eup %3233  ;;  %3255 = vpow2.f32 %v2666_v43  ;;  %v4290_v12 = vpop.f32.mrb[17].mxu0 }
 0x186   : > { %v3236_v7 = vpop.eup %3235  ;;  %v4287_v50 = vmul.f32 %v3234_v55, %v4190_v9  ;;  %v4292_v53 = vpop.f32.mrb[17].mxu1  ;;  %3257 = vpow2.f32 %v2667_v49 }
 0x187   : > { %v3238_v60 = vpop.eup %3237  ;;  %v1697_v18 = vmul.f32 %v3236_v7, %v4193_v10  ;;  %v4299_v62 = vpop.f32.mrb[18].mxu0  ;;  %3259 = vpow2.f32 %v2669_v52  ;;  %v2675_v52 = vmul.f32 -1.442695, %v4297_v22 }
 0x188   : > { %v4301_v9 = vpop.f32.mrb[18].mxu1  ;;  %v3240_v25 = vpop.eup %3239  ;;  %v1819_v26 = vpack.c.bf16 %v4287_v50, %v4284_v8  ;;  %3261 = vpow2.f32 %v2668_v47  ;;  %v1696_v20 = vmul.f32 %v3238_v60, %v4198_v15  ;;  %v2677_v47 = vmul.f32 -1.442695, %v4307_v34 }
 0x189   : > { %v4309_v63 = vpop.f32.mrb[19].mxu0  ;;  %v4311_v10 = vpop.f32.mrb[19].mxu1  ;;  %v1821_v39 = vpack.c.bf16 %v1697_v18, %v1693_v17  ;;  %3263 = vpow2.f32 %v2670_v61  ;;  %v1698_v49 = vmul.f32 %v3240_v25, %v4201_v16  ;;  %v1692_v8 = vmul.f32 %v3230_v48, %v4182_v3 }
 0x18a   : > { %v4313_v14 = vpop.eup %3241  ;;  %3265 = vpow2.f32 %v2671_v11  ;;  %v1694_v61 = vmul.f32 %v3232_v51, %v4185_v4 }
 0x18b   : > { %v4316_v41 = vpop.eup %3243  ;;  %3267 = vpow2.f32 %v2673_v32  ;;  %v4329_v50 = vpop.f32.mrb[20].mxu0  ;;  %v1820_v25 = vpack.c.bf16 %v1696_v20, %v1692_v8  ;;  %v4351_v8 = vadd.f32 %v4242_v30, %v4173_v59 }
 0x18c   : > { %v4319_v43 = vpop.eup %3245  ;;  %3269 = vpow2.f32 %v2672_v40  ;;  %v4331_v17 = vpop.f32.mrb[20].mxu1  ;;  %v1822_v32 = vpack.c.bf16 %v1698_v49, %v1694_v61 }
 0x18d   : > { %v4324_v55 = vpop.eup %3247  ;;  %3271 = vpow2.f32 %v2674_v45  ;;  %v4333_v16 = vpop.f32.mrb[21].mxu0  ;;  %2178 = vmatprep.mubr.bf16.mxu0 %v1820_v25 }
 0x18e   : > { %v3250_v7 = vpop.eup %3249  ;;  %v4335_v11 = vpop.f32.mrb[21].mxu1  ;;  %3273 = vpow2.f32 %v2675_v52  ;;  %2339 = vmatprep.mubr.bf16.mxu1 %v1822_v32  ;;  %2179 = vmatmul.mubr.bf16.vlgmr.msra.gmra.mrb[64].mxu0 %v1819_v26  ;;  %v4358_v26 = vadd.f32 %v4244_v31, %v4167_v56  ;;  %v4374_v31 = vadd.f32 %v4254_v38, %v4171_v58 }
 0x18f   : > { %v3252_v15 = vpop.eup %3251  ;;  %v4337_v34 = vpop.f32.mrb[22].mxu0  ;;  %3275 = vpow2.f32 %v2677_v47  ;;  %2340 = vmatmul.mubr.bf16.vlgmr.msra.gmra.mrb[64].mxu1 %v1821_v39  ;;  %v4347_v47 = vadd.f32 %v4236_v21, %v4171_v58  ;;  %v4362_v21 = vadd.f32 %v4252_v37, %v4169_v57 }
 0x190   : > { %v3254_v60 = vpop.eup %3253  ;;  %v1321_v18 = vadd.f32 1.0, %v3252_v15  ;;  %v4339_v3 = vpop.f32.mrb[22].mxu1 }
 0x191   : > { %v3256_v4 = vpop.eup %3255  ;;  %v1320_v48 = vadd.f32 1.0, %v3254_v60  ;;  %v4341_v51 = vpop.f32.mrb[23].mxu0  ;;  %v4354_v60 = vmul.f32 %v3250_v7, %v4222_v33  ;;  %v4370_v33 = vmul.f32 %v4313_v14, %v4208_v23 }
 0x192   : > { %v4343_v40 = vpop.f32.mrb[23].mxu1  ;;  %v3258_v45 = vpop.eup %3257  ;;  %3277 = vrcp.f32 %v1321_v18  ;;  %v1322_v22 = vadd.f32 1.0, %v3256_v4 }
 0x193   : > { %v3260_v15 = vpop.eup %3259  ;;  %3279 = vrcp.f32 %v1320_v48  ;;  %v1323_v20 = vadd.f32 1.0, %v3258_v45  ;;  %v4364_v25 = vpop.f32.mrb[24].mxu0  ;;  %v1823_v38 = vpack.c.bf16 %v4354_v60, %v4370_v33  ;;  %v2680_v60 = vmul.f32 -1.442695, %v4374_v31 }
 0x194   : > { %v3262_v49 = vpop.eup %3261  ;;  %3281 = vrcp.f32 %v1322_v22  ;;  %v1325_v52 = vadd.f32 1.0, %v3260_v15  ;;  %v4366_v30 = vpop.f32.mrb[24].mxu1  ;;  %v2676_v15 = vmul.f32 -1.442695, %v4347_v47  ;;  %v4401_v33 = vadd.f32 %v4279_v2, %v4167_v56 }
 0x195   : > { %v3264_v61 = vpop.eup %3263  ;;  %3283 = vrcp.f32 %v1323_v20  ;;  %v1324_v18 = vadd.f32 1.0, %v3262_v49  ;;  %v4376_v4 = vpop.f32.mrb[25].mxu0  ;;  %v2678_v20 = vmul.f32 -1.442695, %v4351_v8  ;;  %v4416_v2 = vadd.f32 %v4292_v53, %v4173_v59 }
 0x196   : > { %v3266_v22 = vpop.eup %3265  ;;  %3285 = vrcp.f32 %v1325_v52  ;;  %v1326_v39 = vadd.f32 1.0, %v3264_v61  ;;  %v4378_v48 = vpop.f32.mrb[25].mxu1  ;;  %v2679_v52 = vmul.f32 -1.442695, %v4358_v26  ;;  %v1702_v53 = vmul.f32 %v4324_v55, %v4217_v28 }
 0x197   : > { %v3268_v32 = vpop.eup %3267  ;;  %3287 = vrcp.f32 %v1324_v18  ;;  %v1327_v7 = vadd.f32 1.0, %v3266_v22  ;;  %5371 = vst [vmem:[#allocation14_spill] sm:$0xff] %v4378_v48  ;;  %v4382_v49 = vpop.f32.mrb[26].mxu0  ;;  %5376 = vst [vmem:[#allocation19_spill] sm:$0xff] %v4416_v2  ;;  %v2683_v55 = vmul.f32 -1.442695, %v4401_v33 }
 0x198   : > { %v3270_v37 = vpop.eup %3269  ;;  %3289 = vrcp.f32 %v1326_v39  ;;  %v1329_v45 = vadd.f32 1.0, %v3268_v32  ;;  %5372 = vst [vmem:[#allocation15_spill] sm:$0xff] %v4382_v49  ;;  %v4387_v61 = vpop.f32.mrb[26].mxu1  ;;  %v2681_v32 = vmul.f32 -1.442695, %v4362_v21  ;;  %v4394_v49 = vadd.f32 %v4260_v44, %v4173_v59 }
 0x199   : > { %v3272_v23 = vpop.eup %3271  ;;  %3291 = vrcp.f32 %v1327_v7  ;;  %v1328_v14 = vadd.f32 1.0, %v3270_v37  ;;  %5373 = vst [vmem:[#allocation16_spill] sm:$0xff] %v4387_v61  ;;  %v4389_v18 = vpop.f32.mrb[27].mxu0  ;;  %v4409_v44 = vadd.f32 %v4290_v12, %v4171_v58  ;;  %v4423_v12 = vadd.f32 %v4299_v62, %v4167_v56 }
 0x19a   : > { %5374 = vst [vmem:[#allocation17_spill] sm:$0xff] %v4389_v18  ;;  %v3274_v22 = vpop.eup %3273  ;;  %3293 = vrcp.f32 %v1329_v45  ;;  %v1330_v39 = vadd.f32 1.0, %v3272_v23  ;;  %v4396_v7 = vpop.f32.mrb[27].mxu1  ;;  %v4405_v23 = vadd.f32 %v4281_v5, %v4169_v57  ;;  %v1700_v5 = vmul.f32 %v4319_v43, %v4214_v27 }
 0x19b   : > { %5375 = vst [vmem:[#allocation18_spill] sm:$0xff] %v4396_v7  ;;  %v3276_v37 = vpop.eup %3275  ;;  %3295 = vrcp.f32 %v1328_v14  ;;  %v1331_v48 = vadd.f32 1.0, %v3274_v22  ;;  %v1701_v14 = vmul.f32 %v4316_v41, %v4211_v24  ;;  %v4425_v61 = vpop.f32.mrb[28].mxu0  ;;  %v2682_v62 = vmul.f32 -1.442695, %v4394_v49 }
 0x19c   : > { %v3278_v18 = vpop.eup %3277  ;;  %3297 = vrcp.f32 %v1330_v39  ;;  %v1333_v45 = vadd.f32 1.0, %v3276_v37  ;;  %v4427_v24 = vpop.f32.mrb[28].mxu1 }
 0x19d   : > { %v3280_v7 = vpop.eup %3279  ;;  %v1705_v22 = vmul.f32 %v3278_v18, %v4228_v6  ;;  %3299 = vrcp.f32 %v1331_v48  ;;  %v4432_v27 = vpop.f32.mrb[29].mxu0  ;;  %v4439_v18 = vadd.f32 %v4301_v9, %v4169_v57 }
 0x19e   : > { %v3282_v39 = vpop.eup %3281  ;;  %v1704_v37 = vmul.f32 %v3280_v7, %v4231_v13  ;;  %3301 = vrcp.f32 %v1333_v45  ;;  %v4434_v13 = vpop.f32.mrb[29].mxu1 }
 0x19f   : > { %v3284_v6 = vpop.eup %3283  ;;  %v1706_v41 = vmul.f32 %v3282_v39, %v4234_v19  ;;  %3303 = vpow2.f32 %v2676_v15  ;;  %v1825_v48 = vpack.c.bf16 %v1705_v22, %v1701_v14  ;;  %v4441_v45 = vpop.f32.mrb[30].mxu0  ;;  %v4448_v15 = vadd.f32 %v4309_v63, %v4171_v58 }
 0x1a0   : > { %v3286_v43 = vpop.eup %3285  ;;  %3305 = vpow2.f32 %v2678_v20  ;;  %v1824_v7 = vpack.c.bf16 %v1704_v37, %v1700_v5  ;;  %v4443_v28 = vpop.f32.mrb[30].mxu1  ;;  %v2685_v39 = vmul.f32 -1.442695, %v4405_v23  ;;  %v2686_v37 = vmul.f32 -1.442695, %v4416_v2 }
 0x1a1   : > { %5377 = vst [vmem:[#allocation20_spill] sm:$0xff] %v4443_v28  ;;  %v3288_v19 = vpop.eup %3287  ;;  %3307 = vpow2.f32 %v2679_v52  ;;  %v1826_v20 = vpack.c.bf16 %v1706_v41, %v1702_v53  ;;  %v4450_v14 = vpop.f32.mrb[31].mxu0  ;;  %v2684_v52 = vmul.f32 -1.442695, %v4409_v44  ;;  %v2687_v28 = vmul.f32 -1.442695, %v4423_v12 }
 0x1a2   : > { %5378 = vst [vmem:[#allocation21_spill] sm:$0xff] %v4450_v14  ;;  %v4452_v22 = vpop.f32.mrb[31].mxu1  ;;  %v3290_v9 = vpop.eup %3289  ;;  %3309 = vpow2.f32 %v2681_v32  ;;  %2186 = vmatprep.mubr.bf16.mxu0 %v1824_v7  ;;  %v1707_v53 = vmul.f32 %v3284_v6, %v4240_v29  ;;  %v2689_v32 = vmul.f32 -1.442695, %v4439_v18  ;;  %v2688_v14 = vmul.f32 -1.442695, %v4448_v15 }
 0x1a3   : > { %5379 = vst [vmem:[#allocation22_spill] sm:$0xff] %v4452_v22  ;;  %v3292_v5 = vpop.eup %3291  ;;  %3311 = vpow2.f32 %v2680_v60  ;;  %2347 = vmatprep.mubr.bf16.mxu1 %v1826_v20  ;;  %2187 = vmatmul.mubr.bf16.gmra.mrb[68].mxu0 %v1823_v38  ;;  %v1709_v60 = vmul.f32 %v3286_v43, %v4247_v35  ;;  %v1708_v38 = vmul.f32 %v3288_v19, %v4250_v36  ;;  %v4468_v6 = vpop.f32.mrb[32].mxu1 }
 0x1a4   : > { %v3294_v63 = vpop.eup %3293  ;;  %v1711_v41 = vmul.f32 %v3292_v5, %v4264_v46  ;;  %3313 = vpow2.f32 %v2682_v62  ;;  %2348 = vmatmul.mubr.bf16.gmra.mrb[68].mxu1 %v1825_v48  ;;  %v4466_v46 = vpop.f32.mrb[32].mxu0  ;;  %v1710_v35 = vmul.f32 %v3290_v9, %v4258_v42 }
 0x1a5   : > { %v3296_v7 = vpop.eup %3295  ;;  %v1713_v22 = vmul.f32 %v3294_v63, %v4270_v54  ;;  %3315 = vpow2.f32 %v2683_v55  ;;  %v4474_v62 = vpop.f32.mrb[33].mxu0 }
 0x1a6   : > { %v3298_v2 = vpop.eup %3297  ;;  %v1712_v20 = vmul.f32 %v3296_v7, %v4274_v0  ;;  %3317 = vpow2.f32 %v2685_v39  ;;  %v1827_v29 = vpack.c.bf16 %v1711_v41, %v1707_v53  ;;  %v4476_v55 = vpop.f32.mrb[33].mxu1 }
 0x1a7   : > { %v4470_v48 = vpop.eup %3299  ;;  %v1714_v54 = vmul.f32 %v3298_v2, %v4277_v1  ;;  %3319 = vpow2.f32 %v2684_v52  ;;  %v1829_v43 = vpack.c.bf16 %v1713_v22, %v1709_v60  ;;  %v4480_v19 = vpop.f32.mrb[34].mxu0 }
 0x1a8   : > { %v4478_v36 = vpop.eup %3301  ;;  %3321 = vpow2.f32 %v2686_v37  ;;  %v1828_v0 = vpack.c.bf16 %v1712_v20, %v1708_v38  ;;  %v4482_v39 = vpop.f32.mrb[34].mxu1  ;;  %v4490_v38 = vadd.f32 %v4311_v10, %v4173_v59 }
 0x1a9   : > { %v3304_v5 = vpop.eup %3303  ;;  %3323 = vpow2.f32 %v2687_v28  ;;  %v1830_v63 = vpack.c.bf16 %v1714_v54, %v1710_v35  ;;  %v4484_v42 = vpop.f32.mrb[35].mxu0 }
 0x1aa   : > { %v4486_v1 = vpop.f32.mrb[35].mxu1  ;;  %v3306_v2 = vpop.eup %3305  ;;  %v1332_v22 = vadd.f32 1.0, %v3304_v5  ;;  %3325 = vpow2.f32 %v2689_v32  ;;  %2194 = vmatprep.mubr.bf16.mxu0 %v1828_v0 }
 0x1ab   : > { %5380 = vst [vmem:[#allocation23_spill] sm:$0xff] %v4486_v1  ;;  %v3308_v9 = vpop.eup %3307  ;;  %v1334_v52 = vadd.f32 1.0, %v3306_v2  ;;  %3327 = vpow2.f32 %v2688_v14  ;;  %2355 = vmatprep.mubr.bf16.mxu1 %v1830_v63  ;;  %2195 = vmatmul.mubr.bf16.gmra.mrb[72].mxu0 %v1827_v29  ;;  %v4492_v32 = vpop.f32.mrb[36].mxu0  ;;  %v5398_v1 = vld [vmem:[#allocation13_spill] sm:$0xff] }
 0x1ac   : > { %v3310_v37 = vpop.eup %3309  ;;  %3329 = vrcp.f32 %v1332_v22  ;;  %v1335_v53 = vadd.f32 1.0, %v3308_v9  ;;  %2356 = vmatmul.mubr.bf16.gmra.mrb[72].mxu1 %v1829_v43  ;;  %5381 = vst [vmem:[#allocation24_spill] sm:$0xff] %v4492_v32  ;;  %v4494_v20 = vpop.f32.mrb[36].mxu1  ;;  %v4506_v22 = vadd.f32 %v4329_v50, %v4167_v56  ;;  %v4510_v9 = vadd.f32 %v4331_v17, %v4169_v57 }
 0x1ad   : > { %v3312_v41 = vpop.eup %3311  ;;  %3331 = vrcp.f32 %v1334_v52  ;;  %v1337_v28 = vadd.f32 1.0, %v3310_v37  ;;  %5382 = vst [vmem:[#allocation25_spill] sm:$0xff] %v4494_v20  ;;  %v4496_v35 = vpop.f32.mrb[37].mxu0  ;;  %v4523_v17 = vadd.f32 %v4335_v11, %v4173_v59 }
 0x1ae   : > { %v3314_v7 = vpop.eup %3313  ;;  %3333 = vrcp.f32 %v1335_v53  ;;  %v1336_v60 = vadd.f32 1.0, %v3312_v41  ;;  %5383 = vst [vmem:[#allocation26_spill] sm:$0xff] %v4496_v35  ;;  %v4498_v54 = vpop.f32.mrb[37].mxu1  ;;  %v2690_v41 = vmul.f32 -1.442695, %v4490_v38  ;;  %v5395_v35 = vld [vmem:[#allocation12_spill] sm:$0xff] }
 0x1af   : > { %v3316_v14 = vpop.eup %3315  ;;  %3335 = vrcp.f32 %v1337_v28  ;;  %v1338_v29 = vadd.f32 1.0, %v3314_v7  ;;  %5384 = vst [vmem:[#allocation27_spill] sm:$0xff] %v4498_v54  ;;  %v4500_v5 = vpop.f32.mrb[38].mxu0  ;;  %v4517_v28 = vadd.f32 %v4333_v16, %v4171_v58  ;;  %v4531_v16 = vadd.f32 %v4339_v3, %v4169_v57 }
 0x1b0   : > { %v3318_v43 = vpop.eup %3317  ;;  %3337 = vrcp.f32 %v1336_v60  ;;  %v1339_v0 = vadd.f32 1.0, %v3316_v14  ;;  %5385 = vst [vmem:[#allocation28_spill] sm:$0xff] %v4500_v5  ;;  %v4502_v63 = vpop.f32.mrb[38].mxu1  ;;  %v4527_v14 = vadd.f32 %v4337_v34, %v4167_v56  ;;  %v2691_v11 = vmul.f32 -1.442695, %v4506_v22 }
 0x1b1   : > { %5386 = vst [vmem:[#allocation29_spill] sm:$0xff] %v4502_v63  ;;  %v3320_v10 = vpop.eup %3319  ;;  %3339 = vrcp.f32 %v1338_v29  ;;  %v1341_v2 = vadd.f32 1.0, %v3318_v43  ;;  %v4512_v52 = vpop.f32.mrb[39].mxu0 }
 0x1b2   : > { %5387 = vst [vmem:[#allocation30_spill] sm:$0xff] %v4512_v52  ;;  %v3322_v37 = vpop.eup %3321  ;;  %3341 = vrcp.f32 %v1339_v0  ;;  %v1340_v53 = vadd.f32 1.0, %v3320_v10  ;;  %v4519_v7 = vpop.f32.mrb[39].mxu1  ;;  %v4535_v0 = vadd.f32 %v4341_v51, %v4171_v58  ;;  %v2694_v51 = vmul.f32 -1.442695, %v4523_v17 }
 0x1b3   : > { %5388 = vst [vmem:[#allocation31_spill] sm:$0xff] %v4519_v7  ;;  %v3324_v60 = vpop.eup %3323  ;;  %3343 = vrcp.f32 %v1341_v2  ;;  %v1342_v50 = vadd.f32 1.0, %v3322_v37  ;;  %v2693_v37 = vmul.f32 -1.442695, %v4510_v9  ;;  %v4542_v3 = vpop.f32.mrb[40].mxu1 }
 0x1b4   : > { %v3326_v29 = vpop.eup %3325  ;;  %3345 = vrcp.f32 %v1340_v53  ;;  %v1343_v43 = vadd.f32 1.0, %v3324_v60  ;;  %v2692_v53 = vmul.f32 -1.442695, %v4517_v28  ;;  %v4540_v60 = vpop.f32.mrb[40].mxu0  ;;  %5390 = vst [vmem:[#allocation33_spill] sm:$0xff] %v4542_v3 }
 0x1b5   : > { %v3328_v10 = vpop.eup %3327  ;;  %3347 = vrcp.f32 %v1342_v50  ;;  %v1345_v2 = vadd.f32 1.0, %v3326_v29  ;;  %5389 = vst [vmem:[#allocation32_spill] sm:$0xff] %v4540_v60  ;;  %v2695_v50 = vmul.f32 -1.442695, %v4527_v14  ;;  %v4548_v29 = vadd.f32 %v4343_v40, %v4173_v59  ;;  %v4550_v63 = vpop.f32.mrb[41].mxu0 }
 0x1b6   : > { %v3330_v34 = vpop.eup %3329  ;;  %3349 = vrcp.f32 %v1343_v43  ;;  %v1344_v7 = vadd.f32 1.0, %v3328_v10  ;;  %5391 = vst [vmem:[#allocation34_spill] sm:$0xff] %v4550_v63  ;;  %v4552_v43 = vpop.f32.mrb[41].mxu1  ;;  %v2697_v60 = vmul.f32 -1.442695, %v4531_v16  ;;  %v1715_v63 = vmul.f32 %v4470_v48, %v5395_v35 }
 0x1b7   : > { %v3332_v52 = vpop.eup %3331  ;;  %3351 = vrcp.f32 %v1345_v2  ;;  %5392 = vst [vmem:[#allocation35_spill] sm:$0xff] %v4552_v43  ;;  %v2696_v3 = vmul.f32 -1.442695, %v4535_v0  ;;  %v4558_v2 = vadd.f32 %v4364_v25, %v4167_v56  ;;  %v4560_v5 = vpop.f32.mrb[42].mxu0  ;;  %v4580_v48 = vadd.f32 %v4376_v4, %v4171_v58  ;;  %v5399_v4 = vld [vmem:[#allocation14_spill] sm:$0xff] }
 0x1b8   : > { %v3334_v10 = vpop.eup %3333  ;;  %3353 = vrcp.f32 %v1344_v7  ;;  %5393 = vst [vmem:[#allocation36_spill] sm:$0xff] %v4560_v5  ;;  %v4562_v54 = vpop.f32.mrb[42].mxu1  ;;  %v4569_v7 = vadd.f32 %v4366_v30, %v4169_v57  ;;  %v1717_v5 = vmul.f32 %v4478_v36, %v5398_v1  ;;  %v1716_v35 = vmul.f32 %v3330_v34, %v4347_v47 }
 0x1b9   : > { %5394 = vst [vmem:[#allocation37_spill] sm:$0xff] %v4562_v54  ;;  %v3336_v40 = vpop.eup %3335  ;;  %v1719_v43 = vmul.f32 %v3334_v10, %v4358_v26  ;;  %3355 = vpow2.f32 %v2690_v41  ;;  %v4571_v20 = vpop.f32.mrb[43].mxu0  ;;  %v2698_v1 = vmul.f32 -1.442695, %v4548_v29 }
 0x1ba   : > { %5396 = vst [vmem:[#allocation12_spill] sm:$0xff] %v4571_v20  ;;  %v4573_v32 = vpop.f32.mrb[43].mxu1  ;;  %v3338_v25 = vpop.eup %3337  ;;  %v1721_v54 = vmul.f32 %v3336_v40, %v4362_v21  ;;  %3357 = vpow2.f32 %v2691_v11  ;;  %v4589_v11 = vadd.f32 %v5399_v4, %v4173_v59 }
 0x1bb   : > { %5397 = vst [vmem:[#allocation38_spill] sm:$0xff] %v4573_v32  ;;  %v3340_v26 = vpop.eup %3339  ;;  %v1720_v30 = vmul.f32 %v3338_v25, %v4374_v31  ;;  %3359 = vpow2.f32 %v2693_v37  ;;  %v1831_v41 = vpack.c.bf16 %v1719_v43, %v1715_v63  ;;  %v1718_v32 = vmul.f32 %v3332_v52, %v4351_v8  ;;  %v4592_v37 = vpop.f32.mrb[44].mxu0 }
 0x1bc   : > { %v3342_v10 = vpop.eup %3341  ;;  %v1722_v20 = vmul.f32 %v3340_v26, %v4394_v49  ;;  %3361 = vpow2.f32 %v2692_v53  ;;  %v1833_v36 = vpack.c.bf16 %v1721_v54, %v1717_v5  ;;  %v2699_v31 = vmul.f32 -1.442695, %v4558_v2  ;;  %v4594_v8 = vpop.f32.mrb[44].mxu1 }
 0x1bd   : > { %v3344_v21 = vpop.eup %3343  ;;  %3363 = vpow2.f32 %v2694_v51  ;;  %v1832_v47 = vpack.c.bf16 %v1720_v30, %v1716_v35  ;;  %v2701_v54 = vmul.f32 -1.442695, %v4569_v7  ;;  %v4599_v5 = vpop.f32.mrb[45].mxu0  ;;  %v2700_v51 = vmul.f32 -1.442695, %v4580_v48 }
 0x1be   : > { %v3346_v34 = vpop.eup %3345  ;;  %3365 = vpow2.f32 %v2695_v50  ;;  %v1834_v63 = vpack.c.bf16 %v1722_v20, %v1718_v32  ;;  %v4601_v52 = vpop.f32.mrb[45].mxu1  ;;  %v2702_v40 = vmul.f32 -1.442695, %v4589_v11  ;;  %v4616_v35 = vmul.f32 %v3344_v21, %v4405_v23 }
 0x1bf   : > { %v4596_v49 = vpop.eup %3347  ;;  %3367 = vpow2.f32 %v2697_v60  ;;  %2202 = vmatprep.mubr.bf16.mxu0 %v1832_v47  ;;  %v4604_v32 = vpop.f32.mrb[46].mxu0  ;;  %v1723_v60 = vmul.f32 %v3342_v10, %v4401_v33  ;;  %v1724_v33 = vmul.f32 %v3346_v34, %v4409_v44 }
 0x1c0   : > { %v3350_v53 = vpop.eup %3349  ;;  %3369 = vpow2.f32 %v2696_v3  ;;  %2363 = vmatprep.mubr.bf16.mxu1 %v1834_v63  ;;  %2203 = vmatmul.mubr.bf16.gmra.mrb[76].mxu0 %v1831_v41  ;;  %v4606_v20 = vpop.f32.mrb[46].mxu1 }
 0x1c1   : > { %v3352_v50 = vpop.eup %3351  ;;  %v1727_v43 = vmul.f32 %v3350_v53, %v4423_v12  ;;  %3371 = vpow2.f32 %v2698_v1  ;;  %2364 = vmatmul.mubr.bf16.gmra.mrb[76].mxu1 %v1833_v36  ;;  %v4611_v25 = vpop.f32.mrb[47].mxu0 }
 0x1c2   : > { %5400 = vst [vmem:[#allocation13_spill] sm:$0xff] %v4611_v25  ;;  %v4613_v3 = vpop.f32.mrb[47].mxu1  ;;  %v3354_v26 = vpop.eup %3353  ;;  %v4619_v30 = vmul.f32 %v3352_v50, %v4439_v18  ;;  %3373 = vpow2.f32 %v2699_v31 }
 0x1c3   : > { %5401 = vst [vmem:[#allocation14_spill] sm:$0xff] %v4613_v3  ;;  %v3356_v41 = vpop.eup %3355  ;;  %v1728_v12 = vmul.f32 %v3354_v26, %v4448_v15  ;;  %3375 = vpow2.f32 %v2701_v54  ;;  %v1835_v10 = vpack.c.bf16 %v1727_v43, %v1723_v60  ;;  %v4625_v63 = vpop.f32.mrb[48].mxu0  ;;  %v5406_v60 = vld [vmem:[#allocation15_spill] sm:$0xff] }
 0x1c4   : > { %v3358_v36 = vpop.eup %3357  ;;  %v1346_v1 = vadd.f32 1.0, %v3356_v41  ;;  %3377 = vpow2.f32 %v2700_v51  ;;  %5402 = vst [vmem:[#allocation39_spill] sm:$0xff] %v4625_v63  ;;  %v4627_v44 = vpop.f32.mrb[48].mxu1  ;;  %v4635_v43 = vadd.f32 %v5406_v60, %v4167_v56 }
 0x1c5   : > { %v3360_v47 = vpop.eup %3359  ;;  %v1347_v23 = vadd.f32 1.0, %v3358_v36  ;;  %3379 = vpow2.f32 %v2702_v40  ;;  %v1836_v21 = vpack.c.bf16 %v1728_v12, %v1724_v33  ;;  %5403 = vst [vmem:[#allocation40_spill] sm:$0xff] %v4627_v44  ;;  %v4629_v54 = vpop.f32.mrb[49].mxu0  ;;  %v5408_v33 = vld [vmem:[#allocation16_spill] sm:$0xff]  ;;  %v5409_v36 = vld [vmem:[#allocation17_spill] sm:$0xff]  ;;  %v5425_v44 = vld [vmem:[#allocation22_spill] sm:$0xff] }
 0x1c6   : > { %v3362_v18 = vpop.eup %3361  ;;  %3381 = vrcp.f32 %v1346_v1  ;;  %v1349_v31 = vadd.f32 1.0, %v3360_v47  ;;  %5404 = vst [vmem:[#allocation41_spill] sm:$0xff] %v4629_v54  ;;  %v4631_v53 = vpop.f32.mrb[49].mxu1  ;;  %v4641_v12 = vadd.f32 %v5408_v33, %v4169_v57  ;;  %v4645_v1 = vadd.f32 %v5409_v36, %v4171_v58 }
 0x1c7   : > { %v3364_v15 = vpop.eup %3363  ;;  %3383 = vrcp.f32 %v1347_v23  ;;  %v1348_v34 = vadd.f32 1.0, %v3362_v18  ;;  %2210 = vmatprep.mubr.bf16.mxu0 %v1836_v21  ;;  %5405 = vst [vmem:[#allocation42_spill] sm:$0xff] %v4631_v53  ;;  %v4637_v40 = vpop.f32.mrb[50].mxu0  ;;  %v2703_v60 = vmul.f32 -1.442695, %v4635_v43  ;;  %v4716_v63 = vadd.f32 %v5425_v44, %v4173_v59 }
 0x1c8   : > { %v3366_v51 = vpop.eup %3365  ;;  %3385 = vrcp.f32 %v1349_v31  ;;  %v1350_v50 = vadd.f32 1.0, %v3364_v15  ;;  %2211 = vmatmul.mubr.bf16.gmra.mrb[80].mxu0 %v1835_v10  ;;  %5407 = vst [vmem:[#allocation15_spill] sm:$0xff] %v4637_v40  ;;  %v4647_v47 = vpop.f32.mrb[50].mxu1  ;;  %v2705_v4 = vmul.f32 -1.442695, %v4641_v12 }
 0x1c9   : > { %v3368_v26 = vpop.eup %3367  ;;  %3387 = vrcp.f32 %v1348_v34  ;;  %v1351_v41 = vadd.f32 1.0, %v3366_v51  ;;  %5410 = vst [vmem:[#allocation16_spill] sm:$0xff] %v4647_v47  ;;  %v4649_v18 = vpop.f32.mrb[51].mxu0 }
 0x1ca   : > { %v3370_v23 = vpop.eup %3369  ;;  %3389 = vrcp.f32 %v1350_v50  ;;  %v1353_v21 = vadd.f32 1.0, %v3368_v26  ;;  %5411 = vst [vmem:[#allocation17_spill] sm:$0xff] %v4649_v18  ;;  %v4651_v10 = vpop.f32.mrb[51].mxu1  ;;  %v2704_v50 = vmul.f32 -1.442695, %v4645_v1 }
 0x1cb   : > { %5412 = vst [vmem:[#allocation43_spill] sm:$0xff] %v4651_v10  ;;  %v3372_v31 = vpop.eup %3371  ;;  %3391 = vrcp.f32 %v1351_v41  ;;  %v1352_v15 = vadd.f32 1.0, %v3370_v23  ;;  %v5413_v10 = vld [vmem:[#allocation18_spill] sm:$0xff]  ;;  %v4662_v41 = vadd.f32 %v4425_v61, %v4167_v56  ;;  %v4664_v23 = vpop.f32.mrb[52].mxu0 }
 0x1cc   : > { %v3374_v34 = vpop.eup %3373  ;;  %3393 = vrcp.f32 %v1353_v21  ;;  %v1354_v51 = vadd.f32 1.0, %v3372_v31  ;;  %v4658_v47 = vadd.f32 %v5413_v10, %v4173_v59  ;;  %5414 = vst [vmem:[#allocation18_spill] sm:$0xff] %v4664_v23  ;;  %v4666_v21 = vpop.f32.mrb[52].mxu1 }
 0x1cd   : > { %v3376_v33 = vpop.eup %3375  ;;  %3395 = vrcp.f32 %v1352_v15  ;;  %v1355_v36 = vadd.f32 1.0, %v3374_v34  ;;  %5415 = vst [vmem:[#allocation44_spill] sm:$0xff] %v4666_v21  ;;  %v4670_v34 = vadd.f32 %v4427_v24, %v4169_v57  ;;  %v4676_v10 = vpop.f32.mrb[53].mxu0  ;;  %v4682_v21 = vadd.f32 %v4434_v13, %v4173_v59 }
 0x1ce   : > { %v3378_v26 = vpop.eup %3377  ;;  %3397 = vrcp.f32 %v1354_v51  ;;  %v1357_v18 = vadd.f32 1.0, %v3376_v33  ;;  %v4674_v51 = vadd.f32 %v4432_v27, %v4171_v58  ;;  %5416 = vst [vmem:[#allocation45_spill] sm:$0xff] %v4676_v10  ;;  %v4678_v33 = vpop.f32.mrb[53].mxu1  ;;  %v5419_v27 = vld [vmem:[#allocation19_spill] sm:$0xff] }
 0x1cf   : > { %v3380_v31 = vpop.eup %3379  ;;  %3399 = vrcp.f32 %v1355_v36  ;;  %v1356_v15 = vadd.f32 1.0, %v3378_v26  ;;  %5417 = vst [vmem:[#allocation46_spill] sm:$0xff] %v4678_v33  ;;  %v4686_v36 = vadd.f32 %v4441_v45, %v4167_v56  ;;  %v4688_v24 = vpop.f32.mrb[54].mxu0  ;;  %v1726_v40 = vmul.f32 %v4596_v49, %v5419_v27 }
 0x1d0   : > { %v3382_v61 = vpop.eup %3381  ;;  %3401 = vrcp.f32 %v1357_v18  ;;  %v1358_v23 = vadd.f32 1.0, %v3380_v31  ;;  %5418 = vst [vmem:[#allocation47_spill] sm:$0xff] %v4688_v24  ;;  %v5420_v18 = vld [vmem:[#allocation20_spill] sm:$0xff]  ;;  %v4697_v33 = vpop.f32.mrb[54].mxu1  ;;  %v2706_v45 = vmul.f32 -1.442695, %v4658_v47 }
 0x1d1   : > { %v3384_v26 = vpop.eup %3383  ;;  %v1730_v10 = vmul.f32 %v3382_v61, %v4490_v38  ;;  %3403 = vrcp.f32 %v1356_v15  ;;  %v4695_v31 = vadd.f32 %v5420_v18, %v4169_v57  ;;  %5421 = vst [vmem:[#allocation19_spill] sm:$0xff] %v4697_v33  ;;  %v4699_v13 = vpop.f32.mrb[55].mxu0  ;;  %v2707_v49 = vmul.f32 -1.442695, %v4662_v41  ;;  %v5424_v38 = vld [vmem:[#allocation21_spill] sm:$0xff] }
 0x1d2   : > { %5422 = vst [vmem:[#allocation20_spill] sm:$0xff] %v4699_v13  ;;  %v3386_v53 = vpop.eup %3385  ;;  %3405 = vrcp.f32 %v1358_v23  ;;  %v4702_v24 = vpop.f32.mrb[55].mxu1  ;;  %v4707_v15 = vadd.f32 %v5424_v38, %v4171_v58  ;;  %v2709_v18 = vmul.f32 -1.442695, %v4670_v34  ;;  %v2708_v13 = vmul.f32 -1.442695, %v4674_v51 }
 0x1d3   : > { %5423 = vst [vmem:[#allocation48_spill] sm:$0xff] %v4702_v24  ;;  %v3388_v54 = vpop.eup %3387  ;;  %3407 = vpow2.f32 %v2703_v60  ;;  %v1838_v61 = vpack.c.bf16 %v1730_v10, %v1726_v40  ;;  %v2710_v23 = vmul.f32 -1.442695, %v4682_v21  ;;  %v2711_v24 = vmul.f32 -1.442695, %v4686_v36  ;;  %v4727_v3 = vpop.f32.mrb[56].mxu0 }
 0x1d4   : > { %v3390_v27 = vpop.eup %3389  ;;  %3409 = vpow2.f32 %v2705_v4  ;;  %v2713_v60 = vmul.f32 -1.442695, %v4695_v31  ;;  %v1731_v4 = vmul.f32 %v3384_v26, %v4506_v22  ;;  %v4722_v38 = vadd.f32 %v4466_v46, %v4167_v56  ;;  %v4729_v25 = vpop.f32.mrb[56].mxu1 }
 0x1d5   : > { %v3392_v33 = vpop.eup %3391  ;;  %3411 = vpow2.f32 %v2704_v50  ;;  %2371 = vmatprep.mubr.bf16.mxu1 %v1838_v61  ;;  %v5426_v50 = vpack.c.bf16 %v4619_v30, %v4616_v35  ;;  %5427 = vst [vmem:[#allocation21_spill] sm:$0xff] %v4729_v25  ;;  %v1733_v61 = vmul.f32 %v3386_v53, %v4510_v9  ;;  %v4736_v46 = vpop.f32.mrb[57].mxu1  ;;  %v1732_v35 = vmul.f32 %v3388_v54, %v4517_v28 }
 0x1d6   : > { %v3394_v40 = vpop.eup %3393  ;;  %v1735_v10 = vmul.f32 %v3392_v33, %v4527_v14  ;;  %3413 = vpow2.f32 %v2706_v45  ;;  %v2712_v14 = vmul.f32 -1.442695, %v4707_v15  ;;  %v4734_v33 = vpop.f32.mrb[57].mxu0  ;;  %5428 = vst [vmem:[#allocation22_spill] sm:$0xff] %v4736_v46 }
 0x1d7   : > { %2372 = vmatmul.mubr.bf16.gmra.mrb[80].mxu1 %v5426_v50  ;;  %v3396_v44 = vpop.eup %3395  ;;  %v1737_v22 = vmul.f32 %v3394_v40, %v4531_v16  ;;  %3415 = vpow2.f32 %v2707_v49  ;;  %v4740_v50 = vpop.f32.mrb[58].mxu0  ;;  %v1734_v16 = vmul.f32 %v3390_v27, %v4523_v17 }
 0x1d8   : > { %v3398_v26 = vpop.eup %3397  ;;  %v1736_v30 = vmul.f32 %v3396_v44, %v4535_v0  ;;  %3417 = vpow2.f32 %v2709_v18  ;;  %v1839_v45 = vpack.c.bf16 %v1735_v10, %v1731_v4  ;;  %v4742_v25 = vpop.f32.mrb[58].mxu1  ;;  %v2714_v0 = vmul.f32 -1.442695, %v4716_v63 }
 0x1d9   : > { %v4744_v9 = vpop.eup %3399  ;;  %v1738_v53 = vmul.f32 %v3398_v26, %v4548_v29  ;;  %3419 = vpow2.f32 %v2708_v13  ;;  %v1841_v49 = vpack.c.bf16 %v1737_v22, %v1733_v61  ;;  %v4748_v40 = vpop.f32.mrb[59].mxu0  ;;  %v2715_v4 = vmul.f32 -1.442695, %v4722_v38 }
 0x1da   : > { %5429 = vst [vmem:[#allocation49_spill] sm:$0xff] %v4748_v40  ;;  %v4750_v46 = vpop.f32.mrb[59].mxu1  ;;  %v4752_v28 = vpop.eup %3401  ;;  %3421 = vpow2.f32 %v2710_v23  ;;  %v1840_v54 = vpack.c.bf16 %v1736_v30, %v1732_v35 }
 0x1db   : > { %5430 = vst [vmem:[#allocation50_spill] sm:$0xff] %v4750_v46  ;;  %v4755_v18 = vpop.eup %3403  ;;  %3423 = vpow2.f32 %v2711_v24  ;;  %v1842_v17 = vpack.c.bf16 %v1738_v53, %v1734_v16  ;;  %v4760_v23 = vpop.f32.mrb[60].mxu0 }
 0x1dc   : > { %v4758_v27 = vpop.eup %3405  ;;  %3425 = vpow2.f32 %v2713_v60  ;;  %2218 = vmatprep.mubr.bf16.mxu0 %v1840_v54  ;;  %5431 = vst [vmem:[#allocation51_spill] sm:$0xff] %v4760_v23  ;;  %v4762_v24 = vpop.f32.mrb[60].mxu1  ;;  %v4776_v54 = vadd.f32 %v4468_v6, %v4169_v57  ;;  %v4790_v6 = vadd.f32 %v4480_v19, %v4167_v56 }
 0x1dd   : > { %v3408_v29 = vpop.eup %3407  ;;  %3427 = vpow2.f32 %v2712_v14  ;;  %2379 = vmatprep.mubr.bf16.mxu1 %v1842_v17  ;;  %2219 = vmatmul.mubr.bf16.gmra.mrb[84].mxu0 %v1839_v45  ;;  %5432 = vst [vmem:[#allocation52_spill] sm:$0xff] %v4762_v24  ;;  %v4764_v22 = vpop.f32.mrb[61].mxu0  ;;  %v5442_v24 = vld [vmem:[#allocation26_spill] sm:$0xff] }
 0x1de   : > { %v3410_v13 = vpop.eup %3409  ;;  %v1359_v10 = vadd.f32 1.0, %v3408_v29  ;;  %3429 = vpow2.f32 %v2714_v0  ;;  %5433 = vst [vmem:[#allocation53_spill] sm:$0xff] %v4764_v22  ;;  %v4766_v35 = vpop.f32.mrb[61].mxu1 }
 0x1df   : > { %2380 = vmatmul.mubr.bf16.gmra.mrb[84].mxu1 %v1841_v49  ;;  %v3412_v44 = vpop.eup %3411  ;;  %v1361_v61 = vadd.f32 1.0, %v3410_v13  ;;  %3431 = vpow2.f32 %v2715_v4  ;;  %5434 = vst [vmem:[#allocation54_spill] sm:$0xff] %v4766_v35  ;;  %v4768_v14 = vpop.f32.mrb[62].mxu0  ;;  %v4782_v13 = vadd.f32 %v4474_v62, %v4171_v58 }
 0x1e0   : > { %v3414_v26 = vpop.eup %3413  ;;  %3433 = vrcp.f32 %v1359_v10  ;;  %v1360_v60 = vadd.f32 1.0, %v3412_v44  ;;  %5435 = vst [vmem:[#allocation55_spill] sm:$0xff] %v4768_v14  ;;  %v4770_v16 = vpop.f32.mrb[62].mxu1  ;;  %v4786_v10 = vadd.f32 %v4476_v55, %v4173_v59  ;;  %v2717_v55 = vmul.f32 -1.442695, %v4776_v54 }
 0x1e1   : > { %v3416_v30 = vpop.eup %3415  ;;  %3435 = vrcp.f32 %v1361_v61  ;;  %v1362_v45 = vadd.f32 1.0, %v3414_v26  ;;  %5436 = vst [vmem:[#allocation56_spill] sm:$0xff] %v4770_v16  ;;  %v4772_v53 = vpop.f32.mrb[63].mxu0 }
 0x1e2   : > { %5437 = vst [vmem:[#allocation57_spill] sm:$0xff] %v4772_v53  ;;  %v3418_v49 = vpop.eup %3417  ;;  %3437 = vrcp.f32 %v1360_v60  ;;  %v1363_v0 = vadd.f32 1.0, %v3416_v30  ;;  %v4778_v4 = vpop.f32.mrb[63].mxu1  ;;  %v4794_v30 = vadd.f32 %v4482_v39, %v4169_v57 }
 0x1e3   : > { %5438 = vst [vmem:[#allocation58_spill] sm:$0xff] %v4778_v4  ;;  %v3420_v17 = vpop.eup %3419  ;;  %3439 = vrcp.f32 %v1362_v45  ;;  %v1365_v29 = vadd.f32 1.0, %v3418_v49  ;;  %v4799_v49 = vadd.f32 %v4484_v42, %v4171_v58  ;;  %v2719_v4 = vmul.f32 -1.442695, %v4790_v6 }
 0x1e4   : > { %v3422_v44 = vpop.eup %3421  ;;  %3441 = vrcp.f32 %v1363_v0  ;;  %v1364_v61 = vadd.f32 1.0, %v3420_v17  ;;  %v2716_v17 = vmul.f32 -1.442695, %v4782_v13  ;;  %v2721_v16 = vmul.f32 -1.442695, %v4794_v30 }
 0x1e5   : > { %v3424_v26 = vpop.eup %3423  ;;  %3443 = vrcp.f32 %v1365_v29  ;;  %v1366_v60 = vadd.f32 1.0, %v3422_v44  ;;  %v2718_v29 = vmul.f32 -1.442695, %v4786_v10 }
 0x1e6   : > { %v3426_v62 = vpop.eup %3425  ;;  %3445 = vrcp.f32 %v1364_v61  ;;  %v1367_v45 = vadd.f32 1.0, %v3424_v26  ;;  %v5439_v61 = vld [vmem:[#allocation23_spill] sm:$0xff] }
 0x1e7   : > { %v3428_v0 = vpop.eup %3427  ;;  %3447 = vrcp.f32 %v1366_v60  ;;  %v1369_v19 = vadd.f32 1.0, %v3426_v62  ;;  %v4806_v26 = vadd.f32 %v5439_v61, %v4173_v59  ;;  %v5440_v60 = vld [vmem:[#allocation24_spill] sm:$0xff] }
 0x1e8   : > { %v3430_v44 = vpop.eup %3429  ;;  %3449 = vrcp.f32 %v1367_v45  ;;  %v1368_v39 = vadd.f32 1.0, %v3428_v0  ;;  %v4811_v62 = vadd.f32 %v5440_v60, %v4167_v56  ;;  %v2720_v45 = vmul.f32 -1.442695, %v4799_v49  ;;  %v5441_v0 = vld [vmem:[#allocation25_spill] sm:$0xff] }
 0x1e9   : > { %v3432_v53 = vpop.eup %3431  ;;  %3451 = vrcp.f32 %v1369_v19  ;;  %v1370_v42 = vadd.f32 1.0, %v3430_v44  ;;  %v4816_v22 = vadd.f32 %v5441_v0, %v4169_v57  ;;  %v1739_v19 = vmul.f32 %v4744_v9, %v4558_v2  ;;  %v5443_v0 = vld [vmem:[#allocation27_spill] sm:$0xff] }
 0x1ea   : > { %v3434_v14 = vpop.eup %3433  ;;  %3453 = vrcp.f32 %v1368_v39  ;;  %v1371_v35 = vadd.f32 1.0, %v3432_v53  ;;  %v4823_v60 = vadd.f32 %v5442_v24, %v4171_v58  ;;  %v1741_v53 = vmul.f32 %v4752_v28, %v4569_v7 }
 0x1eb   : > { %v3436_v61 = vpop.eup %3435  ;;  %v1743_v44 = vmul.f32 %v3434_v14, %v4635_v43  ;;  %3455 = vrcp.f32 %v1370_v42  ;;  %v4830_v46 = vadd.f32 %v5443_v0, %v4173_v59  ;;  %v1740_v2 = vmul.f32 %v4755_v18, %v4580_v48  ;;  %v5444_v42 = vld [vmem:[#allocation28_spill] sm:$0xff] }
 0x1ec   : > { %v3438_v23 = vpop.eup %3437  ;;  %v1745_v39 = vmul.f32 %v3436_v61, %v4641_v12  ;;  %3457 = vrcp.f32 %v1371_v35  ;;  %v1742_v14 = vmul.f32 %v4758_v27, %v4589_v11  ;;  %v2722_v35 = vmul.f32 -1.442695, %v4806_v26 }
 0x1ed   : > { %v3440_v40 = vpop.eup %3439  ;;  %v1744_v43 = vmul.f32 %v3438_v23, %v4645_v1  ;;  %3459 = vpow2.f32 %v2717_v55  ;;  %v1843_v9 = vpack.c.bf16 %v1743_v44, %v1739_v19  ;;  %v4841_v61 = vadd.f32 %v5444_v42, %v4167_v56  ;;  %v5445_v23 = vld [vmem:[#allocation29_spill] sm:$0xff] }
 0x1ee   : > { %v3442_v24 = vpop.eup %3441  ;;  %v1746_v7 = vmul.f32 %v3440_v40, %v4658_v47  ;;  %3461 = vpow2.f32 %v2716_v17  ;;  %v1845_v12 = vpack.c.bf16 %v1745_v39, %v1741_v53  ;;  %v2723_v18 = vmul.f32 -1.442695, %v4811_v62 }
 0x1ef   : > { %v3444_v28 = vpop.eup %3443  ;;  %3463 = vpow2.f32 %v2718_v29  ;;  %v1844_v48 = vpack.c.bf16 %v1744_v43, %v1740_v2  ;;  %v4846_v11 = vadd.f32 %v5445_v23, %v4169_v57  ;;  %v2725_v27 = vmul.f32 -1.442695, %v4816_v22 }
 0x1f0   : > { %v3446_v1 = vpop.eup %3445  ;;  %3465 = vpow2.f32 %v2719_v4  ;;  %v1846_v47 = vpack.c.bf16 %v1746_v7, %v1742_v14  ;;  %v2724_v17 = vmul.f32 -1.442695, %v4823_v60  ;;  %v2726_v29 = vmul.f32 -1.442695, %v4830_v46 }
 0x1f1   : > { %v3448_v40 = vpop.eup %3447  ;;  %3467 = vpow2.f32 %v2721_v16  ;;  %2226 = vmatprep.mubr.bf16.mxu0 %v1844_v48  ;;  %v1747_v19 = vmul.f32 %v3442_v24, %v4662_v41  ;;  %v2727_v53 = vmul.f32 -1.442695, %v4841_v61  ;;  %v1749_v39 = vmul.f32 %v3444_v28, %v4670_v34 }
 0x1f2   : > { %v3450_v55 = vpop.eup %3449  ;;  %3469 = vpow2.f32 %v2720_v45  ;;  %2387 = vmatprep.mubr.bf16.mxu1 %v1846_v47  ;;  %2227 = vmatmul.mubr.bf16.gmra.mrb[88].mxu0 %v1843_v9  ;;  %v2729_v0 = vmul.f32 -1.442695, %v4846_v11  ;;  %v1748_v43 = vmul.f32 %v3446_v1, %v4674_v51  ;;  %v1750_v24 = vmul.f32 %v3448_v40, %v4682_v21  ;;  %v5446_v1 = vld [vmem:[#allocation30_spill] sm:$0xff] }
 0x1f3   : > { %v3452_v4 = vpop.eup %3451  ;;  %v1751_v44 = vmul.f32 %v3450_v55, %v4686_v36  ;;  %3471 = vpow2.f32 %v2722_v35  ;;  %2388 = vmatmul.mubr.bf16.gmra.mrb[88].mxu1 %v1845_v12 }
 0x1f4   : > { %v3454_v16 = vpop.eup %3453  ;;  %v1753_v45 = vmul.f32 %v3452_v4, %v4695_v31  ;;  %3473 = vpow2.f32 %v2723_v18  ;;  %v4865_v18 = vadd.f32 %v5446_v1, %v4171_v58 }
 0x1f5   : > { %v3456_v2 = vpop.eup %3455  ;;  %v1752_v9 = vmul.f32 %v3454_v16, %v4707_v15  ;;  %3475 = vpow2.f32 %v2725_v27  ;;  %v1847_v41 = vpack.c.bf16 %v1751_v44, %v1747_v19  ;;  %v5447_v16 = vld [vmem:[#allocation31_spill] sm:$0xff] }
 0x1f6   : > { %v4859_v36 = vpop.eup %3457  ;;  %v1754_v14 = vmul.f32 %v3456_v2, %v4716_v63  ;;  %3477 = vpow2.f32 %v2724_v17  ;;  %v1849_v34 = vpack.c.bf16 %v1753_v45, %v1749_v39  ;;  %v2728_v19 = vmul.f32 -1.442695, %v4865_v18  ;;  %v5448_v45 = vld [vmem:[#allocation32_spill] sm:$0xff] }
 0x1f7   : > { %v3460_v7 = vpop.eup %3459  ;;  %3479 = vpow2.f32 %v2726_v29  ;;  %v1848_v31 = vpack.c.bf16 %v1752_v9, %v1748_v43  ;;  %v4870_v39 = vadd.f32 %v5447_v16, %v4173_v59  ;;  %v5449_v9 = vld [vmem:[#allocation33_spill] sm:$0xff] }
 0x1f8   : > { %v3462_v12 = vpop.eup %3461  ;;  %v1373_v28 = vadd.f32 1.0, %v3460_v7  ;;  %3481 = vpow2.f32 %v2727_v53  ;;  %v1850_v35 = vpack.c.bf16 %v1754_v14, %v1750_v24  ;;  %v5450_v24 = vld [vmem:[#allocation34_spill] sm:$0xff] }
 0x1f9   : > { %v3464_v51 = vpop.eup %3463  ;;  %v1372_v42 = vadd.f32 1.0, %v3462_v12  ;;  %3483 = vpow2.f32 %v2729_v0  ;;  %2234 = vmatprep.mubr.bf16.mxu0 %v1848_v31  ;;  %v4874_v0 = vadd.f32 %v5448_v45, %v4167_v56  ;;  %v4882_v14 = vadd.f32 %v5450_v24, %v4171_v58  ;;  %v5451_v31 = vld [vmem:[#allocation35_spill] sm:$0xff] }
 0x1fa   : > { %v3466_v15 = vpop.eup %3465  ;;  %3485 = vrcp.f32 %v1373_v28  ;;  %v1374_v48 = vadd.f32 1.0, %v3464_v51  ;;  %2395 = vmatprep.mubr.bf16.mxu1 %v1850_v35  ;;  %2235 = vmatmul.mubr.bf16.gmra.mrb[92].mxu0 %v1847_v41  ;;  %v4878_v41 = vadd.f32 %v5449_v9, %v4169_v57  ;;  %v4886_v12 = vadd.f32 %v5451_v31, %v4173_v59  ;;  %v5452_v28 = vld [vmem:[#allocation36_spill] sm:$0xff] }
 0x1fb   : > { %v3468_v21 = vpop.eup %3467  ;;  %3487 = vrcp.f32 %v1372_v42  ;;  %v1375_v63 = vadd.f32 1.0, %v3466_v15  ;;  %2396 = vmatmul.mubr.bf16.gmra.mrb[92].mxu1 %v1849_v34  ;;  %v4890_v35 = vadd.f32 %v5452_v28, %v4167_v56  ;;  %v5453_v15 = vld [vmem:[#allocation37_spill] sm:$0xff]  ;;  %v4914_v9 = vadd.f32 %v4592_v37, %v4167_v56 }
 0x1fc   : > { %v3470_v23 = vpop.eup %3469  ;;  %3489 = vrcp.f32 %v1374_v48  ;;  %v1377_v47 = vadd.f32 1.0, %v3468_v21  ;;  %v4894_v48 = vadd.f32 %v5453_v15, %v4169_v57  ;;  %v5454_v21 = vld [vmem:[#allocation12_spill] sm:$0xff]  ;;  %v4921_v31 = vadd.f32 %v4594_v8, %v4169_v57 }
 0x1fd   : > { %v3472_v40 = vpop.eup %3471  ;;  %3491 = vrcp.f32 %v1375_v63  ;;  %v1376_v27 = vadd.f32 1.0, %v3470_v23  ;;  %v4898_v63 = vadd.f32 %v5454_v21, %v4171_v58  ;;  %v4927_v37 = vadd.f32 %v4599_v5, %v4171_v58 }
 0x1fe   : > { %v3474_v55 = vpop.eup %3473  ;;  %3493 = vrcp.f32 %v1377_v47  ;;  %v1378_v17 = vadd.f32 1.0, %v3472_v40  ;;  %v2730_v47 = vmul.f32 -1.442695, %v4870_v39 }
 0x1ff   : > { %v3476_v29 = vpop.eup %3475  ;;  %3495 = vrcp.f32 %v1376_v27  ;;  %v1379_v4 = vadd.f32 1.0, %v3474_v55  ;;  %v2731_v27 = vmul.f32 -1.442695, %v4874_v0  ;;  %v2733_v55 = vmul.f32 -1.442695, %v4878_v41 }
 0x200   : > { %v3478_v44 = vpop.eup %3477  ;;  %3497 = vrcp.f32 %v1378_v17  ;;  %v1381_v53 = vadd.f32 1.0, %v3476_v29  ;;  %v2732_v17 = vmul.f32 -1.442695, %v4882_v14 }
 0x201   : > { %v3480_v2 = vpop.eup %3479  ;;  %3499 = vrcp.f32 %v1379_v4  ;;  %v1380_v43 = vadd.f32 1.0, %v3478_v44  ;;  %v2734_v4 = vmul.f32 -1.442695, %v4886_v12  ;;  %v2735_v44 = vmul.f32 -1.442695, %v4890_v35 }
 0x202   : > { %v3482_v34 = vpop.eup %3481  ;;  %3501 = vrcp.f32 %v1381_v53  ;;  %v1382_v7 = vadd.f32 1.0, %v3480_v2  ;;  %v5455_v53 = vld [vmem:[#allocation38_spill] sm:$0xff]  ;;  %v2737_v2 = vmul.f32 -1.442695, %v4894_v48 }
 0x203   : > { %v3484_v51 = vpop.eup %3483  ;;  %3503 = vrcp.f32 %v1380_v43  ;;  %v1383_v42 = vadd.f32 1.0, %v3482_v34  ;;  %v4908_v16 = vadd.f32 %v5455_v53, %v4173_v59  ;;  %v2736_v43 = vmul.f32 -1.442695, %v4898_v63 }
 0x204   : > { %v3486_v1 = vpop.eup %3485  ;;  %3505 = vrcp.f32 %v1382_v7  ;;  %v1385_v23 = vadd.f32 1.0, %v3484_v51  ;;  %v1755_v34 = vmul.f32 %v4859_v36, %v4722_v38 }
 0x205   : > { %v3488_v40 = vpop.eup %3487  ;;  %3507 = vrcp.f32 %v1383_v42  ;;  %v1757_v28 = vmul.f32 %v3486_v1, %v4776_v54  ;;  %v2738_v1 = vmul.f32 -1.442695, %v4908_v16 }
 0x206   : > { %v3490_v29 = vpop.eup %3489  ;;  %3509 = vrcp.f32 %v1385_v23  ;;  %v1756_v38 = vmul.f32 %v3488_v40, %v4782_v13  ;;  %v2739_v13 = vmul.f32 -1.442695, %v4914_v9  ;;  %v2740_v40 = vmul.f32 -1.442695, %v4927_v37 }
 0x207   : > { %v3492_v45 = vpop.eup %3491  ;;  %3511 = vpow2.f32 %v2728_v19  ;;  %v1758_v8 = vmul.f32 %v3490_v29, %v4786_v10  ;;  %v2741_v10 = vmul.f32 -1.442695, %v4921_v31 }
 0x208   : > { %v3494_v24 = vpop.eup %3493  ;;  %v1759_v7 = vmul.f32 %v3492_v45, %v4790_v6  ;;  %3513 = vpow2.f32 %v2730_v47 }
 0x209   : > { %v3496_v19 = vpop.eup %3495  ;;  %v1761_v51 = vmul.f32 %v3494_v24, %v4794_v30  ;;  %3515 = vpow2.f32 %v2731_v27 }
 0x20a   : > { %v3498_v42 = vpop.eup %3497  ;;  %v1760_v6 = vmul.f32 %v3496_v19, %v4799_v49  ;;  %3517 = vpow2.f32 %v2733_v55  ;;  %v1851_v36 = vpack.c.bf16 %v1759_v7, %v1755_v34 }
 0x20b   : > { %v3500_v15 = vpop.eup %3499  ;;  %v1762_v21 = vmul.f32 %v3498_v42, %v4806_v26  ;;  %3519 = vpow2.f32 %v2732_v17  ;;  %v1853_v54 = vpack.c.bf16 %v1761_v51, %v1757_v28  ;;  %v4959_v42 = vadd.f32 %v4601_v52, %v4173_v59 }
 0x20c   : > { %v3502_v30 = vpop.eup %3501  ;;  %3521 = vpow2.f32 %v2734_v4  ;;  %v1852_v5 = vpack.c.bf16 %v1760_v6, %v1756_v38  ;;  %v4942_v55 = vmul.f32 %v3500_v15, %v4811_v62  ;;  %v4963_v38 = vadd.f32 %v4604_v32, %v4167_v56 }
 0x20d   : > { %v4934_v23 = vpop.eup %3503  ;;  %3523 = vpow2.f32 %v2735_v44  ;;  %v1854_v49 = vpack.c.bf16 %v1762_v21, %v1758_v8  ;;  %v4948_v4 = vmul.f32 %v3502_v30, %v4816_v22  ;;  %v4967_v21 = vadd.f32 %v4606_v20, %v4169_v57  ;;  %v5457_v20 = vld [vmem:[#allocation14_spill] sm:$0xff] }
 0x20e   : > { %v4937_v47 = vpop.eup %3505  ;;  %3525 = vpow2.f32 %v2737_v2  ;;  %2242 = vmatprep.mubr.bf16.mxu0 %v1852_v5 }
 0x20f   : > { %v3508_v26 = vpop.eup %3507  ;;  %3527 = vpow2.f32 %v2736_v43  ;;  %2403 = vmatprep.mubr.bf16.mxu1 %v1854_v49  ;;  %2243 = vmatmul.mubr.bf16.gmra.mrb[96].mxu0 %v1851_v36  ;;  %v2743_v49 = vmul.f32 -1.442695, %v4963_v38 }
 0x210   : > { %v3510_v27 = vpop.eup %3509  ;;  %v4945_v17 = vmul.f32 %v3508_v26, %v4841_v61  ;;  %3529 = vpow2.f32 %v2738_v1  ;;  %2404 = vmatmul.mubr.bf16.gmra.mrb[96].mxu1 %v1853_v54  ;;  %v5456_v54 = vld [vmem:[#allocation13_spill] sm:$0xff] }
 0x211   : > { %v3512_v29 = vpop.eup %3511  ;;  %v4951_v44 = vmul.f32 %v3510_v27, %v4846_v11  ;;  %3531 = vpow2.f32 %v2739_v13  ;;  %v4971_v30 = vadd.f32 %v5456_v54, %v4171_v58  ;;  %v2742_v13 = vmul.f32 -1.442695, %v4959_v42  ;;  %v5458_v27 = vld [vmem:[#allocation39_spill] sm:$0xff] }
 0x212   : > { %v3514_v53 = vpop.eup %3513  ;;  %v1384_v45 = vadd.f32 1.0, %v3512_v29  ;;  %3533 = vpow2.f32 %v2741_v10  ;;  %v1855_v62 = vpack.c.bf16 %v4945_v17, %v4942_v55  ;;  %v4981_v29 = vadd.f32 %v5458_v27, %v4167_v56 }
 0x213   : > { %v3516_v2 = vpop.eup %3515  ;;  %v1386_v43 = vadd.f32 1.0, %v3514_v53  ;;  %3535 = vpow2.f32 %v2740_v40  ;;  %v1857_v61 = vpack.c.bf16 %v4951_v44, %v4948_v4  ;;  %v4977_v40 = vadd.f32 %v5457_v20, %v4173_v59 }
 0x214   : > { %v3518_v24 = vpop.eup %3517  ;;  %3537 = vrcp.f32 %v1384_v45  ;;  %v1387_v22 = vadd.f32 1.0, %v3516_v2  ;;  %v2745_v2 = vmul.f32 -1.442695, %v4967_v21  ;;  %v1766_v54 = vmul.f32 %v4937_v47, %v4830_v46 }
 0x215   : > { %v3520_v34 = vpop.eup %3519  ;;  %3539 = vrcp.f32 %v1386_v43  ;;  %v1389_v11 = vadd.f32 1.0, %v3518_v24  ;;  %v2744_v43 = vmul.f32 -1.442695, %v4971_v30  ;;  %v2747_v46 = vmul.f32 -1.442695, %v4981_v29 }
 0x216   : > { %v3522_v7 = vpop.eup %3521  ;;  %3541 = vrcp.f32 %v1387_v22  ;;  %v1388_v19 = vadd.f32 1.0, %v3520_v34  ;;  %v5459_v34 = vld [vmem:[#allocation40_spill] sm:$0xff] }
 0x217   : > { %v3524_v28 = vpop.eup %3523  ;;  %3543 = vrcp.f32 %v1389_v11  ;;  %v1390_v51 = vadd.f32 1.0, %v3522_v7  ;;  %v4987_v11 = vadd.f32 %v5459_v34, %v4169_v57  ;;  %v5460_v7 = vld [vmem:[#allocation41_spill] sm:$0xff] }
 0x218   : > { %v3526_v6 = vpop.eup %3525  ;;  %3545 = vrcp.f32 %v1388_v19  ;;  %v1391_v36 = vadd.f32 1.0, %v3524_v28  ;;  %v4991_v19 = vadd.f32 %v5460_v7, %v4171_v58 }
 0x219   : > { %v3528_v15 = vpop.eup %3527  ;;  %3547 = vrcp.f32 %v1390_v51  ;;  %v1393_v8 = vadd.f32 1.0, %v3526_v6  ;;  %v1764_v51 = vmul.f32 %v4934_v23, %v4823_v60  ;;  %v2746_v60 = vmul.f32 -1.442695, %v4977_v40 }
 0x21a   : > { %v3530_v52 = vpop.eup %3529  ;;  %3549 = vrcp.f32 %v1391_v36  ;;  %v1392_v1 = vadd.f32 1.0, %v3528_v15  ;;  %v5461_v36 = vld [vmem:[#allocation42_spill] sm:$0xff] }
 0x21b   : > { %v3532_v5 = vpop.eup %3531  ;;  %3551 = vrcp.f32 %v1393_v8  ;;  %v1394_v32 = vadd.f32 1.0, %v3530_v52  ;;  %v4998_v15 = vadd.f32 %v5461_v36, %v4173_v59 }
 0x21c   : > { %v3534_v10 = vpop.eup %3533  ;;  %3553 = vrcp.f32 %v1392_v1  ;;  %v1395_v26 = vadd.f32 1.0, %v3532_v5  ;;  %v5462_v1 = vld [vmem:[#allocation15_spill] sm:$0xff] }
 0x21d   : > { %v3536_v53 = vpop.eup %3535  ;;  %3555 = vrcp.f32 %v1394_v32  ;;  %v1397_v45 = vadd.f32 1.0, %v3534_v10  ;;  %v5005_v5 = vadd.f32 %v5462_v1, %v4167_v56 }
 0x21e   : > { %v3538_v24 = vpop.eup %3537  ;;  %3557 = vrcp.f32 %v1395_v26  ;;  %v1396_v22 = vadd.f32 1.0, %v3536_v53  ;;  %v2748_v53 = vmul.f32 -1.442695, %v4991_v19 }
 0x21f   : > { %v3540_v28 = vpop.eup %3539  ;;  %v1768_v6 = vmul.f32 %v3538_v24, %v4865_v18  ;;  %3559 = vrcp.f32 %v1397_v45  ;;  %v5463_v18 = vld [vmem:[#allocation16_spill] sm:$0xff]  ;;  %v2750_v24 = vmul.f32 -1.442695, %v4998_v15 }
 0x220   : > { %v3542_v8 = vpop.eup %3541  ;;  %v1770_v52 = vmul.f32 %v3540_v28, %v4870_v39  ;;  %3561 = vrcp.f32 %v1396_v22  ;;  %v5010_v23 = vadd.f32 %v5463_v18, %v4169_v57  ;;  %v5464_v39 = vld [vmem:[#allocation17_spill] sm:$0xff]  ;;  %v5465_v22 = vld [vmem:[#allocation43_spill] sm:$0xff] }
 0x221   : > { %v3544_v32 = vpop.eup %3543  ;;  %3563 = vpow2.f32 %v2742_v13  ;;  %v1856_v10 = vpack.c.bf16 %v1768_v6, %v1764_v51  ;;  %v5015_v47 = vadd.f32 %v5464_v39, %v4171_v58  ;;  %v2749_v13 = vmul.f32 -1.442695, %v4987_v11 }
 0x222   : > { %v3546_v26 = vpop.eup %3545  ;;  %3565 = vpow2.f32 %v2743_v49  ;;  %v1858_v20 = vpack.c.bf16 %v1770_v52, %v1766_v54  ;;  %v2751_v49 = vmul.f32 -1.442695, %v5005_v5  ;;  %v5023_v34 = vadd.f32 %v5465_v22, %v4173_v59 }
 0x223   : > { %v3548_v27 = vpop.eup %3547  ;;  %3567 = vpow2.f32 %v2745_v2  ;;  %2250 = vmatprep.mubr.bf16.mxu0 %v1856_v10  ;;  %v1771_v7 = vmul.f32 %v3542_v8, %v4874_v0  ;;  %v1773_v6 = vmul.f32 %v3544_v32, %v4878_v41  ;;  %v2752_v55 = vmul.f32 -1.442695, %v5015_v47 }
 0x224   : > { %v3550_v45 = vpop.eup %3549  ;;  %3569 = vpow2.f32 %v2744_v43  ;;  %2411 = vmatprep.mubr.bf16.mxu1 %v1858_v20  ;;  %2251 = vmatmul.mubr.bf16.gmra.mrb[100].mxu0 %v1855_v62  ;;  %v2753_v43 = vmul.f32 -1.442695, %v5010_v23  ;;  %v1772_v0 = vmul.f32 %v3546_v26, %v4882_v14  ;;  %v1774_v4 = vmul.f32 %v3548_v27, %v4886_v12 }
 0x225   : > { %v3552_v2 = vpop.eup %3551  ;;  %v1775_v28 = vmul.f32 %v3550_v45, %v4890_v35  ;;  %3571 = vpow2.f32 %v2746_v60  ;;  %2412 = vmatmul.mubr.bf16.gmra.mrb[100].mxu1 %v1857_v61  ;;  %v5466_v45 = vld [vmem:[#allocation18_spill] sm:$0xff] }
 0x226   : > { %v3554_v51 = vpop.eup %3553  ;;  %v1777_v36 = vmul.f32 %v3552_v2, %v4894_v48  ;;  %3573 = vpow2.f32 %v2747_v46  ;;  %v2754_v48 = vmul.f32 -1.442695, %v5023_v34  ;;  %v5467_v2 = vld [vmem:[#allocation44_spill] sm:$0xff] }
 0x227   : > { %v3556_v17 = vpop.eup %3555  ;;  %v1776_v35 = vmul.f32 %v3554_v51, %v4898_v63  ;;  %3575 = vpow2.f32 %v2749_v13  ;;  %v1859_v62 = vpack.c.bf16 %v1775_v28, %v1771_v7  ;;  %v5054_v7 = vadd.f32 %v5467_v2, %v4169_v57  ;;  %v5468_v28 = vld [vmem:[#allocation45_spill] sm:$0xff] }
 0x228   : > { %v5039_v8 = vpop.eup %3557  ;;  %v1778_v44 = vmul.f32 %v3556_v17, %v4908_v16  ;;  %3577 = vpow2.f32 %v2748_v53  ;;  %v1861_v41 = vpack.c.bf16 %v1777_v36, %v1773_v6  ;;  %v5469_v36 = vld [vmem:[#allocation46_spill] sm:$0xff]  ;;  %v5470_v17 = vld [vmem:[#allocation47_spill] sm:$0xff] }
 0x229   : > { %v5043_v61 = vpop.eup %3559  ;;  %3579 = vpow2.f32 %v2750_v24  ;;  %v1860_v54 = vpack.c.bf16 %v1776_v35, %v1772_v0  ;;  %v5050_v24 = vadd.f32 %v5466_v45, %v4167_v56  ;;  %v5066_v0 = vadd.f32 %v5470_v17, %v4167_v56 }
 0x22a   : > { %v5046_v52 = vpop.eup %3561  ;;  %3581 = vpow2.f32 %v2751_v49  ;;  %v1862_v14 = vpack.c.bf16 %v1778_v44, %v1774_v4  ;;  %v5471_v4 = vld [vmem:[#allocation19_spill] sm:$0xff]  ;;  %v1779_v45 = vmul.f32 %v5039_v8, %v4914_v9 }
 0x22b   : > { %v3564_v63 = vpop.eup %3563  ;;  %3583 = vpow2.f32 %v2753_v43  ;;  %2258 = vmatprep.mubr.bf16.mxu0 %v1860_v54  ;;  %v5058_v43 = vadd.f32 %v5468_v28, %v4171_v58  ;;  %v5070_v44 = vadd.f32 %v5471_v4, %v4169_v57  ;;  %v1781_v28 = vmul.f32 %v5043_v61, %v4921_v31 }
 0x22c   : > { %v3566_v1 = vpop.eup %3565  ;;  %v1398_v32 = vadd.f32 1.0, %v3564_v63  ;;  %3585 = vpow2.f32 %v2752_v55  ;;  %2419 = vmatprep.mubr.bf16.mxu1 %v1862_v14  ;;  %2259 = vmatmul.mubr.bf16.gmra.mrb[104].mxu0 %v1859_v62  ;;  %v5062_v55 = vadd.f32 %v5469_v36, %v4173_v59  ;;  %v2755_v63 = vmul.f32 -1.442695, %v5050_v24 }
 0x22d   : > { %v3568_v12 = vpop.eup %3567  ;;  %v1399_v16 = vadd.f32 1.0, %v3566_v1  ;;  %3587 = vpow2.f32 %v2754_v48  ;;  %2420 = vmatmul.mubr.bf16.gmra.mrb[104].mxu1 %v1861_v41  ;;  %v5472_v41 = vld [vmem:[#allocation20_spill] sm:$0xff]  ;;  %v1780_v9 = vmul.f32 %v5046_v52, %v4927_v37  ;;  %v5109_v4 = vadd.f32 %v4734_v33, %v4171_v58 }
 0x22e   : > { %v3570_v60 = vpop.eup %3569  ;;  %3589 = vrcp.f32 %v1398_v32  ;;  %v1401_v18 = vadd.f32 1.0, %v3568_v12  ;;  %v5074_v48 = vadd.f32 %v5472_v41, %v4171_v58  ;;  %v2757_v12 = vmul.f32 -1.442695, %v5054_v7 }
 0x22f   : > { %v3572_v10 = vpop.eup %3571  ;;  %3591 = vrcp.f32 %v1399_v16  ;;  %v1400_v26 = vadd.f32 1.0, %v3570_v60  ;;  %v2756_v16 = vmul.f32 -1.442695, %v5058_v43 }
 0x230   : > { %v3574_v46 = vpop.eup %3573  ;;  %3593 = vrcp.f32 %v1401_v18  ;;  %v1402_v39 = vadd.f32 1.0, %v3572_v10  ;;  %v2758_v10 = vmul.f32 -1.442695, %v5062_v55 }
 0x231   : > { %v3576_v20 = vpop.eup %3575  ;;  %3595 = vrcp.f32 %v1400_v26  ;;  %v1403_v27 = vadd.f32 1.0, %v3574_v46  ;;  %v2759_v26 = vmul.f32 -1.442695, %v5066_v0 }
 0x232   : > { %v3578_v13 = vpop.eup %3577  ;;  %3597 = vrcp.f32 %v1402_v39  ;;  %v1405_v53 = vadd.f32 1.0, %v3576_v20  ;;  %v2761_v39 = vmul.f32 -1.442695, %v5070_v44  ;;  %v2760_v20 = vmul.f32 -1.442695, %v5074_v48 }
 0x233   : > { %v3580_v49 = vpop.eup %3579  ;;  %3599 = vrcp.f32 %v1403_v27  ;;  %v1404_v22 = vadd.f32 1.0, %v3578_v13  ;;  %v5473_v27 = vld [vmem:[#allocation48_spill] sm:$0xff] }
 0x234   : > { %v3582_v51 = vpop.eup %3581  ;;  %3601 = vrcp.f32 %v1405_v53  ;;  %v1406_v6 = vadd.f32 1.0, %v3580_v49  ;;  %v5085_v13 = vadd.f32 %v5473_v27, %v4173_v59 }
 0x235   : > { %v3584_v35 = vpop.eup %3583  ;;  %3603 = vrcp.f32 %v1404_v22  ;;  %v1407_v62 = vadd.f32 1.0, %v3582_v51  ;;  %v5092_v22 = vadd.f32 %v4727_v3, %v4167_v56 }
 0x236   : > { %v3586_v54 = vpop.eup %3585  ;;  %3605 = vrcp.f32 %v1406_v6  ;;  %v1409_v14 = vadd.f32 1.0, %v3584_v35  ;;  %v5474_v6 = vld [vmem:[#allocation21_spill] sm:$0xff] }
 0x237   : > { %v3588_v1 = vpop.eup %3587  ;;  %3607 = vrcp.f32 %v1407_v62  ;;  %v1408_v32 = vadd.f32 1.0, %v3586_v54  ;;  %v5099_v36 = vadd.f32 %v5474_v6, %v4169_v57  ;;  %v2762_v62 = vmul.f32 -1.442695, %v5085_v13 }
 0x238   : > { %v3590_v60 = vpop.eup %3589  ;;  %3609 = vrcp.f32 %v1409_v14  ;;  %v1410_v18 = vadd.f32 1.0, %v3588_v1 }
 0x239   : > { %v3592_v46 = vpop.eup %3591  ;;  %3611 = vrcp.f32 %v1408_v32  ;;  %v1782_v35 = vmul.f32 %v3590_v60, %v4959_v42  ;;  %v5114_v42 = vadd.f32 %v4740_v50, %v4167_v56  ;;  %v2765_v54 = vmul.f32 -1.442695, %v5099_v36 }
 0x23a   : > { %v3594_v53 = vpop.eup %3593  ;;  %v1783_v49 = vmul.f32 %v3592_v46, %v4963_v38  ;;  %3613 = vrcp.f32 %v1410_v18  ;;  %v2764_v32 = vmul.f32 -1.442695, %v5109_v4 }
 0x23b   : > { %v3596_v2 = vpop.eup %3595  ;;  %v1785_v51 = vmul.f32 %v3594_v53, %v4967_v21  ;;  %3615 = vpow2.f32 %v2755_v63  ;;  %v2767_v60 = vmul.f32 -1.442695, %v5114_v42 }
 0x23c   : > { %v3598_v17 = vpop.eup %3597  ;;  %v1784_v38 = vmul.f32 %v3596_v2, %v4971_v30  ;;  %3617 = vpow2.f32 %v2757_v12  ;;  %v1863_v3 = vpack.c.bf16 %v1783_v49, %v1779_v45  ;;  %v2763_v30 = vmul.f32 -1.442695, %v5092_v22 }
 0x23d   : > { %v3600_v8 = vpop.eup %3599  ;;  %v1786_v31 = vmul.f32 %v3598_v17, %v4977_v40  ;;  %3619 = vpow2.f32 %v2756_v16  ;;  %v1865_v21 = vpack.c.bf16 %v1785_v51, %v1781_v28 }
 0x23e   : > { %v3602_v61 = vpop.eup %3601  ;;  %3621 = vpow2.f32 %v2758_v10  ;;  %v1864_v37 = vpack.c.bf16 %v1784_v38, %v1780_v9  ;;  %v1787_v63 = vmul.f32 %v3600_v8, %v4981_v29 }
 0x23f   : > { %v3604_v52 = vpop.eup %3603  ;;  %3623 = vpow2.f32 %v2759_v26  ;;  %v1866_v40 = vpack.c.bf16 %v1786_v31, %v1782_v35  ;;  %v1789_v12 = vmul.f32 %v3602_v61, %v4987_v11  ;;  %v5134_v35 = vadd.f32 %v4742_v25, %v4169_v57  ;;  %v5476_v61 = vld [vmem:[#allocation49_spill] sm:$0xff] }
 0x240   : > { %v3606_v41 = vpop.eup %3605  ;;  %3625 = vpow2.f32 %v2761_v39  ;;  %2266 = vmatprep.mubr.bf16.mxu0 %v1864_v37  ;;  %v1788_v10 = vmul.f32 %v3604_v52, %v4991_v19 }
 0x241   : > { %v3608_v14 = vpop.eup %3607  ;;  %3627 = vpow2.f32 %v2760_v20  ;;  %2427 = vmatprep.mubr.bf16.mxu1 %v1866_v40  ;;  %2267 = vmatmul.mubr.bf16.gmra.mrb[108].mxu0 %v1863_v3  ;;  %v1790_v46 = vmul.f32 %v3606_v41, %v4998_v15  ;;  %v5477_v40 = vld [vmem:[#allocation50_spill] sm:$0xff]  ;;  %v2769_v25 = vmul.f32 -1.442695, %v5134_v35 }
 0x242   : > { %v3610_v33 = vpop.eup %3609  ;;  %v1791_v1 = vmul.f32 %v3608_v14, %v5005_v5  ;;  %3629 = vpow2.f32 %v2762_v62  ;;  %2428 = vmatmul.mubr.bf16.gmra.mrb[108].mxu1 %v1865_v21  ;;  %v5138_v62 = vadd.f32 %v5476_v61, %v4171_v58  ;;  %v5142_v41 = vadd.f32 %v5477_v40, %v4173_v59  ;;  %v5478_v14 = vld [vmem:[#allocation51_spill] sm:$0xff] }
 0x243   : > { %v3612_v50 = vpop.eup %3611  ;;  %v1793_v16 = vmul.f32 %v3610_v33, %v5010_v23  ;;  %3631 = vpow2.f32 %v2763_v30  ;;  %v5147_v33 = vadd.f32 %v5478_v14, %v4167_v56 }
 0x244   : > { %v3614_v18 = vpop.eup %3613  ;;  %v1792_v26 = vmul.f32 %v3612_v50, %v5015_v47  ;;  %3633 = vpow2.f32 %v2765_v54  ;;  %v1867_v29 = vpack.c.bf16 %v1791_v1, %v1787_v63  ;;  %v5475_v47 = vld [vmem:[#allocation22_spill] sm:$0xff]  ;;  %v2768_v1 = vmul.f32 -1.442695, %v5138_v62 }
 0x245   : > { %v3616_v5 = vpop.eup %3615  ;;  %v1794_v39 = vmul.f32 %v3614_v18, %v5023_v34  ;;  %v1869_v20 = vpack.c.bf16 %v1793_v16, %v1789_v12  ;;  %3635 = vpow2.f32 %v2764_v32  ;;  %v5129_v28 = vadd.f32 %v5475_v47, %v4173_v59  ;;  %v5479_v32 = vld [vmem:[#allocation52_spill] sm:$0xff]  ;;  %v5480_v12 = vld [vmem:[#allocation53_spill] sm:$0xff] }
 0x246   : > { %v3618_v27 = vpop.eup %3617  ;;  %v1411_v11 = vadd.f32 1.0, %v3616_v5  ;;  %v1868_v23 = vpack.c.bf16 %v1792_v26, %v1788_v10  ;;  %3637 = vpow2.f32 %v2767_v60  ;;  %v5152_v50 = vadd.f32 %v5479_v32, %v4169_v57  ;;  %v5481_v60 = vld [vmem:[#allocation54_spill] sm:$0xff] }
 0x247   : > { %v3620_v53 = vpop.eup %3619  ;;  %v1413_v45 = vadd.f32 1.0, %v3618_v27  ;;  %v1870_v49 = vpack.c.bf16 %v1794_v39, %v1790_v46  ;;  %v2766_v8 = vmul.f32 -1.442695, %v5129_v28  ;;  %v5156_v16 = vadd.f32 %v5480_v12, %v4171_v58  ;;  %v5483_v46 = vld [vmem:[#allocation56_spill] sm:$0xff] }
 0x248   : > { %v3622_v2 = vpop.eup %3621  ;;  %3639 = vrcp.f32 %v1411_v11  ;;  %v1412_v19 = vadd.f32 1.0, %v3620_v53  ;;  %2274 = vmatprep.mubr.bf16.mxu0 %v1868_v23  ;;  %v5160_v18 = vadd.f32 %v5481_v60, %v4173_v59  ;;  %v5168_v39 = vadd.f32 %v5483_v46, %v4169_v57  ;;  %v5484_v53 = vld [vmem:[#allocation57_spill] sm:$0xff] }
 0x249   : > { %v3624_v15 = vpop.eup %3623  ;;  %3641 = vrcp.f32 %v1413_v45  ;;  %v1414_v34 = vadd.f32 1.0, %v3622_v2  ;;  %2435 = vmatprep.mubr.bf16.mxu1 %v1870_v49  ;;  %2275 = vmatmul.mubr.bf16.gmra.mrb[112].mxu0 %v1867_v29  ;;  %v5482_v29 = vld [vmem:[#allocation55_spill] sm:$0xff]  ;;  %v2770_v27 = vmul.f32 -1.442695, %v5142_v41  ;;  %v2771_v23 = vmul.f32 -1.442695, %v5147_v33 }
 0x24a   : > { %v3626_v51 = vpop.eup %3625  ;;  %3643 = vrcp.f32 %v1412_v19  ;;  %v1415_v6 = vadd.f32 1.0, %v3624_v15  ;;  %2436 = vmatmul.mubr.bf16.gmra.mrb[112].mxu1 %v1869_v20  ;;  %v5164_v5 = vadd.f32 %v5482_v29, %v4167_v56  ;;  %v5174_v45 = vadd.f32 %v5484_v53, %v4171_v58 }
 0x24b   : > { %v3628_v17 = vpop.eup %3627  ;;  %3645 = vrcp.f32 %v1414_v34  ;;  %v1417_v9 = vadd.f32 1.0, %v3626_v51  ;;  %v2773_v56 = vmul.f32 -1.442695, %v5152_v50  ;;  %v2772_v2 = vmul.f32 -1.442695, %v5156_v16 }
 0x24c   : > { %v3630_v38 = vpop.eup %3629  ;;  %3647 = vrcp.f32 %v1415_v6  ;;  %v1416_v3 = vadd.f32 1.0, %v3628_v17  ;;  %v2774_v19 = vmul.f32 -1.442695, %v5160_v18  ;;  %v2775_v47 = vmul.f32 -1.442695, %v5164_v5  ;;  %v5485_v6 = vld [vmem:[#allocation58_spill] sm:$0xff] }
 0x24d   : > { %v3632_v31 = vpop.eup %3631  ;;  %3649 = vrcp.f32 %v1417_v9  ;;  %v1418_v21 = vadd.f32 1.0, %v3630_v38  ;;  %v2777_v15 = vmul.f32 -1.442695, %v5168_v39  ;;  %v5185_v17 = vadd.f32 %v5485_v6, %v4173_v59 }
 0x24e   : > { %v3634_v37 = vpop.eup %3633  ;;  %3651 = vrcp.f32 %v1416_v3  ;;  %v1419_v52 = vadd.f32 1.0, %v3632_v31 }
 0x24f   : > { %3653 = vrcp.f32 %v1418_v21  ;;  %v1421_v30 = vadd.f32 1.0, %v3634_v37  ;;  %v3636_v54 = vpop.eup %3635 }
 0x250   : > { %3655 = vpow2.f32 %v2766_v8  ;;  %v3638_v63 = vpop.eup %3637  ;;  %v2776_v8 = vmul.f32 -1.442695, %v5174_v45  ;;  %v1420_v40 = vadd.f32 1.0, %v3636_v54 }
 0x251   : > { %3657 = vrcp.f32 %v1419_v52  ;;  %v1423_v26 = vadd.f32 1.0, %v3638_v63 }
 0x252   : > { %v3640_v10 = vpop.eup %3639  ;;  %3659 = vrcp.f32 %v1421_v30 }
 0x253   : > { %v3642_v20 = vpop.eup %3641  ;;  %3661 = vrcp.f32 %v1423_v26  ;;  %v1795_v51 = vmul.f32 %v3640_v10, %v5050_v24 }
 0x254   : > { %v3644_v11 = vpop.eup %3643  ;;  %3663 = vpow2.f32 %v2769_v25  ;;  %v1797_v38 = vmul.f32 %v3642_v20, %v5054_v7  ;;  %v2778_v7 = vmul.f32 -1.442695, %v5185_v17 }
 0x255   : > { %v3646_v49 = vpop.eup %3645  ;;  %3665 = vpow2.f32 %v2768_v1  ;;  %v1796_v21 = vmul.f32 %v3644_v11, %v5058_v43 }
 0x256   : > { %v3648_v57 = vpop.eup %3647  ;;  %3667 = vpow2.f32 %v2770_v27  ;;  %v1798_v37 = vmul.f32 %v3646_v49, %v5062_v55 }
 0x257   : > { %v3650_v34 = vpop.eup %3649  ;;  %v1799_v58 = vmul.f32 %v3648_v57, %v5066_v0  ;;  %3669 = vpow2.f32 %v2771_v23  ;;  %v5208_v57 = vld [vmem:[%s5351_s4] ss:$0 sm:$0xff] }
 0x258   : > { %v3652_v9 = vpop.eup %3651  ;;  %v1801_v3 = vmul.f32 %v3650_v34, %v5070_v44  ;;  %3671 = vpow2.f32 %v2773_v56 }
 0x259   : > { %v3654_v31 = vpop.eup %3653  ;;  %v1800_v24 = vmul.f32 %v3652_v9, %v5074_v48  ;;  %v1871_v0 = vpack.c.bf16 %v1799_v58, %v1795_v51  ;;  %3673 = vpow2.f32 %v2772_v2 }
 0x25a   : > { %v3656_v61 = vpop.eup %3655  ;;  %v1802_v59 = vmul.f32 %v3654_v31, %v5085_v13  ;;  %v1873_v52 = vpack.c.bf16 %v1801_v3, %v1797_v38  ;;  %3675 = vpow2.f32 %v2774_v19 }
 0x25b   : > { %v1872_v44 = vpack.c.bf16 %v1800_v24, %v1796_v21  ;;  %v3658_v30 = vpop.eup %3657  ;;  %3677 = vpow2.f32 %v2775_v47  ;;  %v1422_v48 = vadd.f32 1.0, %v3656_v61 }
 0x25c   : > { %v1874_v25 = vpack.c.bf16 %v1802_v59, %v1798_v37  ;;  %v5195_v43 = vpop.eup %3659  ;;  %3679 = vpow2.f32 %v2777_v15  ;;  %v5198_v13 = vmul.f32 %v3658_v30, %v5092_v22 }
 0x25d   : > { %2282 = vmatprep.mubr.bf16.mxu0 %v1872_v44  ;;  %v3662_v14 = vpop.eup %3661  ;;  %3681 = vpow2.f32 %v2776_v8 }
 0x25e   : > { %2443 = vmatprep.mubr.bf16.mxu1 %v1874_v25  ;;  %2283 = vmatmul.mubr.bf16.gmra.mrb[116].mxu0 %v1871_v0  ;;  %v3664_v55 = vpop.eup %3663  ;;  %v5201_v63 = vmul.f32 %v3662_v14, %v5114_v42  ;;  %3683 = vpow2.f32 %v2778_v7 }
 0x25f   : > { %2444 = vmatmul.mubr.bf16.gmra.mrb[116].mxu1 %v1873_v52  ;;  %v3666_v54 = vpop.eup %3665  ;;  %3685 = vrcp.f32 %v1420_v40  ;;  %v1425_v1 = vadd.f32 1.0, %v3664_v55  ;;  %v1805_v40 = vmul.f32 %v5195_v43, %v5099_v36 }
 0x260   : > { %v3668_v32 = vpop.eup %3667  ;;  %3687 = vrcp.f32 %v1422_v48  ;;  %v1424_v12 = vadd.f32 1.0, %v3666_v54  ;;  %v1875_v60 = vpack.c.bf16 %v5201_v63, %v5198_v13 }
 0x261   : > { %v3670_v10 = vpop.eup %3669  ;;  %3689 = vrcp.f32 %v1425_v1  ;;  %v1426_v26 = vadd.f32 1.0, %v3668_v32  ;;  %v2835_v53 = vpop.f32.mrb[64].mxu0 }
 0x262   : > { %v3672_v29 = vpop.eup %3671  ;;  %3691 = vrcp.f32 %v1424_v12  ;;  %v1427_v22 = vadd.f32 1.0, %v3670_v10  ;;  %v2947_v49 = vpop.f32.mrb[64].mxu1 }
 0x263   : > { %v3674_v46 = vpop.eup %3673  ;;  %3693 = vrcp.f32 %v1426_v26  ;;  %v1429_v42 = vadd.f32 1.0, %v3672_v29  ;;  %v2836_v19 = vpop.f32.mrb[65].mxu0 }
 0x264   : > { %v3676_v20 = vpop.eup %3675  ;;  %3695 = vrcp.f32 %v1427_v22  ;;  %v1428_v27 = vadd.f32 1.0, %v3674_v46  ;;  %v2948_v47 = vpop.f32.mrb[65].mxu1  ;;  %v2837_v51 = vadd.f32 %v2836_v19, %v2835_v53 }
 0x265   : > { %v3678_v11 = vpop.eup %3677  ;;  %3697 = vrcp.f32 %v1429_v42  ;;  %v1430_v23 = vadd.f32 1.0, %v3676_v20  ;;  %v2949_v58 = vadd.f32 %v2948_v47, %v2947_v49  ;;  %v2838_v6 = vpop.f32.mrb[66].mxu0 }
 0x266   : > { %v3680_v56 = vpop.eup %3679  ;;  %3699 = vrcp.f32 %v1428_v27  ;;  %v1431_v2 = vadd.f32 1.0, %v3678_v11  ;;  %v2950_v9 = vpop.f32.mrb[66].mxu1  ;;  %v2181_v0 = vadd.f32 %v2837_v51, %v5208_v57 }
 0x267   : > { %v3682_v15 = vpop.eup %3681  ;;  %3701 = vrcp.f32 %v1430_v23  ;;  %v1433_v34 = vadd.f32 1.0, %v3680_v56  ;;  %v2839_v8 = vpop.f32.mrb[67].mxu0 }
 0x268   : > { %v3684_v38 = vpop.eup %3683  ;;  %3703 = vrcp.f32 %v1431_v2  ;;  %v1432_v3 = vadd.f32 1.0, %v3682_v15  ;;  %v2951_v31 = vpop.f32.mrb[67].mxu1  ;;  %v2840_v61 = vadd.f32 %v2839_v8, %v2838_v6  ;;  %v2342_v7 = vadd.f32 %v2949_v58, %v2181_v0 }
 0x269   : > { %v3686_v21 = vpop.eup %3685  ;;  %3705 = vrcp.f32 %v1433_v34  ;;  %v1434_v24 = vadd.f32 1.0, %v3684_v38  ;;  %v2952_v59 = vadd.f32 %v2951_v31, %v2950_v9 }
 0x26a   : > { %v3688_v37 = vpop.eup %3687  ;;  %3707 = vrcp.f32 %v1432_v3  ;;  %v2184_v44 = vadd.f32 %v2840_v61, %v5208_v57  ;;  %v1804_v14 = vmul.f32 %v3686_v21, %v5109_v4  ;;  %2468 = vst [vmem:[%s5219_s12] sm:$0xff] %v2342_v7 }
 0x26b   : > { %v3690_v52 = vpop.eup %3689  ;;  %3709 = vrcp.f32 %v1434_v24  ;;  %v1806_v32 = vmul.f32 %v3688_v37, %v5129_v28 }
 0x26c   : > { %v3692_v30 = vpop.eup %3691  ;;  %v1809_v25 = vmul.f32 %v3690_v52, %v5134_v35  ;;  %v2345_v54 = vadd.f32 %v2952_v59, %v2184_v44 }
 0x26d   : > { %v3694_v48 = vpop.eup %3693  ;;  %v1808_v55 = vmul.f32 %v3692_v30, %v5138_v62 }
 0x26e   : > { %v3696_v1 = vpop.eup %3695  ;;  %v1810_v12 = vmul.f32 %v3694_v48, %v5142_v41  ;;  %v1877_v36 = vpack.c.bf16 %v1809_v25, %v1805_v40  ;;  %2469 = vst [vmem:[%s5219_s12 + $0x8] sm:$0xff] %v2345_v54 }
 0x26f   : > { %v3698_v43 = vpop.eup %3697  ;;  %v1876_v35 = vpack.c.bf16 %v1808_v55, %v1804_v14  ;;  %v1811_v22 = vmul.f32 %v3696_v1, %v5147_v33 }
 0x270   : > { %v3700_v10 = vpop.eup %3699  ;;  %v1878_v4 = vpack.c.bf16 %v1810_v12, %v1806_v32  ;;  %v1813_v46 = vmul.f32 %v3698_v43, %v5152_v50 }
 0x271   : > { %v3702_v26 = vpop.eup %3701  ;;  %2290 = vmatprep.mubr.bf16.mxu0 %v1876_v35  ;;  %v1812_v27 = vmul.f32 %v3700_v10, %v5156_v16 }
 0x272   : > { %v3704_v62 = vpop.eup %3703  ;;  %2451 = vmatprep.mubr.bf16.mxu1 %v1878_v4  ;;  %2291 = vmatmul.mubr.bf16.gmra.mrb[120].mxu0 %v1875_v60  ;;  %v1814_v13 = vmul.f32 %v3702_v26, %v5160_v18 }
 0x273   : > { %v3706_v29 = vpop.eup %3705  ;;  %v1815_v28 = vmul.f32 %v3704_v62, %v5164_v5  ;;  %2452 = vmatmul.mubr.bf16.gmra.mrb[120].mxu1 %v1877_v36 }
 0x274   : > { %v3708_v41 = vpop.eup %3707  ;;  %v1817_v42 = vmul.f32 %v3706_v29, %v5168_v39 }
 0x275   : > { %v3710_v20 = vpop.eup %3709  ;;  %v1816_v11 = vmul.f32 %v3708_v41, %v5174_v45  ;;  %v1879_v23 = vpack.c.bf16 %v1815_v28, %v1811_v22 }
 0x276   : > { %v2841_v53 = vpop.f32.mrb[68].mxu0  ;;  %v1818_v63 = vmul.f32 %v3710_v20, %v5185_v17  ;;  %v1881_v33 = vpack.c.bf16 %v1817_v42, %v1813_v46 }
 0x277   : > { %v2953_v60 = vpop.f32.mrb[68].mxu1  ;;  %v2842_v5 = vpop.f32.mrb[69].mxu0  ;;  %v1880_v49 = vpack.c.bf16 %v1816_v11, %v1812_v27 }
 0x278   : > { %v2843_v56 = vadd.f32 %v2842_v5, %v2841_v53  ;;  %v2954_v2 = vpop.f32.mrb[69].mxu1  ;;  %v2844_v50 = vpop.f32.mrb[70].mxu0  ;;  %v1882_v39 = vpack.c.bf16 %v1818_v63, %v1814_v13 }
 0x279   : > { %v2955_v19 = vadd.f32 %v2954_v2, %v2953_v60  ;;  %v2956_v47 = vpop.f32.mrb[70].mxu1  ;;  %v2845_v16 = vpop.f32.mrb[71].mxu0  ;;  %2298 = vmatprep.mubr.bf16.mxu0 %v1880_v49 }
 0x27a   : > { %v2189_v45 = vadd.f32 %v2843_v56, %v5208_v57  ;;  %v2846_v15 = vadd.f32 %v2845_v16, %v2844_v50  ;;  %v2957_v18 = vpop.f32.mrb[71].mxu1  ;;  %2459 = vmatprep.mubr.bf16.mxu1 %v1882_v39  ;;  %2299 = vmatmul.mubr.bf16.gmra.mrb[124].mxu0 %v1879_v23 }
 0x27b   : > { %v2958_v17 = vadd.f32 %v2957_v18, %v2956_v47  ;;  %2460 = vmatmul.mubr.bf16.gmra.mrb[124].mxu1 %v1881_v33 }
 0x27c   : > { %v2350_v34 = vadd.f32 %v2955_v19, %v2189_v45  ;;  %v2192_v51 = vadd.f32 %v2846_v15, %v5208_v57 }
 0x27e   : > { %2470 = vst [vmem:[%s5219_s12 + $0x10] sm:$0xff] %v2350_v34  ;;  %v2353_v58 = vadd.f32 %v2958_v17, %v2192_v51  ;;  %v2847_v6 = vpop.f32.mrb[72].mxu0 }
 0x27f   : > { %v2959_v9 = vpop.f32.mrb[72].mxu1  ;;  %v2848_v38 = vpop.f32.mrb[73].mxu0 }
 0x280   : > { %2471 = vst [vmem:[%s5219_s12 + $0x18] sm:$0xff] %v2353_v58  ;;  %v2849_v3 = vadd.f32 %v2848_v38, %v2847_v6  ;;  %v2960_v8 = vpop.f32.mrb[73].mxu1  ;;  %v2850_v31 = vpop.f32.mrb[74].mxu0 }
 0x281   : > { %v2961_v21 = vadd.f32 %v2960_v8, %v2959_v9  ;;  %v2962_v24 = vpop.f32.mrb[74].mxu1  ;;  %v2851_v0 = vpop.f32.mrb[75].mxu0 }
 0x282   : > { %v2197_v61 = vadd.f32 %v2849_v3, %v5208_v57  ;;  %v2852_v37 = vadd.f32 %v2851_v0, %v2850_v31  ;;  %v2963_v59 = vpop.f32.mrb[75].mxu1 }
 0x283   : > { %v2964_v52 = vadd.f32 %v2963_v59, %v2962_v24 }
 0x284   : > { %v2358_v7 = vadd.f32 %v2961_v21, %v2197_v61  ;;  %v2200_v44 = vadd.f32 %v2852_v37, %v5208_v57 }
 0x286   : > { %2472 = vst [vmem:[%s5219_s12 + $0x20] sm:$0xff] %v2358_v7  ;;  %v2361_v30 = vadd.f32 %v2964_v52, %v2200_v44 }
 0x288   : > { %2473 = vst [vmem:[%s5219_s12 + $0x28] sm:$0xff] %v2361_v30 }
 0x293   : > { %v2853_v40 = vpop.f32.mrb[76].mxu0 }
 0x294   : > { %v2965_v25 = vpop.f32.mrb[76].mxu1  ;;  %v2854_v48 = vpop.f32.mrb[77].mxu0 }
 0x295   : > { %v2855_v14 = vadd.f32 %v2854_v48, %v2853_v40  ;;  %v2966_v55 = vpop.f32.mrb[77].mxu1  ;;  %v2856_v54 = vpop.f32.mrb[78].mxu0 }
 0x296   : > { %v2967_v1 = vadd.f32 %v2966_v55, %v2965_v25  ;;  %v2968_v32 = vpop.f32.mrb[78].mxu1  ;;  %v2857_v12 = vpop.f32.mrb[79].mxu0 }
 0x297   : > { %v2205_v36 = vadd.f32 %v2855_v14, %v5208_v57  ;;  %v2858_v43 = vadd.f32 %v2857_v12, %v2856_v54  ;;  %v2969_v35 = vpop.f32.mrb[79].mxu1 }
 0x298   : > { %v2970_v10 = vadd.f32 %v2969_v35, %v2968_v32 }
 0x299   : > { %v2366_v4 = vadd.f32 %v2967_v1, %v2205_v36  ;;  %v2208_v26 = vadd.f32 %v2858_v43, %v5208_v57 }
 0x29b   : > { %2474 = vst [vmem:[%s5219_s12 + $0x30] sm:$0xff] %v2366_v4  ;;  %v2369_v62 = vadd.f32 %v2970_v10, %v2208_v26  ;;  %v2859_v29 = vpop.f32.mrb[80].mxu0 }
 0x29c   : > { %v2860_v22 = vpop.f32.mrb[81].mxu0 }
 0x29d   : > { %2475 = vst [vmem:[%s5219_s12 + $0x38] sm:$0xff] %v2369_v62  ;;  %v2861_v28 = vadd.f32 %v2860_v22, %v2859_v29  ;;  %v2862_v41 = vpop.f32.mrb[82].mxu0 }
 0x29e   : > { %v2863_v46 = vpop.f32.mrb[83].mxu0 }
 0x29f   : > { %v2864_v42 = vadd.f32 %v2863_v46, %v2862_v41  ;;  %v2213_v27 = vadd.f32 %v2861_v28, %v5208_v57 }
 0x2a1   : > { %v2216_v13 = vadd.f32 %v2864_v42, %v5208_v57 }
 0x2aa   : > { %v2971_v20 = vpop.f32.mrb[80].mxu1 }
 0x2ab   : > { %v2972_v11 = vpop.f32.mrb[81].mxu1 }
 0x2ac   : > { %v2973_v23 = vadd.f32 %v2972_v11, %v2971_v20  ;;  %v2974_v53 = vpop.f32.mrb[82].mxu1 }
 0x2ad   : > { %v2975_v63 = vpop.f32.mrb[83].mxu1 }
 0x2ae   : > { %v2374_v33 = vadd.f32 %v2973_v23, %v2213_v27  ;;  %v2976_v60 = vadd.f32 %v2975_v63, %v2974_v53 }
 0x2b0   : > { %2476 = vst [vmem:[%s5219_s12 + $0x40] sm:$0xff] %v2374_v33  ;;  %v2377_v5 = vadd.f32 %v2976_v60, %v2216_v13  ;;  %v2865_v49 = vpop.f32.mrb[84].mxu0 }
 0x2b1   : > { %v2866_v2 = vpop.f32.mrb[85].mxu0 }
 0x2b2   : > { %2477 = vst [vmem:[%s5219_s12 + $0x48] sm:$0xff] %v2377_v5  ;;  %v2977_v56 = vpop.f32.mrb[84].mxu1  ;;  %v2867_v50 = vadd.f32 %v2866_v2, %v2865_v49  ;;  %v2868_v19 = vpop.f32.mrb[86].mxu0 }
 0x2b3   : > { %v2978_v39 = vpop.f32.mrb[85].mxu1  ;;  %v2869_v45 = vpop.f32.mrb[87].mxu0 }
 0x2b4   : > { %v2979_v47 = vadd.f32 %v2978_v39, %v2977_v56  ;;  %v2980_v16 = vpop.f32.mrb[86].mxu1  ;;  %v2221_v15 = vadd.f32 %v2867_v50, %v5208_v57  ;;  %v2870_v18 = vadd.f32 %v2869_v45, %v2868_v19 }
 0x2b5   : > { %v2981_v17 = vpop.f32.mrb[87].mxu1 }
 0x2b6   : > { %v2982_v34 = vadd.f32 %v2981_v17, %v2980_v16  ;;  %v2382_v51 = vadd.f32 %v2979_v47, %v2221_v15  ;;  %v2224_v58 = vadd.f32 %v2870_v18, %v5208_v57 }
 0x2b8   : > { %2478 = vst [vmem:[%s5219_s12 + $0x50] sm:$0xff] %v2382_v51  ;;  %v2385_v6 = vadd.f32 %v2982_v34, %v2224_v58 }
 0x2ba   : > { %2479 = vst [vmem:[%s5219_s12 + $0x58] sm:$0xff] %v2385_v6 }
 0x2c5   : > { %v2871_v9 = vpop.f32.mrb[88].mxu0 }
 0x2c6   : > { %v2983_v38 = vpop.f32.mrb[88].mxu1  ;;  %v2872_v3 = vpop.f32.mrb[89].mxu0 }
 0x2c7   : > { %v2873_v8 = vadd.f32 %v2872_v3, %v2871_v9  ;;  %v2984_v31 = vpop.f32.mrb[89].mxu1  ;;  %v2874_v21 = vpop.f32.mrb[90].mxu0 }
 0x2c8   : > { %v2985_v24 = vadd.f32 %v2984_v31, %v2983_v38  ;;  %v2986_v0 = vpop.f32.mrb[90].mxu1  ;;  %v2875_v61 = vpop.f32.mrb[91].mxu0 }
 0x2c9   : > { %v2229_v37 = vadd.f32 %v2873_v8, %v5208_v57  ;;  %v2876_v59 = vadd.f32 %v2875_v61, %v2874_v21  ;;  %v2987_v52 = vpop.f32.mrb[91].mxu1 }
 0x2ca   : > { %v2988_v7 = vadd.f32 %v2987_v52, %v2986_v0 }
 0x2cb   : > { %v2390_v44 = vadd.f32 %v2985_v24, %v2229_v37  ;;  %v2232_v30 = vadd.f32 %v2876_v59, %v5208_v57 }
 0x2cd   : > { %2480 = vst [vmem:[%s5219_s12 + $0x60] sm:$0xff] %v2390_v44  ;;  %v2393_v40 = vadd.f32 %v2988_v7, %v2232_v30  ;;  %v2877_v25 = vpop.f32.mrb[92].mxu0 }
 0x2ce   : > { %v2989_v48 = vpop.f32.mrb[92].mxu1  ;;  %v2878_v14 = vpop.f32.mrb[93].mxu0 }
 0x2cf   : > { %2481 = vst [vmem:[%s5219_s12 + $0x68] sm:$0xff] %v2393_v40  ;;  %v2879_v55 = vadd.f32 %v2878_v14, %v2877_v25  ;;  %v2990_v54 = vpop.f32.mrb[93].mxu1  ;;  %v2880_v1 = vpop.f32.mrb[94].mxu0 }
 0x2d0   : > { %v2991_v32 = vadd.f32 %v2990_v54, %v2989_v48  ;;  %v2992_v12 = vpop.f32.mrb[94].mxu1  ;;  %v2881_v36 = vpop.f32.mrb[95].mxu0 }
 0x2d1   : > { %v2237_v43 = vadd.f32 %v2879_v55, %v5208_v57  ;;  %v2882_v35 = vadd.f32 %v2881_v36, %v2880_v1  ;;  %v2993_v10 = vpop.f32.mrb[95].mxu1 }
 0x2d2   : > { %v2994_v4 = vadd.f32 %v2993_v10, %v2992_v12 }
 0x2d3   : > { %v2398_v26 = vadd.f32 %v2991_v32, %v2237_v43  ;;  %v2240_v62 = vadd.f32 %v2882_v35, %v5208_v57 }
 0x2d5   : > { %2482 = vst [vmem:[%s5219_s12 + $0x70] sm:$0xff] %v2398_v26  ;;  %v2401_v29 = vadd.f32 %v2994_v4, %v2240_v62 }
 0x2d7   : > { %2483 = vst [vmem:[%s5219_s12 + $0x78] sm:$0xff] %v2401_v29 }
 0x2e2   : > { %v2883_v22 = vpop.f32.mrb[96].mxu0 }
 0x2e3   : > { %v2995_v28 = vpop.f32.mrb[96].mxu1  ;;  %v2884_v41 = vpop.f32.mrb[97].mxu0 }
 0x2e4   : > { %v2885_v46 = vadd.f32 %v2884_v41, %v2883_v22  ;;  %v2996_v42 = vpop.f32.mrb[97].mxu1  ;;  %v2886_v20 = vpop.f32.mrb[98].mxu0 }
 0x2e5   : > { %v2997_v27 = vadd.f32 %v2996_v42, %v2995_v28  ;;  %v2998_v11 = vpop.f32.mrb[98].mxu1  ;;  %v2887_v23 = vpop.f32.mrb[99].mxu0 }
 0x2e6   : > { %v2245_v53 = vadd.f32 %v2885_v46, %v5208_v57  ;;  %v2888_v13 = vadd.f32 %v2887_v23, %v2886_v20  ;;  %v2999_v63 = vpop.f32.mrb[99].mxu1 }
 0x2e7   : > { %v3000_v33 = vadd.f32 %v2999_v63, %v2998_v11 }
 0x2e8   : > { %v2406_v60 = vadd.f32 %v2997_v27, %v2245_v53  ;;  %v2248_v5 = vadd.f32 %v2888_v13, %v5208_v57 }
 0x2ea   : > { %2484 = vst [vmem:[%s5219_s12 + $0x80] sm:$0xff] %v2406_v60  ;;  %v2409_v49 = vadd.f32 %v3000_v33, %v2248_v5 }
 0x2ec   : > { %2485 = vst [vmem:[%s5219_s12 + $0x88] sm:$0xff] %v2409_v49 }
 0x2f7   : > { %v2889_v56 = vpop.f32.mrb[100].mxu0 }
 0x2f8   : > { %v3001_v2 = vpop.f32.mrb[100].mxu1  ;;  %v2890_v50 = vpop.f32.mrb[101].mxu0 }
 0x2f9   : > { %v2891_v39 = vadd.f32 %v2890_v50, %v2889_v56  ;;  %v3002_v19 = vpop.f32.mrb[101].mxu1  ;;  %v2892_v47 = vpop.f32.mrb[102].mxu0 }
 0x2fa   : > { %v3003_v16 = vadd.f32 %v3002_v19, %v3001_v2  ;;  %v3004_v45 = vpop.f32.mrb[102].mxu1  ;;  %v2893_v15 = vpop.f32.mrb[103].mxu0 }
 0x2fb   : > { %v2253_v18 = vadd.f32 %v2891_v39, %v5208_v57  ;;  %v2894_v17 = vadd.f32 %v2893_v15, %v2892_v47  ;;  %v3005_v34 = vpop.f32.mrb[103].mxu1 }
 0x2fc   : > { %v3006_v51 = vadd.f32 %v3005_v34, %v3004_v45 }
 0x2fd   : > { %v2414_v58 = vadd.f32 %v3003_v16, %v2253_v18  ;;  %v2256_v6 = vadd.f32 %v2894_v17, %v5208_v57 }
 0x2ff   : > { %2486 = vst [vmem:[%s5219_s12 + $0x90] sm:$0xff] %v2414_v58  ;;  %v2417_v9 = vadd.f32 %v3006_v51, %v2256_v6  ;;  %v2895_v38 = vpop.f32.mrb[104].mxu0 }
 0x300   : > { %v3007_v3 = vpop.f32.mrb[104].mxu1  ;;  %v2896_v8 = vpop.f32.mrb[105].mxu0 }
 0x301   : > { %2487 = vst [vmem:[%s5219_s12 + $0x98] sm:$0xff] %v2417_v9  ;;  %v2897_v31 = vadd.f32 %v2896_v8, %v2895_v38  ;;  %v3008_v21 = vpop.f32.mrb[105].mxu1  ;;  %v2898_v24 = vpop.f32.mrb[106].mxu0 }
 0x302   : > { %v3009_v0 = vadd.f32 %v3008_v21, %v3007_v3  ;;  %v3010_v61 = vpop.f32.mrb[106].mxu1  ;;  %v2899_v37 = vpop.f32.mrb[107].mxu0 }
 0x303   : > { %v2261_v59 = vadd.f32 %v2897_v31, %v5208_v57  ;;  %v2900_v52 = vadd.f32 %v2899_v37, %v2898_v24  ;;  %v3011_v7 = vpop.f32.mrb[107].mxu1 }
 0x304   : > { %v3012_v44 = vadd.f32 %v3011_v7, %v3010_v61 }
 0x305   : > { %v2422_v30 = vadd.f32 %v3009_v0, %v2261_v59  ;;  %v2264_v40 = vadd.f32 %v2900_v52, %v5208_v57 }
 0x307   : > { %2488 = vst [vmem:[%s5219_s12 + $0xa0] sm:$0xff] %v2422_v30  ;;  %v2425_v25 = vadd.f32 %v3012_v44, %v2264_v40 }
 0x309   : > { %2489 = vst [vmem:[%s5219_s12 + $0xa8] sm:$0xff] %v2425_v25 }
 0x314   : > { %v2901_v48 = vpop.f32.mrb[108].mxu0 }
 0x315   : > { %v3013_v14 = vpop.f32.mrb[108].mxu1  ;;  %v2902_v55 = vpop.f32.mrb[109].mxu0 }
 0x316   : > { %v2903_v54 = vadd.f32 %v2902_v55, %v2901_v48  ;;  %v3014_v1 = vpop.f32.mrb[109].mxu1  ;;  %v2904_v32 = vpop.f32.mrb[110].mxu0 }
 0x317   : > { %v3015_v12 = vadd.f32 %v3014_v1, %v3013_v14  ;;  %v3016_v36 = vpop.f32.mrb[110].mxu1  ;;  %v2905_v43 = vpop.f32.mrb[111].mxu0 }
 0x318   : > { %v2269_v35 = vadd.f32 %v2903_v54, %v5208_v57  ;;  %v2906_v10 = vadd.f32 %v2905_v43, %v2904_v32  ;;  %v3017_v4 = vpop.f32.mrb[111].mxu1 }
 0x319   : > { %v3018_v26 = vadd.f32 %v3017_v4, %v3016_v36 }
 0x31a   : > { %v2430_v62 = vadd.f32 %v3015_v12, %v2269_v35  ;;  %v2272_v29 = vadd.f32 %v2906_v10, %v5208_v57 }
 0x31c   : > { %2490 = vst [vmem:[%s5219_s12 + $0xb0] sm:$0xff] %v2430_v62  ;;  %v2433_v22 = vadd.f32 %v3018_v26, %v2272_v29  ;;  %v2907_v28 = vpop.f32.mrb[112].mxu0 }
 0x31d   : > { %v3019_v41 = vpop.f32.mrb[112].mxu1  ;;  %v2908_v46 = vpop.f32.mrb[113].mxu0 }
 0x31e   : > { %2491 = vst [vmem:[%s5219_s12 + $0xb8] sm:$0xff] %v2433_v22  ;;  %v2909_v42 = vadd.f32 %v2908_v46, %v2907_v28  ;;  %v3020_v20 = vpop.f32.mrb[113].mxu1  ;;  %v2910_v27 = vpop.f32.mrb[114].mxu0 }
 0x31f   : > { %v3021_v11 = vadd.f32 %v3020_v20, %v3019_v41  ;;  %v3022_v23 = vpop.f32.mrb[114].mxu1  ;;  %v2911_v53 = vpop.f32.mrb[115].mxu0 }
 0x320   : > { %v2277_v13 = vadd.f32 %v2909_v42, %v5208_v57  ;;  %v2912_v63 = vadd.f32 %v2911_v53, %v2910_v27  ;;  %v3023_v33 = vpop.f32.mrb[115].mxu1 }
 0x321   : > { %v3024_v60 = vadd.f32 %v3023_v33, %v3022_v23 }
 0x322   : > { %v2438_v5 = vadd.f32 %v3021_v11, %v2277_v13  ;;  %v2280_v49 = vadd.f32 %v2912_v63, %v5208_v57 }
 0x324   : > { %2492 = vst [vmem:[%s5219_s12 + $0xc0] sm:$0xff] %v2438_v5  ;;  %v2441_v56 = vadd.f32 %v3024_v60, %v2280_v49 }
 0x326   : > { %2493 = vst [vmem:[%s5219_s12 + $0xc8] sm:$0xff] %v2441_v56 }
 0x331   : > { %v2913_v2 = vpop.f32.mrb[116].mxu0 }
 0x332   : > { %v3025_v50 = vpop.f32.mrb[116].mxu1  ;;  %v2914_v39 = vpop.f32.mrb[117].mxu0 }
 0x333   : > { %v2915_v19 = vadd.f32 %v2914_v39, %v2913_v2  ;;  %v3026_v47 = vpop.f32.mrb[117].mxu1  ;;  %v2916_v16 = vpop.f32.mrb[118].mxu0 }
 0x334   : > { %v3027_v45 = vadd.f32 %v3026_v47, %v3025_v50  ;;  %v3028_v15 = vpop.f32.mrb[118].mxu1  ;;  %v2917_v18 = vpop.f32.mrb[119].mxu0 }
 0x335   : > { %v2285_v17 = vadd.f32 %v2915_v19, %v5208_v57  ;;  %v2918_v34 = vadd.f32 %v2917_v18, %v2916_v16  ;;  %v3029_v51 = vpop.f32.mrb[119].mxu1 }
 0x336   : > { %v3030_v58 = vadd.f32 %v3029_v51, %v3028_v15 }
 0x337   : > { %v2446_v6 = vadd.f32 %v3027_v45, %v2285_v17  ;;  %v2288_v9 = vadd.f32 %v2918_v34, %v5208_v57 }
 0x339   : > { %2494 = vst [vmem:[%s5219_s12 + $0xd0] sm:$0xff] %v2446_v6  ;;  %v2449_v38 = vadd.f32 %v3030_v58, %v2288_v9 }
 0x33b   : > { %2495 = vst [vmem:[%s5219_s12 + $0xd8] sm:$0xff] %v2449_v38 }
 0x345   : > { %v2919_v3 = vpop.f32.mrb[120].mxu0 }
 0x346   : > { %v3031_v8 = vpop.f32.mrb[120].mxu1  ;;  %v2920_v31 = vpop.f32.mrb[121].mxu0 }
 0x347   : > { %v2921_v21 = vadd.f32 %v2920_v31, %v2919_v3  ;;  %v3032_v24 = vpop.f32.mrb[121].mxu1  ;;  %v2922_v0 = vpop.f32.mrb[122].mxu0 }
 0x348   : > { %v3033_v61 = vadd.f32 %v3032_v24, %v3031_v8  ;;  %v3034_v37 = vpop.f32.mrb[122].mxu1  ;;  %v2923_v59 = vpop.f32.mrb[123].mxu0 }
 0x349   : > { %v2293_v52 = vadd.f32 %v2921_v21, %v5208_v57  ;;  %v2924_v7 = vadd.f32 %v2923_v59, %v2922_v0  ;;  %v3035_v44 = vpop.f32.mrb[123].mxu1 }
 0x34a   : > { %v3036_v30 = vadd.f32 %v3035_v44, %v3034_v37 }
 0x34b   : > { %v2454_v40 = vadd.f32 %v3033_v61, %v2293_v52  ;;  %v2296_v25 = vadd.f32 %v2924_v7, %v5208_v57 }
 0x34d   : > { %2496 = vst [vmem:[%s5219_s12 + $0xe0] sm:$0xff] %v2454_v40  ;;  %v2457_v48 = vadd.f32 %v3036_v30, %v2296_v25  ;;  %v2925_v14 = vpop.f32.mrb[124].mxu0 }
 0x34e   : > { %v3037_v55 = vpop.f32.mrb[124].mxu1  ;;  %v2926_v54 = vpop.f32.mrb[125].mxu0 }
 0x34f   : > { %2497 = vst [vmem:[%s5219_s12 + $0xe8] sm:$0xff] %v2457_v48  ;;  %v2927_v1 = vadd.f32 %v2926_v54, %v2925_v14  ;;  %v3038_v32 = vpop.f32.mrb[125].mxu1  ;;  %v2928_v12 = vpop.f32.mrb[126].mxu0 }
 0x350   : > { %v3039_v36 = vadd.f32 %v3038_v32, %v3037_v55  ;;  %v3040_v43 = vpop.f32.mrb[126].mxu1  ;;  %v2929_v35 = vpop.f32.mrb[127].mxu0 }
 0x351   : > { %v2301_v10 = vadd.f32 %v2927_v1, %v5208_v57  ;;  %v2930_v4 = vadd.f32 %v2929_v35, %v2928_v12  ;;  %v3041_v26 = vpop.f32.mrb[127].mxu1 }
 0x352   : > { %v3042_v62 = vadd.f32 %v3041_v26, %v3040_v43 }
 0x353   : > { %v2462_v29 = vadd.f32 %v3039_v36, %v2301_v10  ;;  %v2304_v22 = vadd.f32 %v2930_v4, %v5208_v57 }
 0x355   : > { %2498 = vst [vmem:[%s5219_s12 + $0xf0] sm:$0xff] %v2462_v29  ;;  %v2465_v28 = vadd.f32 %v3042_v62, %v2304_v22 }
 0x357   : > { %2499 = vst [vmem:[%s5219_s12 + $0xf8] sm:$0xff] %v2465_v28 }
 0x358   : > { %3810 = shalt.err (!%p3807_p2)
}
 0x359   : > { %s3811_s6 = scalar_lea.hbm %s5299_s11, 4096  ;;  %s3815_s10 = scalar_lea.hbm %s5352_s5, 8192 }
 0x35a   : > { %p3812_p13 = scmp.ne.s32.totalorder %s5299_s11, %s3811_s6  ;;  %p3816_p4 = scmp.lt.u32.totalorder %s5299_s11, %s5352_s5 }
 0x35b   : > { %p3817_p7 = scmp.lt.u32.totalorder %s3815_s10, %s3811_s6  ;;  %p3819_p11 = scmp.lt.u32.totalorder %s3811_s6, %s5299_s11 }
 0x35c   : > { %p3813_p6 = pnand %p3812_p13, %p5486_p0 }
 0x35d   : > { %p3818_p8 = por %p3817_p7, %p3816_p4 }
 0x35e   : > { %p3814_p10 = pneg %p3813_p6 }
 0x35f   : > { %p3820_p1 = por %p3819_p11, %p3818_p8 }
 0x361   : > { %p3821_p3 = pnand %p3820_p1, %p3814_p10 }
 0x363   : > { %3824 = shalt.err (!%p3821_p3)
}
 0x364   : > { %s3880_s13 = smov 128   ;;  %s3881_s8 = smov 8  }
 0x365   : > { %3053 = dma.vmem_to_hbm [thread:$0]  (%p5486_p0), %s5301_s29, 4096, %s5299_s11, %s2501_s14, %s3880_s13, %s3880_s13, %s3881_s8  }
 0x366 PF: > { %s2529_s9 = sand.u32 1, %s3855_s18   ;;  %p5487_p5 = scmp.ne.s32.totalorder %s5360_s25, 0 }
 0x367   : > { %p5488_p9 = scmp.ge.s32.totalorder %s3867_s21, 2  ;;  %s2530_s22 = scalar_lea.sflag [#allocation4], %s2529_s9 }
 0x369   : > { %p3067_p12 = pnand %p5488_p9, %p5487_p5 }
 0x36b   : > { %3850 = dma.done.wait (!%p3067_p12), %s2530_s22, 4096  }
 0x36c   : > { %3852 = vsyncadd (!%p3067_p12), %s2530_s22, 4294963200  ;;  %p19_p2 = scmp.ge.s32.totalorder %s4022_s16, 4   ;;  %s5489_s18 = smov %s3859_s19 }
 0x36d   : > { %s5490_s19 = smov %s3863_s20  ;;  %s5491_s20 = smov %s4031_s27 }
 0x36e   : > { %s5492_s21 = smov %s4022_s16  ;;  %21 = sbr.rel (!%p19_p2) target bundleno = 6 (0x6), region = 93 }
 0x375   :  { %2535 = vsyncpa [#allocation3], 1 }
 0x376   :  { %2537 = vsyncpa [#allocation3 + $0x1], 1 }
 0x377   :  { %2538 = vsyncpa [#allocation6], 1 }
 0x378   :  { %2539 = vsyncpa [#allocation4], 1 }
 0x379   :  { %2541 = vsyncpa [#allocation4 + $0x1], 1 }

</bundles_post_ra>
